<compile_context>
chip_gen: v5e
topology: v5e:2x2
jax: 0.10.0
libtpu: 0.0.40
codegen_flags: <defaults>
</compile_context>

<pallas_src>
import math
import functools

import jax
import jax.numpy as jnp
from jax.experimental import pallas as pl
from jax.experimental.pallas import tpu as pltpu

# ----------------------------- config ---------------------------------------
D_MODEL = 32
NUM_HEADS = 4
D_FF = 64
N_ENC_LAYERS = 2
N_DEC_LAYERS = 2
SRC_VOCAB = 50
TGT_VOCAB = 50
MAX_SEQ = 64
LN_EPS = 1e-5          # nn.LayerNorm default
VOCAB_PAD = 128        # lane-dense logits output; sliced back to TGT_VOCAB outside

# ------------------------- per-layer weight slab layout ----------------------
# One (SLAB_ROWS, 128) f32 slab per layer; row offsets below.  Encoder layers
# leave the cross-attention rows zero.  Lane dim padded to 128 (lane-dense DMA).
_R_WQKV = 0                       # (D, 3D)  fused self-attn QKV weight
_R_WO = _R_WQKV + D_MODEL         # (D, D)   self-attn out-proj weight
_R_W1 = _R_WO + D_MODEL           # (D, F)   FFN in weight
_R_W2 = _R_W1 + D_MODEL           # (F, D)   FFN out weight
_R_CWQ = _R_W2 + D_FF             # (D, D)   cross-attn Q weight (decoder only)
_R_CWKV = _R_CWQ + D_MODEL        # (D, 2D)  fused cross-attn KV weight (decoder only)
_R_CWO = _R_CWKV + D_MODEL        # (D, D)   cross-attn out-proj weight (decoder only)
_R_VEC = _R_CWO + D_MODEL         # start of 1-row vectors (biases / LN params)
(_V_BQKV, _V_BO, _V_LN1G, _V_LN1B, _V_B1, _V_B2, _V_LNFG, _V_LNFB,
 _V_CBQ, _V_CBKV, _V_CBO, _V_LN2G, _V_LN2B) = range(_R_VEC, _R_VEC + 13)
SLAB_LANES = 128
SLAB_ROWS = ((_R_VEC + 13 + 7) // 8) * 8   # 272

assert 3 * D_MODEL <= SLAB_LANES and D_FF <= SLAB_LANES
assert TGT_VOCAB <= VOCAB_PAD


# ----------------------- in-kernel building blocks ---------------------------
def _add_layernorm(x, y, g, b):
    # residual add + LayerNorm over last axis (f32 math)
    z = x + y
    mean = jnp.mean(z, axis=-1, keepdims=True)
    var = jnp.mean(jnp.square(z - mean), axis=-1, keepdims=True)
    return (z - mean) * jax.lax.rsqrt(var + LN_EPS) * g + b


def _mha(q2d, k2d, v2d, wo, bo, B, Sq, Sk, H, dk):
    # q2d: (B*Sq, H*dk); k2d/v2d: (B*Sk, H*dk); wo: (H*dk, D); bo: (1, D)
    D = H * dk
    scale = 1.0 / math.sqrt(dk)
    q = q2d.reshape(B, Sq, D)
    k = k2d.reshape(B, Sk, D)
    v = v2d.reshape(B, Sk, D)
    # Heads stacked along the leading (batch) axis -> one batched score einsum,
    # one softmax pass and one context einsum (instead of a 4x per-head unroll).
    qh = jnp.concatenate([q[:, :, h * dk:(h + 1) * dk] for h in range(H)], axis=0)
    kh = jnp.concatenate([k[:, :, h * dk:(h + 1) * dk] for h in range(H)], axis=0)
    vh = jnp.concatenate([v[:, :, h * dk:(h + 1) * dk] for h in range(H)], axis=0)
    s = jnp.einsum('bqd,bkd->bqk', qh, kh,
                   preferred_element_type=jnp.float32) * scale      # (H*B, Sq, Sk)
    m = jnp.max(s, axis=-1, keepdims=True)
    p = jnp.exp(s - m)
    p = p * pl.reciprocal(jnp.sum(p, axis=-1, keepdims=True), approx=True)
    ctx = jnp.einsum('bqk,bkd->bqd', p, vh,
                     preferred_element_type=jnp.float32)            # (H*B, Sq, dk)
    # Output projection folded over heads: ctx_full @ W_o == sum_h ctx_h @ W_o[h*dk:].
    # (Avoids a sub-128-lane concatenate; identical math, 4 tiny extra MXU pushes.)
    out = bo
    for h in range(H):
        ctx_h = ctx[h * B:(h + 1) * B].reshape(B * Sq, dk)
        out = out + jnp.dot(ctx_h, wo[h * dk:(h + 1) * dk, :],
                            preferred_element_type=jnp.float32)
    return out


def _self_attention(x2d, wqkv, bqkv, wo, bo, B, S, H, dk):
    D = H * dk
    qkv = jnp.dot(x2d, wqkv, preferred_element_type=jnp.float32) + bqkv   # (M, 3D)
    return _mha(qkv[:, :D], qkv[:, D:2 * D], qkv[:, 2 * D:], wo, bo, B, S, S, H, dk)


def _cross_attention(y2d, enc2d, wq, bq, wkv, bkv, wo, bo, B, Sq, Sk, H, dk):
    D = H * dk
    q = jnp.dot(y2d, wq, preferred_element_type=jnp.float32) + bq          # (Mq, D)
    kv = jnp.dot(enc2d, wkv, preferred_element_type=jnp.float32) + bkv     # (Mk, 2D)
    return _mha(q, kv[:, :D], kv[:, D:], wo, bo, B, Sq, Sk, H, dk)


def _ffn(x2d, w1, b1, w2, b2):
    h = jnp.maximum(jnp.dot(x2d, w1, preferred_element_type=jnp.float32) + b1, 0.0)
    return jnp.dot(h, w2, preferred_element_type=jnp.float32) + b2


# ----------------------------- fused Pallas kernel ----------------------------
def _transformer_kernel(x_in_ref, y_in_ref, slab_ref, fw_ref, fb_ref,
                        logits_ref, x_scr, y_scr, *,
                        B, Ss, St, H, dk, n_enc):
    layer = pl.program_id(0)
    D = H * dk
    F = D_FF

    slab = slab_ref.at[0]                       # (SLAB_ROWS, 128) view, no load

    def mat(row, rows, cols):
        return slab[row:row + rows, :cols]      # static slice load

    def vec(row, cols):
        return slab[row:row + 1, :cols]         # (1, cols)

    @pl.when(layer == 0)
    def _():
        x_scr[...] = x_in_ref[...]
        y_scr[...] = y_in_ref[...]
        logits_ref[...] = jnp.zeros_like(logits_ref)

    # Shared per-layer parameters (one slab DMA per grid step).
    wqkv = mat(_R_WQKV, D, 3 * D)
    bqkv = vec(_V_BQKV, 3 * D)
    wo = mat(_R_WO, D, D)
    bo = vec(_V_BO, D)
    ln1g, ln1b = vec(_V_LN1G, D), vec(_V_LN1B, D)
    w1, b1 = mat(_R_W1, D, F), vec(_V_B1, F)
    w2, b2 = mat(_R_W2, F, D), vec(_V_B2, D)
    lnfg, lnfb = vec(_V_LNFG, D), vec(_V_LNFB, D)

    # -------- encoder layer --------
    @pl.when(layer < n_enc)
    def _():
        x = x_scr[...]
        attn = _self_attention(x, wqkv, bqkv, wo, bo, B, Ss, H, dk)
        x = _add_layernorm(x, attn, ln1g, ln1b)
        ff = _ffn(x, w1, b1, w2, b2)
        x_scr[...] = _add_layernorm(x, ff, lnfg, lnfb)

    # -------- decoder layer --------
    @pl.when(layer >= n_enc)
    def _():
        y = y_scr[...]
        enc = x_scr[...]                         # encoder output, VMEM-resident
        attn = _self_attention(y, wqkv, bqkv, wo, bo, B, St, H, dk)
        y = _add_layernorm(y, attn, ln1g, ln1b)
        cattn = _cross_attention(
            y, enc,
            mat(_R_CWQ, D, D), vec(_V_CBQ, D),
            mat(_R_CWKV, D, 2 * D), vec(_V_CBKV, 2 * D),
            mat(_R_CWO, D, D), vec(_V_CBO, D),
            B, St, Ss, H, dk)
        y = _add_layernorm(y, cattn, vec(_V_LN2G, D), vec(_V_LN2B, D))
        ff = _ffn(y, w1, b1, w2, b2)
        y_scr[...] = _add_layernorm(y, ff, lnfg, lnfb)

    # -------- final vocab projection fused into the last grid step --------
    @pl.when(layer == pl.num_programs(0) - 1)
    def _():
        logits_ref[...] = (jnp.dot(y_scr[...], fw_ref[...],
                                   preferred_element_type=jnp.float32) + fb_ref[...])


def run_transformer(slab, final_w, final_b, x2d, y2d, B, Ss, St):
    Ms, D = x2d.shape
    Mt = y2d.shape[0]
    L = slab.shape[0]
    kern = functools.partial(_transformer_kernel, B=B, Ss=Ss, St=St,
                             H=NUM_HEADS, dk=D // NUM_HEADS, n_enc=N_ENC_LAYERS)
    return pl.pallas_call(
        kern,
        out_shape=jax.ShapeDtypeStruct((Mt, VOCAB_PAD), jnp.float32),
        grid=(L,),
        in_specs=[
            pl.BlockSpec((Ms, D), lambda l: (0, 0)),                        # enc input
            pl.BlockSpec((Mt, D), lambda l: (0, 0)),                        # dec input
            pl.BlockSpec((1, SLAB_ROWS, SLAB_LANES), lambda l: (l, 0, 0)),  # layer slab
            pl.BlockSpec(final_w.shape, lambda l: (0, 0)),                  # final W
            pl.BlockSpec(final_b.shape, lambda l: (0, 0)),                  # final b
        ],
        out_specs=pl.BlockSpec((Mt, VOCAB_PAD), lambda l: (0, 0)),
        scratch_shapes=[pltpu.VMEM((Ms, D), jnp.float32),    # encoder stream / enc out
                        pltpu.VMEM((Mt, D), jnp.float32)],   # decoder stream
        compiler_params=pltpu.CompilerParams(dimension_semantics=("arbitrary",)),
    )(x2d, y2d, slab, final_w, final_b)


# ----------------------------- model ------------------------------------------
def positional_encoding_table(d_model, max_len):
    position = jnp.arange(max_len, dtype=jnp.float32)[:, None]
    div_term = jnp.exp(
        jnp.arange(0, d_model, 2, dtype=jnp.float32) * (-math.log(10000.0) / d_model))
    pe = jnp.zeros((max_len, d_model), dtype=jnp.float32)
    pe = pe.at[:, 0::2].set(jnp.sin(position * div_term))
    pe = pe.at[:, 1::2].set(jnp.cos(position * div_term))
    return pe


def transformer_forward(params, src, tgt):
    B, Ss = src.shape
    St = tgt.shape[1]
    D = D_MODEL
    emb_scale = math.sqrt(D)
    pe = params["pe"]

    # embedding gather + positional encoding (token-id dependent gather stays in JAX)
    x = jnp.take(params["enc_emb"], src, axis=0) * emb_scale + pe[None, :Ss]
    y = jnp.take(params["dec_emb"], tgt, axis=0) * emb_scale + pe[None, :St]

    logits_p = run_transformer(params["slab"], params["final_w"], params["final_b"],
                               x.reshape(B * Ss, D), y.reshape(B * St, D), B, Ss, St)
    return logits_p[:, :TGT_VOCAB].reshape(B, St, TGT_VOCAB)


# ----------------------------- parameter init ----------------------------------
def _init_linear_t(key, in_dim, out_dim, std=0.02):
    # pre-transposed weights: stored (in, out), y = x @ w + b
    k1, k2 = jax.random.split(key)
    w = jax.random.normal(k1, (in_dim, out_dim), jnp.float32) * std
    b = jax.random.normal(k2, (out_dim,), jnp.float32) * std
    return w, b


def _pack_rows(slab, row, arr):
    arr = arr if arr.ndim == 2 else arr.reshape(1, -1)
    return slab.at[row:row + arr.shape[0], :arr.shape[1]].set(arr)


def _init_enc_layer_slab(key):
    ks = jax.random.split(key, 6)
    wq, bq = _init_linear_t(ks[0], D_MODEL, D_MODEL)
    wk, bk = _init_linear_t(ks[1], D_MODEL, D_MODEL)
    wv, bv = _init_linear_t(ks[2], D_MODEL, D_MODEL)
    wo, bo = _init_linear_t(ks[3], D_MODEL, D_MODEL)
    w1, b1 = _init_linear_t(ks[4], D_MODEL, D_FF)
    w2, b2 = _init_linear_t(ks[5], D_FF, D_MODEL)
    ones, zeros = jnp.ones((D_MODEL,), jnp.float32), jnp.zeros((D_MODEL,), jnp.float32)
    slab = jnp.zeros((SLAB_ROWS, SLAB_LANES), jnp.float32)
    slab = _pack_rows(slab, _R_WQKV, jnp.concatenate([wq, wk, wv], axis=1))
    slab = _pack_rows(slab, _V_BQKV, jnp.concatenate([bq, bk, bv]))
    slab = _pack_rows(slab, _R_WO, wo)
    slab = _pack_rows(slab, _V_BO, bo)
    slab = _pack_rows(slab, _V_LN1G, ones)
    slab = _pack_rows(slab, _V_LN1B, zeros)
    slab = _pack_rows(slab, _R_W1, w1)
    slab = _pack_rows(slab, _V_B1, b1)
    slab = _pack_rows(slab, _R_W2, w2)
    slab = _pack_rows(slab, _V_B2, b2)
    slab = _pack_rows(slab, _V_LNFG, ones)
    slab = _pack_rows(slab, _V_LNFB, zeros)
    return slab


def _init_dec_layer_slab(key):
    ks = jax.random.split(key, 10)
    wq, bq = _init_linear_t(ks[0], D_MODEL, D_MODEL)
    wk, bk = _init_linear_t(ks[1], D_MODEL, D_MODEL)
    wv, bv = _init_linear_t(ks[2], D_MODEL, D_MODEL)
    wo, bo = _init_linear_t(ks[3], D_MODEL, D_MODEL)
    cwq, cbq = _init_linear_t(ks[4], D_MODEL, D_MODEL)
    cwk, cbk = _init_linear_t(ks[5], D_MODEL, D_MODEL)
    cwv, cbv = _init_linear_t(ks[6], D_MODEL, D_MODEL)
    cwo, cbo = _init_linear_t(ks[7], D_MODEL, D_MODEL)
    w1, b1 = _init_linear_t(ks[8], D_MODEL, D_FF)
    w2, b2 = _init_linear_t(ks[9], D_FF, D_MODEL)
    ones, zeros = jnp.ones((D_MODEL,), jnp.float32), jnp.zeros((D_MODEL,), jnp.float32)
    slab = jnp.zeros((SLAB_ROWS, SLAB_LANES), jnp.float32)
    slab = _pack_rows(slab, _R_WQKV, jnp.concatenate([wq, wk, wv], axis=1))
    slab = _pack_rows(slab, _V_BQKV, jnp.concatenate([bq, bk, bv]))
    slab = _pack_rows(slab, _R_WO, wo)
    slab = _pack_rows(slab, _V_BO, bo)
    slab = _pack_rows(slab, _V_LN1G, ones)
    slab = _pack_rows(slab, _V_LN1B, zeros)
    slab = _pack_rows(slab, _R_CWQ, cwq)
    slab = _pack_rows(slab, _V_CBQ, cbq)
    slab = _pack_rows(slab, _R_CWKV, jnp.concatenate([cwk, cwv], axis=1))
    slab = _pack_rows(slab, _V_CBKV, jnp.concatenate([cbk, cbv]))
    slab = _pack_rows(slab, _R_CWO, cwo)
    slab = _pack_rows(slab, _V_CBO, cbo)
    slab = _pack_rows(slab, _V_LN2G, ones)
    slab = _pack_rows(slab, _V_LN2B, zeros)
    slab = _pack_rows(slab, _R_W1, w1)
    slab = _pack_rows(slab, _V_B1, b1)
    slab = _pack_rows(slab, _R_W2, w2)
    slab = _pack_rows(slab, _V_B2, b2)
    slab = _pack_rows(slab, _V_LNFG, ones)
    slab = _pack_rows(slab, _V_LNFB, zeros)
    return slab


def init_params(key):
    keys = jax.random.split(key, 3 + N_ENC_LAYERS + N_DEC_LAYERS)
    enc_emb = jax.random.normal(keys[0], (SRC_VOCAB, D_MODEL), jnp.float32) * 0.02
    dec_emb = jax.random.normal(keys[1], (TGT_VOCAB, D_MODEL), jnp.float32) * 0.02
    fw, fb = _init_linear_t(keys[2], D_MODEL, TGT_VOCAB)
    final_w = jnp.zeros((D_MODEL, VOCAB_PAD), jnp.float32).at[:, :TGT_VOCAB].set(fw)
    final_b = jnp.zeros((1, VOCAB_PAD), jnp.float32).at[:, :TGT_VOCAB].set(fb)
    enc_slabs = [_init_enc_layer_slab(keys[3 + i]) for i in range(N_ENC_LAYERS)]
    dec_slabs = [_init_dec_layer_slab(keys[3 + N_ENC_LAYERS + i])
                 for i in range(N_DEC_LAYERS)]
    return dict(
        enc_emb=enc_emb,
        dec_emb=dec_emb,
        final_w=final_w,
        final_b=final_b,
        slab=jnp.stack(enc_slabs + dec_slabs, axis=0),   # (L_total, 272, 128)
        pe=positional_encoding_table(D_MODEL, MAX_SEQ),
    )


# ----------------------------- main ------------------------------------------
if __name__ == "__main__":
    key = jax.random.PRNGKey(0)
    k_param, k_src, k_tgt = jax.random.split(key, 3)

    params = init_params(k_param)

    B, S_SRC, S_TGT = 2, 8, 8
    src = jax.random.randint(k_src, (B, S_SRC), 0, SRC_VOCAB, dtype=jnp.int32)
    tgt = jax.random.randint(k_tgt, (B, S_TGT), 0, TGT_VOCAB, dtype=jnp.int32)

    logits = jax.jit(transformer_forward)(params, src, tgt)
    logits = jax.block_until_ready(logits)

    assert logits.shape == (B, S_TGT, TGT_VOCAB)
    assert bool(jnp.all(jnp.isfinite(logits)))
    print("KERNEL_OK")
</pallas_src>

<mosaic_0001>
module attributes {stable_mosaic.version = 11 : i64} {
  func.func @_transformer_kernel(%arg0: i32, %arg1: memref<16x32xf32, #tpu.memory_space<vmem>>, %arg2: memref<16x32xf32, #tpu.memory_space<vmem>>, %arg3: memref<1x272x128xf32, #tpu.memory_space<vmem>>, %arg4: memref<32x128xf32, #tpu.memory_space<vmem>>, %arg5: memref<1x128xf32, #tpu.memory_space<vmem>>, %arg6: memref<16x128xf32, #tpu.memory_space<vmem>>, %arg7: memref<16x32xf32, #tpu.memory_space<vmem>>, %arg8: memref<16x32xf32, #tpu.memory_space<vmem>>) attributes {dimension_semantics = [#tpu.dimension_semantics<arbitrary>], iteration_bounds = array<i64: 4>, scalar_prefetch = 0 : i64, scratch_operands = 2 : i64, tpu.core_type = #tpu.core_type<tc>, window_params = [{pipeline_mode = #tpu.pipeline_mode<synchronous>, transform_indices = @transform_0, window_bounds = array<i64: 16, 32>}, {pipeline_mode = #tpu.pipeline_mode<synchronous>, transform_indices = @transform_1, window_bounds = array<i64: 16, 32>}, {transform_indices = @transform_2, window_bounds = array<i64: 1, 272, 128>}, {pipeline_mode = #tpu.pipeline_mode<synchronous>, transform_indices = @transform_3, window_bounds = array<i64: 32, 128>}, {pipeline_mode = #tpu.pipeline_mode<synchronous>, transform_indices = @transform_4, window_bounds = array<i64: 1, 128>}, {pipeline_mode = #tpu.pipeline_mode<synchronous>, transform_indices = @transform_5, window_bounds = array<i64: 16, 128>}]} {
    %c0_i32 = arith.constant 0 : i32
    %0 = arith.cmpi eq, %arg0, %c0_i32 : i32
    %1 = arith.extui %0 : i1 to i32
    %c0_i32_0 = arith.constant 0 : i32
    %2 = arith.cmpi ne, %1, %c0_i32_0 : i32
    scf.if %2 {
      %c0_54 = arith.constant 0 : index
      %c0_55 = arith.constant 0 : index
      %48 = vector.load %arg1[%c0_54, %c0_55] : memref<16x32xf32, #tpu.memory_space<vmem>>, vector<16x32xf32>
      %c0_56 = arith.constant 0 : index
      %c0_57 = arith.constant 0 : index
      %49 = vector.load %arg7[%c0_56, %c0_57] : memref<16x32xf32, #tpu.memory_space<vmem>>, vector<16x32xf32>
      tpu.vector_store %arg7[%c0_56, %c0_57], %48 {strides = array<i32>} : memref<16x32xf32, #tpu.memory_space<vmem>>, vector<16x32xf32>,
      %c0_58 = arith.constant 0 : index
      %c0_59 = arith.constant 0 : index
      %50 = vector.load %arg2[%c0_58, %c0_59] : memref<16x32xf32, #tpu.memory_space<vmem>>, vector<16x32xf32>
      %c0_60 = arith.constant 0 : index
      %c0_61 = arith.constant 0 : index
      %51 = vector.load %arg8[%c0_60, %c0_61] : memref<16x32xf32, #tpu.memory_space<vmem>>, vector<16x32xf32>
      tpu.vector_store %arg8[%c0_60, %c0_61], %50 {strides = array<i32>} : memref<16x32xf32, #tpu.memory_space<vmem>>, vector<16x32xf32>,
      %cst = arith.constant 0.000000e+00 : f32
      %52 = vector.broadcast %cst : f32 to vector<16x128xf32>
      %c0_62 = arith.constant 0 : index
      %c0_63 = arith.constant 0 : index
      %53 = vector.load %arg6[%c0_62, %c0_63] : memref<16x128xf32, #tpu.memory_space<vmem>>, vector<16x128xf32>
      tpu.vector_store %arg6[%c0_62, %c0_63], %52 {strides = array<i32>} : memref<16x128xf32, #tpu.memory_space<vmem>>, vector<16x128xf32>,
    } else {
    }
    %c0_i32_1 = arith.constant 0 : i32
    %c0_i32_2 = arith.constant 0 : i32
    %c0_i32_3 = arith.constant 0 : i32
    %3 = tpu.memref_slice %arg3[%c0_i32_1, %c0_i32_2, %c0_i32_3] : memref<1x272x128xf32, #tpu.memory_space<vmem>> -> memref<1x272x128xf32, #tpu.memory_space<vmem>>
    %4 = tpu.memref_squeeze %3 : memref<1x272x128xf32, #tpu.memory_space<vmem>> -> memref<272x128xf32, #tpu.memory_space<vmem>>
    %c0 = arith.constant 0 : index
    %c0_4 = arith.constant 0 : index
    %5 = vector.load %4[%c0, %c0_4] : memref<272x128xf32, #tpu.memory_space<vmem>>, vector<32x96xf32>
    %c0_i32_5 = arith.constant 0 : i32
    %c0_i32_6 = arith.constant 0 : i32
    %c0_i32_7 = arith.constant 0 : i32
    %6 = tpu.memref_slice %arg3[%c0_i32_5, %c0_i32_6, %c0_i32_7] : memref<1x272x128xf32, #tpu.memory_space<vmem>> -> memref<1x272x128xf32, #tpu.memory_space<vmem>>
    %7 = tpu.memref_squeeze %6 : memref<1x272x128xf32, #tpu.memory_space<vmem>> -> memref<272x128xf32, #tpu.memory_space<vmem>>
    %c256 = arith.constant 256 : index
    %c0_8 = arith.constant 0 : index
    %8 = vector.load %7[%c256, %c0_8] : memref<272x128xf32, #tpu.memory_space<vmem>>, vector<1x96xf32>
    %c0_i32_9 = arith.constant 0 : i32
    %c0_i32_10 = arith.constant 0 : i32
    %c0_i32_11 = arith.constant 0 : i32
    %9 = tpu.memref_slice %arg3[%c0_i32_9, %c0_i32_10, %c0_i32_11] : memref<1x272x128xf32, #tpu.memory_space<vmem>> -> memref<1x272x128xf32, #tpu.memory_space<vmem>>
    %10 = tpu.memref_squeeze %9 : memref<1x272x128xf32, #tpu.memory_space<vmem>> -> memref<272x128xf32, #tpu.memory_space<vmem>>
    %c32 = arith.constant 32 : index
    %c0_12 = arith.constant 0 : index
    %11 = vector.load %10[%c32, %c0_12] : memref<272x128xf32, #tpu.memory_space<vmem>>, vector<32x32xf32>
    %c0_i32_13 = arith.constant 0 : i32
    %c0_i32_14 = arith.constant 0 : i32
    %c0_i32_15 = arith.constant 0 : i32
    %12 = tpu.memref_slice %arg3[%c0_i32_13, %c0_i32_14, %c0_i32_15] : memref<1x272x128xf32, #tpu.memory_space<vmem>> -> memref<1x272x128xf32, #tpu.memory_space<vmem>>
    %13 = tpu.memref_squeeze %12 : memref<1x272x128xf32, #tpu.memory_space<vmem>> -> memref<272x128xf32, #tpu.memory_space<vmem>>
    %c257 = arith.constant 257 : index
    %c0_16 = arith.constant 0 : index
    %14 = vector.load %13[%c257, %c0_16] : memref<272x128xf32, #tpu.memory_space<vmem>>, vector<1x32xf32>
    %c0_i32_17 = arith.constant 0 : i32
    %c0_i32_18 = arith.constant 0 : i32
    %c0_i32_19 = arith.constant 0 : i32
    %15 = tpu.memref_slice %arg3[%c0_i32_17, %c0_i32_18, %c0_i32_19] : memref<1x272x128xf32, #tpu.memory_space<vmem>> -> memref<1x272x128xf32, #tpu.memory_space<vmem>>
    %16 = tpu.memref_squeeze %15 : memref<1x272x128xf32, #tpu.memory_space<vmem>> -> memref<272x128xf32, #tpu.memory_space<vmem>>
    %c258 = arith.constant 258 : index
    %c0_20 = arith.constant 0 : index
    %17 = vector.load %16[%c258, %c0_20] : memref<272x128xf32, #tpu.memory_space<vmem>>, vector<1x32xf32>
    %c0_i32_21 = arith.constant 0 : i32
    %c0_i32_22 = arith.constant 0 : i32
    %c0_i32_23 = arith.constant 0 : i32
    %18 = tpu.memref_slice %arg3[%c0_i32_21, %c0_i32_22, %c0_i32_23] : memref<1x272x128xf32, #tpu.memory_space<vmem>> -> memref<1x272x128xf32, #tpu.memory_space<vmem>>
    %19 = tpu.memref_squeeze %18 : memref<1x272x128xf32, #tpu.memory_space<vmem>> -> memref<272x128xf32, #tpu.memory_space<vmem>>
    %c259 = arith.constant 259 : index
    %c0_24 = arith.constant 0 : index
    %20 = vector.load %19[%c259, %c0_24] : memref<272x128xf32, #tpu.memory_space<vmem>>, vector<1x32xf32>
    %c0_i32_25 = arith.constant 0 : i32
    %c0_i32_26 = arith.constant 0 : i32
    %c0_i32_27 = arith.constant 0 : i32
    %21 = tpu.memref_slice %arg3[%c0_i32_25, %c0_i32_26, %c0_i32_27] : memref<1x272x128xf32, #tpu.memory_space<vmem>> -> memref<1x272x128xf32, #tpu.memory_space<vmem>>
    %22 = tpu.memref_squeeze %21 : memref<1x272x128xf32, #tpu.memory_space<vmem>> -> memref<272x128xf32, #tpu.memory_space<vmem>>
    %c64 = arith.constant 64 : index
    %c0_28 = arith.constant 0 : index
    %23 = vector.load %22[%c64, %c0_28] : memref<272x128xf32, #tpu.memory_space<vmem>>, vector<32x64xf32>
    %c0_i32_29 = arith.constant 0 : i32
    %c0_i32_30 = arith.constant 0 : i32
    %c0_i32_31 = arith.constant 0 : i32
    %24 = tpu.memref_slice %arg3[%c0_i32_29, %c0_i32_30, %c0_i32_31] : memref<1x272x128xf32, #tpu.memory_space<vmem>> -> memref<1x272x128xf32, #tpu.memory_space<vmem>>
    %25 = tpu.memref_squeeze %24 : memref<1x272x128xf32, #tpu.memory_space<vmem>> -> memref<272x128xf32, #tpu.memory_space<vmem>>
    %c260 = arith.constant 260 : index
    %c0_32 = arith.constant 0 : index
    %26 = vector.load %25[%c260, %c0_32] : memref<272x128xf32, #tpu.memory_space<vmem>>, vector<1x64xf32>
    %c0_i32_33 = arith.constant 0 : i32
    %c0_i32_34 = arith.constant 0 : i32
    %c0_i32_35 = arith.constant 0 : i32
    %27 = tpu.memref_slice %arg3[%c0_i32_33, %c0_i32_34, %c0_i32_35] : memref<1x272x128xf32, #tpu.memory_space<vmem>> -> memref<1x272x128xf32, #tpu.memory_space<vmem>>
    %28 = tpu.memref_squeeze %27 : memref<1x272x128xf32, #tpu.memory_space<vmem>> -> memref<272x128xf32, #tpu.memory_space<vmem>>
    %c96 = arith.constant 96 : index
    %c0_36 = arith.constant 0 : index
    %29 = vector.load %28[%c96, %c0_36] : memref<272x128xf32, #tpu.memory_space<vmem>>, vector<64x32xf32>
    %c0_i32_37 = arith.constant 0 : i32
    %c0_i32_38 = arith.constant 0 : i32
    %c0_i32_39 = arith.constant 0 : i32
    %30 = tpu.memref_slice %arg3[%c0_i32_37, %c0_i32_38, %c0_i32_39] : memref<1x272x128xf32, #tpu.memory_space<vmem>> -> memref<1x272x128xf32, #tpu.memory_space<vmem>>
    %31 = tpu.memref_squeeze %30 : memref<1x272x128xf32, #tpu.memory_space<vmem>> -> memref<272x128xf32, #tpu.memory_space<vmem>>
    %c261 = arith.constant 261 : index
    %c0_40 = arith.constant 0 : index
    %32 = vector.load %31[%c261, %c0_40] : memref<272x128xf32, #tpu.memory_space<vmem>>, vector<1x32xf32>
    %c0_i32_41 = arith.constant 0 : i32
    %c0_i32_42 = arith.constant 0 : i32
    %c0_i32_43 = arith.constant 0 : i32
    %33 = tpu.memref_slice %arg3[%c0_i32_41, %c0_i32_42, %c0_i32_43] : memref<1x272x128xf32, #tpu.memory_space<vmem>> -> memref<1x272x128xf32, #tpu.memory_space<vmem>>
    %34 = tpu.memref_squeeze %33 : memref<1x272x128xf32, #tpu.memory_space<vmem>> -> memref<272x128xf32, #tpu.memory_space<vmem>>
    %c262 = arith.constant 262 : index
    %c0_44 = arith.constant 0 : index
    %35 = vector.load %34[%c262, %c0_44] : memref<272x128xf32, #tpu.memory_space<vmem>>, vector<1x32xf32>
    %c0_i32_45 = arith.constant 0 : i32
    %c0_i32_46 = arith.constant 0 : i32
    %c0_i32_47 = arith.constant 0 : i32
    %36 = tpu.memref_slice %arg3[%c0_i32_45, %c0_i32_46, %c0_i32_47] : memref<1x272x128xf32, #tpu.memory_space<vmem>> -> memref<1x272x128xf32, #tpu.memory_space<vmem>>
    %37 = tpu.memref_squeeze %36 : memref<1x272x128xf32, #tpu.memory_space<vmem>> -> memref<272x128xf32, #tpu.memory_space<vmem>>
    %c263 = arith.constant 263 : index
    %c0_48 = arith.constant 0 : index
    %38 = vector.load %37[%c263, %c0_48] : memref<272x128xf32, #tpu.memory_space<vmem>>, vector<1x32xf32>
    %c2_i32 = arith.constant 2 : i32
    %39 = arith.cmpi slt, %arg0, %c2_i32 : i32
    %40 = arith.extui %39 : i1 to i32
    %c0_i32_49 = arith.constant 0 : i32
    %41 = arith.cmpi ne, %40, %c0_i32_49 : i32
    scf.if %41 {
      %c0_54 = arith.constant 0 : index
      %c0_55 = arith.constant 0 : index
      %48 = vector.load %arg7[%c0_54, %c0_55] : memref<16x32xf32, #tpu.memory_space<vmem>>, vector<16x32xf32>
      %cst = arith.constant dense<0.000000e+00> : vector<16x96xf32>
      %49 = tpu.matmul %48, %5, %cst {dimension_numbers = #tpu.dot_dimension_numbers<[1], [0], [0], [1], [0, 0, 1, 1], [], []>} : vector<16x32xf32>, vector<32x96xf32>, vector<16x96xf32> -> vector<16x96xf32>
      %50 = vector.broadcast %8 : vector<1x96xf32> to vector<16x96xf32>
      %51 = arith.addf %49, %50 : vector<16x96xf32>
      %52 = vector.extract_strided_slice %51 {offsets = [0, 0], sizes = [16, 32], strides = [1, 1]} : vector<16x96xf32> to vector<16x32xf32>
      %53 = vector.extract_strided_slice %51 {offsets = [0, 32], sizes = [16, 32], strides = [1, 1]} : vector<16x96xf32> to vector<16x32xf32>
      %54 = vector.extract_strided_slice %51 {offsets = [0, 64], sizes = [16, 32], strides = [1, 1]} : vector<16x96xf32> to vector<16x32xf32>
      %55 = vector.shape_cast %52 : vector<16x32xf32> to vector<2x8x32xf32>
      %56 = vector.shape_cast %53 : vector<16x32xf32> to vector<2x8x32xf32>
      %57 = vector.shape_cast %54 : vector<16x32xf32> to vector<2x8x32xf32>
      %58 = vector.extract_strided_slice %55 {offsets = [0, 0, 0], sizes = [2, 8, 8], strides = [1, 1, 1]} : vector<2x8x32xf32> to vector<2x8x8xf32>
      %59 = vector.extract_strided_slice %55 {offsets = [0, 0, 8], sizes = [2, 8, 8], strides = [1, 1, 1]} : vector<2x8x32xf32> to vector<2x8x8xf32>
      %60 = vector.extract_strided_slice %55 {offsets = [0, 0, 16], sizes = [2, 8, 8], strides = [1, 1, 1]} : vector<2x8x32xf32> to vector<2x8x8xf32>
      %61 = vector.extract_strided_slice %55 {offsets = [0, 0, 24], sizes = [2, 8, 8], strides = [1, 1, 1]} : vector<2x8x32xf32> to vector<2x8x8xf32>
      %62 = tpu.concatenate %58, %59, %60, %61 in 0 : vector<2x8x8xf32>, vector<2x8x8xf32>, vector<2x8x8xf32>, vector<2x8x8xf32> -> vector<8x8x8xf32>
      %63 = vector.extract_strided_slice %56 {offsets = [0, 0, 0], sizes = [2, 8, 8], strides = [1, 1, 1]} : vector<2x8x32xf32> to vector<2x8x8xf32>
      %64 = vector.extract_strided_slice %56 {offsets = [0, 0, 8], sizes = [2, 8, 8], strides = [1, 1, 1]} : vector<2x8x32xf32> to vector<2x8x8xf32>
      %65 = vector.extract_strided_slice %56 {offsets = [0, 0, 16], sizes = [2, 8, 8], strides = [1, 1, 1]} : vector<2x8x32xf32> to vector<2x8x8xf32>
      %66 = vector.extract_strided_slice %56 {offsets = [0, 0, 24], sizes = [2, 8, 8], strides = [1, 1, 1]} : vector<2x8x32xf32> to vector<2x8x8xf32>
      %67 = tpu.concatenate %63, %64, %65, %66 in 0 : vector<2x8x8xf32>, vector<2x8x8xf32>, vector<2x8x8xf32>, vector<2x8x8xf32> -> vector<8x8x8xf32>
      %68 = vector.extract_strided_slice %57 {offsets = [0, 0, 0], sizes = [2, 8, 8], strides = [1, 1, 1]} : vector<2x8x32xf32> to vector<2x8x8xf32>
      %69 = vector.extract_strided_slice %57 {offsets = [0, 0, 8], sizes = [2, 8, 8], strides = [1, 1, 1]} : vector<2x8x32xf32> to vector<2x8x8xf32>
      %70 = vector.extract_strided_slice %57 {offsets = [0, 0, 16], sizes = [2, 8, 8], strides = [1, 1, 1]} : vector<2x8x32xf32> to vector<2x8x8xf32>
      %71 = vector.extract_strided_slice %57 {offsets = [0, 0, 24], sizes = [2, 8, 8], strides = [1, 1, 1]} : vector<2x8x32xf32> to vector<2x8x8xf32>
      %72 = tpu.concatenate %68, %69, %70, %71 in 0 : vector<2x8x8xf32>, vector<2x8x8xf32>, vector<2x8x8xf32>, vector<2x8x8xf32> -> vector<8x8x8xf32>
      "tpu.trace_start"() <{level = 10 : i32, message = "bqd,bkd->bqk"}> : () -> ()
      %cst_56 = arith.constant dense<0.000000e+00> : vector<8x8x8xf32>
      %73 = tpu.matmul %62, %67, %cst_56 {dimension_numbers = #tpu.dot_dimension_numbers<[2], [2], [1], [1], [0, 0, 0, 1, 1, 1], [0], [0]>} : vector<8x8x8xf32>, vector<8x8x8xf32>, vector<8x8x8xf32> -> vector<8x8x8xf32>
      "tpu.trace_stop"() : () -> ()
      %cst_57 = arith.constant 0.353553385 : f32
      %74 = vector.broadcast %cst_57 : f32 to vector<8x8x8xf32>
      %75 = arith.mulf %73, %74 : vector<8x8x8xf32>
      %cst_58 = arith.constant dense<0xFF800000> : vector<8x8xf32>
      %76 = vector.multi_reduction <maximumf>, %75, %cst_58 [2] : vector<8x8x8xf32> to vector<8x8xf32>
      %77 = vector.shape_cast %76 : vector<8x8xf32> to vector<8x8x1xf32>
      %78 = vector.broadcast %77 : vector<8x8x1xf32> to vector<8x8x8xf32>
      %79 = arith.subf %75, %78 : vector<8x8x8xf32>
      %80 = math.exp %79 : vector<8x8x8xf32>
      %cst_59 = arith.constant dense<0.000000e+00> : vector<8x8xf32>
      %81 = vector.multi_reduction <add>, %80, %cst_59 [2] : vector<8x8x8xf32> to vector<8x8xf32>
      %82 = vector.shape_cast %81 : vector<8x8xf32> to vector<8x8x1xf32>
      %83 = tpu.reciprocal %82 {approx = true} : vector<8x8x1xf32> -> vector<8x8x1xf32>
      %84 = vector.broadcast %83 : vector<8x8x1xf32> to vector<8x8x8xf32>
      %85 = arith.mulf %80, %84 : vector<8x8x8xf32>
      "tpu.trace_start"() <{level = 10 : i32, message = "bqk,bkd->bqd"}> : () -> ()
      %cst_60 = arith.constant dense<0.000000e+00> : vector<8x8x8xf32>
      %86 = tpu.matmul %85, %72, %cst_60 {dimension_numbers = #tpu.dot_dimension_numbers<[2], [1], [1], [2], [0, 0, 0, 1, 1, 2], [0], [0]>} : vector<8x8x8xf32>, vector<8x8x8xf32>, vector<8x8x8xf32> -> vector<8x8x8xf32>
      "tpu.trace_stop"() : () -> ()
      %87 = vector.extract_strided_slice %86 {offsets = [0, 0, 0], sizes = [2, 8, 8], strides = [1, 1, 1]} : vector<8x8x8xf32> to vector<2x8x8xf32>
      %88 = vector.shape_cast %87 : vector<2x8x8xf32> to vector<16x8xf32>
      %89 = vector.extract_strided_slice %11 {offsets = [0, 0], sizes = [8, 32], strides = [1, 1]} : vector<32x32xf32> to vector<8x32xf32>
      %cst_61 = arith.constant dense<0.000000e+00> : vector<16x32xf32>
      %90 = tpu.matmul %88, %89, %cst_61 {dimension_numbers = #tpu.dot_dimension_numbers<[1], [0], [0], [1], [0, 0, 1, 1], [], []>} : vector<16x8xf32>, vector<8x32xf32>, vector<16x32xf32> -> vector<16x32xf32>
      %91 = vector.broadcast %14 : vector<1x32xf32> to vector<16x32xf32>
      %92 = arith.addf %91, %90 : vector<16x32xf32>
      %93 = vector.extract_strided_slice %86 {offsets = [2, 0, 0], sizes = [2, 8, 8], strides = [1, 1, 1]} : vector<8x8x8xf32> to vector<2x8x8xf32>
      %94 = vector.shape_cast %93 : vector<2x8x8xf32> to vector<16x8xf32>
      %95 = vector.extract_strided_slice %11 {offsets = [8, 0], sizes = [8, 32], strides = [1, 1]} : vector<32x32xf32> to vector<8x32xf32>
      %cst_62 = arith.constant dense<0.000000e+00> : vector<16x32xf32>
      %96 = tpu.matmul %94, %95, %cst_62 {dimension_numbers = #tpu.dot_dimension_numbers<[1], [0], [0], [1], [0, 0, 1, 1], [], []>} : vector<16x8xf32>, vector<8x32xf32>, vector<16x32xf32> -> vector<16x32xf32>
      %97 = arith.addf %92, %96 : vector<16x32xf32>
      %98 = vector.extract_strided_slice %86 {offsets = [4, 0, 0], sizes = [2, 8, 8], strides = [1, 1, 1]} : vector<8x8x8xf32> to vector<2x8x8xf32>
      %99 = vector.shape_cast %98 : vector<2x8x8xf32> to vector<16x8xf32>
      %100 = vector.extract_strided_slice %11 {offsets = [16, 0], sizes = [8, 32], strides = [1, 1]} : vector<32x32xf32> to vector<8x32xf32>
      %cst_63 = arith.constant dense<0.000000e+00> : vector<16x32xf32>
      %101 = tpu.matmul %99, %100, %cst_63 {dimension_numbers = #tpu.dot_dimension_numbers<[1], [0], [0], [1], [0, 0, 1, 1], [], []>} : vector<16x8xf32>, vector<8x32xf32>, vector<16x32xf32> -> vector<16x32xf32>
      %102 = arith.addf %97, %101 : vector<16x32xf32>
      %103 = vector.extract_strided_slice %86 {offsets = [6, 0, 0], sizes = [2, 8, 8], strides = [1, 1, 1]} : vector<8x8x8xf32> to vector<2x8x8xf32>
      %104 = vector.shape_cast %103 : vector<2x8x8xf32> to vector<16x8xf32>
      %105 = vector.extract_strided_slice %11 {offsets = [24, 0], sizes = [8, 32], strides = [1, 1]} : vector<32x32xf32> to vector<8x32xf32>
      %cst_64 = arith.constant dense<0.000000e+00> : vector<16x32xf32>
      %106 = tpu.matmul %104, %105, %cst_64 {dimension_numbers = #tpu.dot_dimension_numbers<[1], [0], [0], [1], [0, 0, 1, 1], [], []>} : vector<16x8xf32>, vector<8x32xf32>, vector<16x32xf32> -> vector<16x32xf32>
      %107 = arith.addf %102, %106 : vector<16x32xf32>
      %108 = arith.addf %48, %107 : vector<16x32xf32>
      %cst_65 = arith.constant dense<0.000000e+00> : vector<16xf32>
      %109 = vector.multi_reduction <add>, %108, %cst_65 [1] : vector<16x32xf32> to vector<16xf32>
      %110 = vector.shape_cast %109 : vector<16xf32> to vector<16x1xf32>
      %cst_66 = arith.constant 3.200000e+01 : f32
      %111 = vector.broadcast %cst_66 : f32 to vector<16x1xf32>
      %112 = arith.divf %110, %111 : vector<16x1xf32>
      %113 = vector.broadcast %112 : vector<16x1xf32> to vector<16x32xf32>
      %114 = arith.subf %108, %113 : vector<16x32xf32>
      %115 = arith.mulf %114, %114 : vector<16x32xf32>
      %cst_67 = arith.constant dense<0.000000e+00> : vector<16xf32>
      %116 = vector.multi_reduction <add>, %115, %cst_67 [1] : vector<16x32xf32> to vector<16xf32>
      %117 = vector.shape_cast %116 : vector<16xf32> to vector<16x1xf32>
      %cst_68 = arith.constant 3.200000e+01 : f32
      %118 = vector.broadcast %cst_68 : f32 to vector<16x1xf32>
      %119 = arith.divf %117, %118 : vector<16x1xf32>
      %120 = vector.broadcast %112 : vector<16x1xf32> to vector<16x32xf32>
      %121 = arith.subf %108, %120 : vector<16x32xf32>
      %cst_69 = arith.constant 9.99999974E-6 : f32
      %122 = vector.broadcast %cst_69 : f32 to vector<16x1xf32>
      %123 = arith.addf %119, %122 : vector<16x1xf32>
      %124 = math.rsqrt %123 : vector<16x1xf32>
      %125 = vector.broadcast %124 : vector<16x1xf32> to vector<16x32xf32>
      %126 = arith.mulf %121, %125 : vector<16x32xf32>
      %127 = vector.broadcast %17 : vector<1x32xf32> to vector<16x32xf32>
      %128 = arith.mulf %126, %127 : vector<16x32xf32>
      %129 = vector.broadcast %20 : vector<1x32xf32> to vector<16x32xf32>
      %130 = arith.addf %128, %129 : vector<16x32xf32>
      %cst_70 = arith.constant dense<0.000000e+00> : vector<16x64xf32>
      %131 = tpu.matmul %130, %23, %cst_70 {dimension_numbers = #tpu.dot_dimension_numbers<[1], [0], [0], [1], [0, 0, 1, 1], [], []>} : vector<16x32xf32>, vector<32x64xf32>, vector<16x64xf32> -> vector<16x64xf32>
      %132 = vector.broadcast %26 : vector<1x64xf32> to vector<16x64xf32>
      %133 = arith.addf %131, %132 : vector<16x64xf32>
      %cst_71 = arith.constant 0.000000e+00 : f32
      %134 = vector.broadcast %cst_71 : f32 to vector<16x64xf32>
      %135 = arith.maximumf %133, %134 : vector<16x64xf32>
      %cst_72 = arith.constant dense<0.000000e+00> : vector<16x32xf32>
      %136 = tpu.matmul %135, %29, %cst_72 {dimension_numbers = #tpu.dot_dimension_numbers<[1], [0], [0], [1], [0, 0, 1, 1], [], []>} : vector<16x64xf32>, vector<64x32xf32>, vector<16x32xf32> -> vector<16x32xf32>
      %137 = vector.broadcast %32 : vector<1x32xf32> to vector<16x32xf32>
      %138 = arith.addf %136, %137 : vector<16x32xf32>
      %139 = arith.addf %130, %138 : vector<16x32xf32>
      %cst_73 = arith.constant dense<0.000000e+00> : vector<16xf32>
      %140 = vector.multi_reduction <add>, %139, %cst_73 [1] : vector<16x32xf32> to vector<16xf32>
      %141 = vector.shape_cast %140 : vector<16xf32> to vector<16x1xf32>
      %cst_74 = arith.constant 3.200000e+01 : f32
      %142 = vector.broadcast %cst_74 : f32 to vector<16x1xf32>
      %143 = arith.divf %141, %142 : vector<16x1xf32>
      %144 = vector.broadcast %143 : vector<16x1xf32> to vector<16x32xf32>
      %145 = arith.subf %139, %144 : vector<16x32xf32>
      %146 = arith.mulf %145, %145 : vector<16x32xf32>
      %cst_75 = arith.constant dense<0.000000e+00> : vector<16xf32>
      %147 = vector.multi_reduction <add>, %146, %cst_75 [1] : vector<16x32xf32> to vector<16xf32>
      %148 = vector.shape_cast %147 : vector<16xf32> to vector<16x1xf32>
      %cst_76 = arith.constant 3.200000e+01 : f32
      %149 = vector.broadcast %cst_76 : f32 to vector<16x1xf32>
      %150 = arith.divf %148, %149 : vector<16x1xf32>
      %151 = vector.broadcast %143 : vector<16x1xf32> to vector<16x32xf32>
      %152 = arith.subf %139, %151 : vector<16x32xf32>
      %cst_77 = arith.constant 9.99999974E-6 : f32
      %153 = vector.broadcast %cst_77 : f32 to vector<16x1xf32>
      %154 = arith.addf %150, %153 : vector<16x1xf32>
      %155 = math.rsqrt %154 : vector<16x1xf32>
      %156 = vector.broadcast %155 : vector<16x1xf32> to vector<16x32xf32>
      %157 = arith.mulf %152, %156 : vector<16x32xf32>
      %158 = vector.broadcast %35 : vector<1x32xf32> to vector<16x32xf32>
      %159 = arith.mulf %157, %158 : vector<16x32xf32>
      %160 = vector.broadcast %38 : vector<1x32xf32> to vector<16x32xf32>
      %161 = arith.addf %159, %160 : vector<16x32xf32>
      %c0_78 = arith.constant 0 : index
      %c0_79 = arith.constant 0 : index
      %162 = vector.load %arg7[%c0_78, %c0_79] : memref<16x32xf32, #tpu.memory_space<vmem>>, vector<16x32xf32>
      tpu.vector_store %arg7[%c0_78, %c0_79], %161 {strides = array<i32>} : memref<16x32xf32, #tpu.memory_space<vmem>>, vector<16x32xf32>,
    } else {
    }
    %c2_i32_50 = arith.constant 2 : i32
    %42 = arith.cmpi sge, %arg0, %c2_i32_50 : i32
    %43 = arith.extui %42 : i1 to i32
    %c0_i32_51 = arith.constant 0 : i32
    %c0_i32_52 = arith.constant 0 : i32
    %44 = arith.cmpi ne, %43, %c0_i32_52 : i32
    scf.if %44 {
      %c0_54 = arith.constant 0 : index
      %c0_55 = arith.constant 0 : index
      %48 = vector.load %arg8[%c0_54, %c0_55] : memref<16x32xf32, #tpu.memory_space<vmem>>, vector<16x32xf32>
      %c0_56 = arith.constant 0 : index
      %c0_57 = arith.constant 0 : index
      %49 = vector.load %arg7[%c0_56, %c0_57] : memref<16x32xf32, #tpu.memory_space<vmem>>, vector<16x32xf32>
      %cst = arith.constant dense<0.000000e+00> : vector<16x96xf32>
      %50 = tpu.matmul %48, %5, %cst {dimension_numbers = #tpu.dot_dimension_numbers<[1], [0], [0], [1], [0, 0, 1, 1], [], []>} : vector<16x32xf32>, vector<32x96xf32>, vector<16x96xf32> -> vector<16x96xf32>
      %51 = vector.broadcast %8 : vector<1x96xf32> to vector<16x96xf32>
      %52 = arith.addf %50, %51 : vector<16x96xf32>
      %53 = vector.extract_strided_slice %52 {offsets = [0, 0], sizes = [16, 32], strides = [1, 1]} : vector<16x96xf32> to vector<16x32xf32>
      %54 = vector.extract_strided_slice %52 {offsets = [0, 32], sizes = [16, 32], strides = [1, 1]} : vector<16x96xf32> to vector<16x32xf32>
      %55 = vector.extract_strided_slice %52 {offsets = [0, 64], sizes = [16, 32], strides = [1, 1]} : vector<16x96xf32> to vector<16x32xf32>
      %56 = vector.shape_cast %53 : vector<16x32xf32> to vector<2x8x32xf32>
      %57 = vector.shape_cast %54 : vector<16x32xf32> to vector<2x8x32xf32>
      %58 = vector.shape_cast %55 : vector<16x32xf32> to vector<2x8x32xf32>
      %59 = vector.extract_strided_slice %56 {offsets = [0, 0, 0], sizes = [2, 8, 8], strides = [1, 1, 1]} : vector<2x8x32xf32> to vector<2x8x8xf32>
      %60 = vector.extract_strided_slice %56 {offsets = [0, 0, 8], sizes = [2, 8, 8], strides = [1, 1, 1]} : vector<2x8x32xf32> to vector<2x8x8xf32>
      %61 = vector.extract_strided_slice %56 {offsets = [0, 0, 16], sizes = [2, 8, 8], strides = [1, 1, 1]} : vector<2x8x32xf32> to vector<2x8x8xf32>
      %62 = vector.extract_strided_slice %56 {offsets = [0, 0, 24], sizes = [2, 8, 8], strides = [1, 1, 1]} : vector<2x8x32xf32> to vector<2x8x8xf32>
      %63 = tpu.concatenate %59, %60, %61, %62 in 0 : vector<2x8x8xf32>, vector<2x8x8xf32>, vector<2x8x8xf32>, vector<2x8x8xf32> -> vector<8x8x8xf32>
      %64 = vector.extract_strided_slice %57 {offsets = [0, 0, 0], sizes = [2, 8, 8], strides = [1, 1, 1]} : vector<2x8x32xf32> to vector<2x8x8xf32>
      %65 = vector.extract_strided_slice %57 {offsets = [0, 0, 8], sizes = [2, 8, 8], strides = [1, 1, 1]} : vector<2x8x32xf32> to vector<2x8x8xf32>
      %66 = vector.extract_strided_slice %57 {offsets = [0, 0, 16], sizes = [2, 8, 8], strides = [1, 1, 1]} : vector<2x8x32xf32> to vector<2x8x8xf32>
      %67 = vector.extract_strided_slice %57 {offsets = [0, 0, 24], sizes = [2, 8, 8], strides = [1, 1, 1]} : vector<2x8x32xf32> to vector<2x8x8xf32>
      %68 = tpu.concatenate %64, %65, %66, %67 in 0 : vector<2x8x8xf32>, vector<2x8x8xf32>, vector<2x8x8xf32>, vector<2x8x8xf32> -> vector<8x8x8xf32>
      %69 = vector.extract_strided_slice %58 {offsets = [0, 0, 0], sizes = [2, 8, 8], strides = [1, 1, 1]} : vector<2x8x32xf32> to vector<2x8x8xf32>
      %70 = vector.extract_strided_slice %58 {offsets = [0, 0, 8], sizes = [2, 8, 8], strides = [1, 1, 1]} : vector<2x8x32xf32> to vector<2x8x8xf32>
      %71 = vector.extract_strided_slice %58 {offsets = [0, 0, 16], sizes = [2, 8, 8], strides = [1, 1, 1]} : vector<2x8x32xf32> to vector<2x8x8xf32>
      %72 = vector.extract_strided_slice %58 {offsets = [0, 0, 24], sizes = [2, 8, 8], strides = [1, 1, 1]} : vector<2x8x32xf32> to vector<2x8x8xf32>
      %73 = tpu.concatenate %69, %70, %71, %72 in 0 : vector<2x8x8xf32>, vector<2x8x8xf32>, vector<2x8x8xf32>, vector<2x8x8xf32> -> vector<8x8x8xf32>
      "tpu.trace_start"() <{level = 10 : i32, message = "bqd,bkd->bqk"}> : () -> ()
      %cst_58 = arith.constant dense<0.000000e+00> : vector<8x8x8xf32>
      %74 = tpu.matmul %63, %68, %cst_58 {dimension_numbers = #tpu.dot_dimension_numbers<[2], [2], [1], [1], [0, 0, 0, 1, 1, 1], [0], [0]>} : vector<8x8x8xf32>, vector<8x8x8xf32>, vector<8x8x8xf32> -> vector<8x8x8xf32>
      "tpu.trace_stop"() : () -> ()
      %cst_59 = arith.constant 0.353553385 : f32
      %75 = vector.broadcast %cst_59 : f32 to vector<8x8x8xf32>
      %76 = arith.mulf %74, %75 : vector<8x8x8xf32>
      %cst_60 = arith.constant dense<0xFF800000> : vector<8x8xf32>
      %77 = vector.multi_reduction <maximumf>, %76, %cst_60 [2] : vector<8x8x8xf32> to vector<8x8xf32>
      %78 = vector.shape_cast %77 : vector<8x8xf32> to vector<8x8x1xf32>
      %79 = vector.broadcast %78 : vector<8x8x1xf32> to vector<8x8x8xf32>
      %80 = arith.subf %76, %79 : vector<8x8x8xf32>
      %81 = math.exp %80 : vector<8x8x8xf32>
      %cst_61 = arith.constant dense<0.000000e+00> : vector<8x8xf32>
      %82 = vector.multi_reduction <add>, %81, %cst_61 [2] : vector<8x8x8xf32> to vector<8x8xf32>
      %83 = vector.shape_cast %82 : vector<8x8xf32> to vector<8x8x1xf32>
      %84 = tpu.reciprocal %83 {approx = true} : vector<8x8x1xf32> -> vector<8x8x1xf32>
      %85 = vector.broadcast %84 : vector<8x8x1xf32> to vector<8x8x8xf32>
      %86 = arith.mulf %81, %85 : vector<8x8x8xf32>
      "tpu.trace_start"() <{level = 10 : i32, message = "bqk,bkd->bqd"}> : () -> ()
      %cst_62 = arith.constant dense<0.000000e+00> : vector<8x8x8xf32>
      %87 = tpu.matmul %86, %73, %cst_62 {dimension_numbers = #tpu.dot_dimension_numbers<[2], [1], [1], [2], [0, 0, 0, 1, 1, 2], [0], [0]>} : vector<8x8x8xf32>, vector<8x8x8xf32>, vector<8x8x8xf32> -> vector<8x8x8xf32>
      "tpu.trace_stop"() : () -> ()
      %88 = vector.extract_strided_slice %87 {offsets = [0, 0, 0], sizes = [2, 8, 8], strides = [1, 1, 1]} : vector<8x8x8xf32> to vector<2x8x8xf32>
      %89 = vector.shape_cast %88 : vector<2x8x8xf32> to vector<16x8xf32>
      %90 = vector.extract_strided_slice %11 {offsets = [0, 0], sizes = [8, 32], strides = [1, 1]} : vector<32x32xf32> to vector<8x32xf32>
      %cst_63 = arith.constant dense<0.000000e+00> : vector<16x32xf32>
      %91 = tpu.matmul %89, %90, %cst_63 {dimension_numbers = #tpu.dot_dimension_numbers<[1], [0], [0], [1], [0, 0, 1, 1], [], []>} : vector<16x8xf32>, vector<8x32xf32>, vector<16x32xf32> -> vector<16x32xf32>
      %92 = vector.broadcast %14 : vector<1x32xf32> to vector<16x32xf32>
      %93 = arith.addf %92, %91 : vector<16x32xf32>
      %94 = vector.extract_strided_slice %87 {offsets = [2, 0, 0], sizes = [2, 8, 8], strides = [1, 1, 1]} : vector<8x8x8xf32> to vector<2x8x8xf32>
      %95 = vector.shape_cast %94 : vector<2x8x8xf32> to vector<16x8xf32>
      %96 = vector.extract_strided_slice %11 {offsets = [8, 0], sizes = [8, 32], strides = [1, 1]} : vector<32x32xf32> to vector<8x32xf32>
      %cst_64 = arith.constant dense<0.000000e+00> : vector<16x32xf32>
      %97 = tpu.matmul %95, %96, %cst_64 {dimension_numbers = #tpu.dot_dimension_numbers<[1], [0], [0], [1], [0, 0, 1, 1], [], []>} : vector<16x8xf32>, vector<8x32xf32>, vector<16x32xf32> -> vector<16x32xf32>
      %98 = arith.addf %93, %97 : vector<16x32xf32>
      %99 = vector.extract_strided_slice %87 {offsets = [4, 0, 0], sizes = [2, 8, 8], strides = [1, 1, 1]} : vector<8x8x8xf32> to vector<2x8x8xf32>
      %100 = vector.shape_cast %99 : vector<2x8x8xf32> to vector<16x8xf32>
      %101 = vector.extract_strided_slice %11 {offsets = [16, 0], sizes = [8, 32], strides = [1, 1]} : vector<32x32xf32> to vector<8x32xf32>
      %cst_65 = arith.constant dense<0.000000e+00> : vector<16x32xf32>
      %102 = tpu.matmul %100, %101, %cst_65 {dimension_numbers = #tpu.dot_dimension_numbers<[1], [0], [0], [1], [0, 0, 1, 1], [], []>} : vector<16x8xf32>, vector<8x32xf32>, vector<16x32xf32> -> vector<16x32xf32>
      %103 = arith.addf %98, %102 : vector<16x32xf32>
      %104 = vector.extract_strided_slice %87 {offsets = [6, 0, 0], sizes = [2, 8, 8], strides = [1, 1, 1]} : vector<8x8x8xf32> to vector<2x8x8xf32>
      %105 = vector.shape_cast %104 : vector<2x8x8xf32> to vector<16x8xf32>
      %106 = vector.extract_strided_slice %11 {offsets = [24, 0], sizes = [8, 32], strides = [1, 1]} : vector<32x32xf32> to vector<8x32xf32>
      %cst_66 = arith.constant dense<0.000000e+00> : vector<16x32xf32>
      %107 = tpu.matmul %105, %106, %cst_66 {dimension_numbers = #tpu.dot_dimension_numbers<[1], [0], [0], [1], [0, 0, 1, 1], [], []>} : vector<16x8xf32>, vector<8x32xf32>, vector<16x32xf32> -> vector<16x32xf32>
      %108 = arith.addf %103, %107 : vector<16x32xf32>
      %109 = arith.addf %48, %108 : vector<16x32xf32>
      %cst_67 = arith.constant dense<0.000000e+00> : vector<16xf32>
      %110 = vector.multi_reduction <add>, %109, %cst_67 [1] : vector<16x32xf32> to vector<16xf32>
      %111 = vector.shape_cast %110 : vector<16xf32> to vector<16x1xf32>
      %cst_68 = arith.constant 3.200000e+01 : f32
      %112 = vector.broadcast %cst_68 : f32 to vector<16x1xf32>
      %113 = arith.divf %111, %112 : vector<16x1xf32>
      %114 = vector.broadcast %113 : vector<16x1xf32> to vector<16x32xf32>
      %115 = arith.subf %109, %114 : vector<16x32xf32>
      %116 = arith.mulf %115, %115 : vector<16x32xf32>
      %cst_69 = arith.constant dense<0.000000e+00> : vector<16xf32>
      %117 = vector.multi_reduction <add>, %116, %cst_69 [1] : vector<16x32xf32> to vector<16xf32>
      %118 = vector.shape_cast %117 : vector<16xf32> to vector<16x1xf32>
      %cst_70 = arith.constant 3.200000e+01 : f32
      %119 = vector.broadcast %cst_70 : f32 to vector<16x1xf32>
      %120 = arith.divf %118, %119 : vector<16x1xf32>
      %121 = vector.broadcast %113 : vector<16x1xf32> to vector<16x32xf32>
      %122 = arith.subf %109, %121 : vector<16x32xf32>
      %cst_71 = arith.constant 9.99999974E-6 : f32
      %123 = vector.broadcast %cst_71 : f32 to vector<16x1xf32>
      %124 = arith.addf %120, %123 : vector<16x1xf32>
      %125 = math.rsqrt %124 : vector<16x1xf32>
      %126 = vector.broadcast %125 : vector<16x1xf32> to vector<16x32xf32>
      %127 = arith.mulf %122, %126 : vector<16x32xf32>
      %128 = vector.broadcast %17 : vector<1x32xf32> to vector<16x32xf32>
      %129 = arith.mulf %127, %128 : vector<16x32xf32>
      %130 = vector.broadcast %20 : vector<1x32xf32> to vector<16x32xf32>
      %131 = arith.addf %129, %130 : vector<16x32xf32>
      %c0_i32_72 = arith.constant 0 : i32
      %c0_i32_73 = arith.constant 0 : i32
      %132 = tpu.memref_slice %arg3[%c0_i32_51, %c0_i32_72, %c0_i32_73] : memref<1x272x128xf32, #tpu.memory_space<vmem>> -> memref<1x272x128xf32, #tpu.memory_space<vmem>>
      %133 = tpu.memref_squeeze %132 : memref<1x272x128xf32, #tpu.memory_space<vmem>> -> memref<272x128xf32, #tpu.memory_space<vmem>>
      %c160 = arith.constant 160 : index
      %c0_74 = arith.constant 0 : index
      %134 = vector.load %133[%c160, %c0_74] : memref<272x128xf32, #tpu.memory_space<vmem>>, vector<32x32xf32>
      %c0_i32_75 = arith.constant 0 : i32
      %c0_i32_76 = arith.constant 0 : i32
      %135 = tpu.memref_slice %arg3[%c0_i32_51, %c0_i32_75, %c0_i32_76] : memref<1x272x128xf32, #tpu.memory_space<vmem>> -> memref<1x272x128xf32, #tpu.memory_space<vmem>>
      %136 = tpu.memref_squeeze %135 : memref<1x272x128xf32, #tpu.memory_space<vmem>> -> memref<272x128xf32, #tpu.memory_space<vmem>>
      %c264 = arith.constant 264 : index
      %c0_77 = arith.constant 0 : index
      %137 = vector.load %136[%c264, %c0_77] : memref<272x128xf32, #tpu.memory_space<vmem>>, vector<1x32xf32>
      %c0_i32_78 = arith.constant 0 : i32
      %c0_i32_79 = arith.constant 0 : i32
      %138 = tpu.memref_slice %arg3[%c0_i32_51, %c0_i32_78, %c0_i32_79] : memref<1x272x128xf32, #tpu.memory_space<vmem>> -> memref<1x272x128xf32, #tpu.memory_space<vmem>>
      %139 = tpu.memref_squeeze %138 : memref<1x272x128xf32, #tpu.memory_space<vmem>> -> memref<272x128xf32, #tpu.memory_space<vmem>>
      %c192 = arith.constant 192 : index
      %c0_80 = arith.constant 0 : index
      %140 = vector.load %139[%c192, %c0_80] : memref<272x128xf32, #tpu.memory_space<vmem>>, vector<32x64xf32>
      %c0_i32_81 = arith.constant 0 : i32
      %c0_i32_82 = arith.constant 0 : i32
      %141 = tpu.memref_slice %arg3[%c0_i32_51, %c0_i32_81, %c0_i32_82] : memref<1x272x128xf32, #tpu.memory_space<vmem>> -> memref<1x272x128xf32, #tpu.memory_space<vmem>>
      %142 = tpu.memref_squeeze %141 : memref<1x272x128xf32, #tpu.memory_space<vmem>> -> memref<272x128xf32, #tpu.memory_space<vmem>>
      %c265 = arith.constant 265 : index
      %c0_83 = arith.constant 0 : index
      %143 = vector.load %142[%c265, %c0_83] : memref<272x128xf32, #tpu.memory_space<vmem>>, vector<1x64xf32>
      %c0_i32_84 = arith.constant 0 : i32
      %c0_i32_85 = arith.constant 0 : i32
      %144 = tpu.memref_slice %arg3[%c0_i32_51, %c0_i32_84, %c0_i32_85] : memref<1x272x128xf32, #tpu.memory_space<vmem>> -> memref<1x272x128xf32, #tpu.memory_space<vmem>>
      %145 = tpu.memref_squeeze %144 : memref<1x272x128xf32, #tpu.memory_space<vmem>> -> memref<272x128xf32, #tpu.memory_space<vmem>>
      %c224 = arith.constant 224 : index
      %c0_86 = arith.constant 0 : index
      %146 = vector.load %145[%c224, %c0_86] : memref<272x128xf32, #tpu.memory_space<vmem>>, vector<32x32xf32>
      %c0_i32_87 = arith.constant 0 : i32
      %c0_i32_88 = arith.constant 0 : i32
      %147 = tpu.memref_slice %arg3[%c0_i32_51, %c0_i32_87, %c0_i32_88] : memref<1x272x128xf32, #tpu.memory_space<vmem>> -> memref<1x272x128xf32, #tpu.memory_space<vmem>>
      %148 = tpu.memref_squeeze %147 : memref<1x272x128xf32, #tpu.memory_space<vmem>> -> memref<272x128xf32, #tpu.memory_space<vmem>>
      %c266 = arith.constant 266 : index
      %c0_89 = arith.constant 0 : index
      %149 = vector.load %148[%c266, %c0_89] : memref<272x128xf32, #tpu.memory_space<vmem>>, vector<1x32xf32>
      %cst_90 = arith.constant dense<0.000000e+00> : vector<16x32xf32>
      %150 = tpu.matmul %131, %134, %cst_90 {dimension_numbers = #tpu.dot_dimension_numbers<[1], [0], [0], [1], [0, 0, 1, 1], [], []>} : vector<16x32xf32>, vector<32x32xf32>, vector<16x32xf32> -> vector<16x32xf32>
      %151 = vector.broadcast %137 : vector<1x32xf32> to vector<16x32xf32>
      %152 = arith.addf %150, %151 : vector<16x32xf32>
      %cst_91 = arith.constant dense<0.000000e+00> : vector<16x64xf32>
      %153 = tpu.matmul %49, %140, %cst_91 {dimension_numbers = #tpu.dot_dimension_numbers<[1], [0], [0], [1], [0, 0, 1, 1], [], []>} : vector<16x32xf32>, vector<32x64xf32>, vector<16x64xf32> -> vector<16x64xf32>
      %154 = vector.broadcast %143 : vector<1x64xf32> to vector<16x64xf32>
      %155 = arith.addf %153, %154 : vector<16x64xf32>
      %156 = vector.extract_strided_slice %155 {offsets = [0, 0], sizes = [16, 32], strides = [1, 1]} : vector<16x64xf32> to vector<16x32xf32>
      %157 = vector.extract_strided_slice %155 {offsets = [0, 32], sizes = [16, 32], strides = [1, 1]} : vector<16x64xf32> to vector<16x32xf32>
      %158 = vector.shape_cast %152 : vector<16x32xf32> to vector<2x8x32xf32>
      %159 = vector.shape_cast %156 : vector<16x32xf32> to vector<2x8x32xf32>
      %160 = vector.shape_cast %157 : vector<16x32xf32> to vector<2x8x32xf32>
      %161 = vector.extract_strided_slice %158 {offsets = [0, 0, 0], sizes = [2, 8, 8], strides = [1, 1, 1]} : vector<2x8x32xf32> to vector<2x8x8xf32>
      %162 = vector.extract_strided_slice %158 {offsets = [0, 0, 8], sizes = [2, 8, 8], strides = [1, 1, 1]} : vector<2x8x32xf32> to vector<2x8x8xf32>
      %163 = vector.extract_strided_slice %158 {offsets = [0, 0, 16], sizes = [2, 8, 8], strides = [1, 1, 1]} : vector<2x8x32xf32> to vector<2x8x8xf32>
      %164 = vector.extract_strided_slice %158 {offsets = [0, 0, 24], sizes = [2, 8, 8], strides = [1, 1, 1]} : vector<2x8x32xf32> to vector<2x8x8xf32>
      %165 = tpu.concatenate %161, %162, %163, %164 in 0 : vector<2x8x8xf32>, vector<2x8x8xf32>, vector<2x8x8xf32>, vector<2x8x8xf32> -> vector<8x8x8xf32>
      %166 = vector.extract_strided_slice %159 {offsets = [0, 0, 0], sizes = [2, 8, 8], strides = [1, 1, 1]} : vector<2x8x32xf32> to vector<2x8x8xf32>
      %167 = vector.extract_strided_slice %159 {offsets = [0, 0, 8], sizes = [2, 8, 8], strides = [1, 1, 1]} : vector<2x8x32xf32> to vector<2x8x8xf32>
      %168 = vector.extract_strided_slice %159 {offsets = [0, 0, 16], sizes = [2, 8, 8], strides = [1, 1, 1]} : vector<2x8x32xf32> to vector<2x8x8xf32>
      %169 = vector.extract_strided_slice %159 {offsets = [0, 0, 24], sizes = [2, 8, 8], strides = [1, 1, 1]} : vector<2x8x32xf32> to vector<2x8x8xf32>
      %170 = tpu.concatenate %166, %167, %168, %169 in 0 : vector<2x8x8xf32>, vector<2x8x8xf32>, vector<2x8x8xf32>, vector<2x8x8xf32> -> vector<8x8x8xf32>
      %171 = vector.extract_strided_slice %160 {offsets = [0, 0, 0], sizes = [2, 8, 8], strides = [1, 1, 1]} : vector<2x8x32xf32> to vector<2x8x8xf32>
      %172 = vector.extract_strided_slice %160 {offsets = [0, 0, 8], sizes = [2, 8, 8], strides = [1, 1, 1]} : vector<2x8x32xf32> to vector<2x8x8xf32>
      %173 = vector.extract_strided_slice %160 {offsets = [0, 0, 16], sizes = [2, 8, 8], strides = [1, 1, 1]} : vector<2x8x32xf32> to vector<2x8x8xf32>
      %174 = vector.extract_strided_slice %160 {offsets = [0, 0, 24], sizes = [2, 8, 8], strides = [1, 1, 1]} : vector<2x8x32xf32> to vector<2x8x8xf32>
      %175 = tpu.concatenate %171, %172, %173, %174 in 0 : vector<2x8x8xf32>, vector<2x8x8xf32>, vector<2x8x8xf32>, vector<2x8x8xf32> -> vector<8x8x8xf32>
      "tpu.trace_start"() <{level = 10 : i32, message = "bqd,bkd->bqk"}> : () -> ()
      %cst_92 = arith.constant dense<0.000000e+00> : vector<8x8x8xf32>
      %176 = tpu.matmul %165, %170, %cst_92 {dimension_numbers = #tpu.dot_dimension_numbers<[2], [2], [1], [1], [0, 0, 0, 1, 1, 1], [0], [0]>} : vector<8x8x8xf32>, vector<8x8x8xf32>, vector<8x8x8xf32> -> vector<8x8x8xf32>
      "tpu.trace_stop"() : () -> ()
      %cst_93 = arith.constant 0.353553385 : f32
      %177 = vector.broadcast %cst_93 : f32 to vector<8x8x8xf32>
      %178 = arith.mulf %176, %177 : vector<8x8x8xf32>
      %cst_94 = arith.constant dense<0xFF800000> : vector<8x8xf32>
      %179 = vector.multi_reduction <maximumf>, %178, %cst_94 [2] : vector<8x8x8xf32> to vector<8x8xf32>
      %180 = vector.shape_cast %179 : vector<8x8xf32> to vector<8x8x1xf32>
      %181 = vector.broadcast %180 : vector<8x8x1xf32> to vector<8x8x8xf32>
      %182 = arith.subf %178, %181 : vector<8x8x8xf32>
      %183 = math.exp %182 : vector<8x8x8xf32>
      %cst_95 = arith.constant dense<0.000000e+00> : vector<8x8xf32>
      %184 = vector.multi_reduction <add>, %183, %cst_95 [2] : vector<8x8x8xf32> to vector<8x8xf32>
      %185 = vector.shape_cast %184 : vector<8x8xf32> to vector<8x8x1xf32>
      %186 = tpu.reciprocal %185 {approx = true} : vector<8x8x1xf32> -> vector<8x8x1xf32>
      %187 = vector.broadcast %186 : vector<8x8x1xf32> to vector<8x8x8xf32>
      %188 = arith.mulf %183, %187 : vector<8x8x8xf32>
      "tpu.trace_start"() <{level = 10 : i32, message = "bqk,bkd->bqd"}> : () -> ()
      %cst_96 = arith.constant dense<0.000000e+00> : vector<8x8x8xf32>
      %189 = tpu.matmul %188, %175, %cst_96 {dimension_numbers = #tpu.dot_dimension_numbers<[2], [1], [1], [2], [0, 0, 0, 1, 1, 2], [0], [0]>} : vector<8x8x8xf32>, vector<8x8x8xf32>, vector<8x8x8xf32> -> vector<8x8x8xf32>
      "tpu.trace_stop"() : () -> ()
      %190 = vector.extract_strided_slice %189 {offsets = [0, 0, 0], sizes = [2, 8, 8], strides = [1, 1, 1]} : vector<8x8x8xf32> to vector<2x8x8xf32>
      %191 = vector.shape_cast %190 : vector<2x8x8xf32> to vector<16x8xf32>
      %192 = vector.extract_strided_slice %146 {offsets = [0, 0], sizes = [8, 32], strides = [1, 1]} : vector<32x32xf32> to vector<8x32xf32>
      %cst_97 = arith.constant dense<0.000000e+00> : vector<16x32xf32>
      %193 = tpu.matmul %191, %192, %cst_97 {dimension_numbers = #tpu.dot_dimension_numbers<[1], [0], [0], [1], [0, 0, 1, 1], [], []>} : vector<16x8xf32>, vector<8x32xf32>, vector<16x32xf32> -> vector<16x32xf32>
      %194 = vector.broadcast %149 : vector<1x32xf32> to vector<16x32xf32>
      %195 = arith.addf %194, %193 : vector<16x32xf32>
      %196 = vector.extract_strided_slice %189 {offsets = [2, 0, 0], sizes = [2, 8, 8], strides = [1, 1, 1]} : vector<8x8x8xf32> to vector<2x8x8xf32>
      %197 = vector.shape_cast %196 : vector<2x8x8xf32> to vector<16x8xf32>
      %198 = vector.extract_strided_slice %146 {offsets = [8, 0], sizes = [8, 32], strides = [1, 1]} : vector<32x32xf32> to vector<8x32xf32>
      %cst_98 = arith.constant dense<0.000000e+00> : vector<16x32xf32>
      %199 = tpu.matmul %197, %198, %cst_98 {dimension_numbers = #tpu.dot_dimension_numbers<[1], [0], [0], [1], [0, 0, 1, 1], [], []>} : vector<16x8xf32>, vector<8x32xf32>, vector<16x32xf32> -> vector<16x32xf32>
      %200 = arith.addf %195, %199 : vector<16x32xf32>
      %201 = vector.extract_strided_slice %189 {offsets = [4, 0, 0], sizes = [2, 8, 8], strides = [1, 1, 1]} : vector<8x8x8xf32> to vector<2x8x8xf32>
      %202 = vector.shape_cast %201 : vector<2x8x8xf32> to vector<16x8xf32>
      %203 = vector.extract_strided_slice %146 {offsets = [16, 0], sizes = [8, 32], strides = [1, 1]} : vector<32x32xf32> to vector<8x32xf32>
      %cst_99 = arith.constant dense<0.000000e+00> : vector<16x32xf32>
      %204 = tpu.matmul %202, %203, %cst_99 {dimension_numbers = #tpu.dot_dimension_numbers<[1], [0], [0], [1], [0, 0, 1, 1], [], []>} : vector<16x8xf32>, vector<8x32xf32>, vector<16x32xf32> -> vector<16x32xf32>
      %205 = arith.addf %200, %204 : vector<16x32xf32>
      %206 = vector.extract_strided_slice %189 {offsets = [6, 0, 0], sizes = [2, 8, 8], strides = [1, 1, 1]} : vector<8x8x8xf32> to vector<2x8x8xf32>
      %207 = vector.shape_cast %206 : vector<2x8x8xf32> to vector<16x8xf32>
      %208 = vector.extract_strided_slice %146 {offsets = [24, 0], sizes = [8, 32], strides = [1, 1]} : vector<32x32xf32> to vector<8x32xf32>
      %cst_100 = arith.constant dense<0.000000e+00> : vector<16x32xf32>
      %209 = tpu.matmul %207, %208, %cst_100 {dimension_numbers = #tpu.dot_dimension_numbers<[1], [0], [0], [1], [0, 0, 1, 1], [], []>} : vector<16x8xf32>, vector<8x32xf32>, vector<16x32xf32> -> vector<16x32xf32>
      %210 = arith.addf %205, %209 : vector<16x32xf32>
      %c0_i32_101 = arith.constant 0 : i32
      %c0_i32_102 = arith.constant 0 : i32
      %211 = tpu.memref_slice %arg3[%c0_i32_51, %c0_i32_101, %c0_i32_102] : memref<1x272x128xf32, #tpu.memory_space<vmem>> -> memref<1x272x128xf32, #tpu.memory_space<vmem>>
      %212 = tpu.memref_squeeze %211 : memref<1x272x128xf32, #tpu.memory_space<vmem>> -> memref<272x128xf32, #tpu.memory_space<vmem>>
      %c267 = arith.constant 267 : index
      %c0_103 = arith.constant 0 : index
      %213 = vector.load %212[%c267, %c0_103] : memref<272x128xf32, #tpu.memory_space<vmem>>, vector<1x32xf32>
      %c0_i32_104 = arith.constant 0 : i32
      %c0_i32_105 = arith.constant 0 : i32
      %214 = tpu.memref_slice %arg3[%c0_i32_51, %c0_i32_104, %c0_i32_105] : memref<1x272x128xf32, #tpu.memory_space<vmem>> -> memref<1x272x128xf32, #tpu.memory_space<vmem>>
      %215 = tpu.memref_squeeze %214 : memref<1x272x128xf32, #tpu.memory_space<vmem>> -> memref<272x128xf32, #tpu.memory_space<vmem>>
      %c268 = arith.constant 268 : index
      %c0_106 = arith.constant 0 : index
      %216 = vector.load %215[%c268, %c0_106] : memref<272x128xf32, #tpu.memory_space<vmem>>, vector<1x32xf32>
      %217 = arith.addf %131, %210 : vector<16x32xf32>
      %cst_107 = arith.constant dense<0.000000e+00> : vector<16xf32>
      %218 = vector.multi_reduction <add>, %217, %cst_107 [1] : vector<16x32xf32> to vector<16xf32>
      %219 = vector.shape_cast %218 : vector<16xf32> to vector<16x1xf32>
      %cst_108 = arith.constant 3.200000e+01 : f32
      %220 = vector.broadcast %cst_108 : f32 to vector<16x1xf32>
      %221 = arith.divf %219, %220 : vector<16x1xf32>
      %222 = vector.broadcast %221 : vector<16x1xf32> to vector<16x32xf32>
      %223 = arith.subf %217, %222 : vector<16x32xf32>
      %224 = arith.mulf %223, %223 : vector<16x32xf32>
      %cst_109 = arith.constant dense<0.000000e+00> : vector<16xf32>
      %225 = vector.multi_reduction <add>, %224, %cst_109 [1] : vector<16x32xf32> to vector<16xf32>
      %226 = vector.shape_cast %225 : vector<16xf32> to vector<16x1xf32>
      %cst_110 = arith.constant 3.200000e+01 : f32
      %227 = vector.broadcast %cst_110 : f32 to vector<16x1xf32>
      %228 = arith.divf %226, %227 : vector<16x1xf32>
      %229 = vector.broadcast %221 : vector<16x1xf32> to vector<16x32xf32>
      %230 = arith.subf %217, %229 : vector<16x32xf32>
      %cst_111 = arith.constant 9.99999974E-6 : f32
      %231 = vector.broadcast %cst_111 : f32 to vector<16x1xf32>
      %232 = arith.addf %228, %231 : vector<16x1xf32>
      %233 = math.rsqrt %232 : vector<16x1xf32>
      %234 = vector.broadcast %233 : vector<16x1xf32> to vector<16x32xf32>
      %235 = arith.mulf %230, %234 : vector<16x32xf32>
      %236 = vector.broadcast %213 : vector<1x32xf32> to vector<16x32xf32>
      %237 = arith.mulf %235, %236 : vector<16x32xf32>
      %238 = vector.broadcast %216 : vector<1x32xf32> to vector<16x32xf32>
      %239 = arith.addf %237, %238 : vector<16x32xf32>
      %cst_112 = arith.constant dense<0.000000e+00> : vector<16x64xf32>
      %240 = tpu.matmul %239, %23, %cst_112 {dimension_numbers = #tpu.dot_dimension_numbers<[1], [0], [0], [1], [0, 0, 1, 1], [], []>} : vector<16x32xf32>, vector<32x64xf32>, vector<16x64xf32> -> vector<16x64xf32>
      %241 = vector.broadcast %26 : vector<1x64xf32> to vector<16x64xf32>
      %242 = arith.addf %240, %241 : vector<16x64xf32>
      %cst_113 = arith.constant 0.000000e+00 : f32
      %243 = vector.broadcast %cst_113 : f32 to vector<16x64xf32>
      %244 = arith.maximumf %242, %243 : vector<16x64xf32>
      %cst_114 = arith.constant dense<0.000000e+00> : vector<16x32xf32>
      %245 = tpu.matmul %244, %29, %cst_114 {dimension_numbers = #tpu.dot_dimension_numbers<[1], [0], [0], [1], [0, 0, 1, 1], [], []>} : vector<16x64xf32>, vector<64x32xf32>, vector<16x32xf32> -> vector<16x32xf32>
      %246 = vector.broadcast %32 : vector<1x32xf32> to vector<16x32xf32>
      %247 = arith.addf %245, %246 : vector<16x32xf32>
      %248 = arith.addf %239, %247 : vector<16x32xf32>
      %cst_115 = arith.constant dense<0.000000e+00> : vector<16xf32>
      %249 = vector.multi_reduction <add>, %248, %cst_115 [1] : vector<16x32xf32> to vector<16xf32>
      %250 = vector.shape_cast %249 : vector<16xf32> to vector<16x1xf32>
      %cst_116 = arith.constant 3.200000e+01 : f32
      %251 = vector.broadcast %cst_116 : f32 to vector<16x1xf32>
      %252 = arith.divf %250, %251 : vector<16x1xf32>
      %253 = vector.broadcast %252 : vector<16x1xf32> to vector<16x32xf32>
      %254 = arith.subf %248, %253 : vector<16x32xf32>
      %255 = arith.mulf %254, %254 : vector<16x32xf32>
      %cst_117 = arith.constant dense<0.000000e+00> : vector<16xf32>
      %256 = vector.multi_reduction <add>, %255, %cst_117 [1] : vector<16x32xf32> to vector<16xf32>
      %257 = vector.shape_cast %256 : vector<16xf32> to vector<16x1xf32>
      %cst_118 = arith.constant 3.200000e+01 : f32
      %258 = vector.broadcast %cst_118 : f32 to vector<16x1xf32>
      %259 = arith.divf %257, %258 : vector<16x1xf32>
      %260 = vector.broadcast %252 : vector<16x1xf32> to vector<16x32xf32>
      %261 = arith.subf %248, %260 : vector<16x32xf32>
      %cst_119 = arith.constant 9.99999974E-6 : f32
      %262 = vector.broadcast %cst_119 : f32 to vector<16x1xf32>
      %263 = arith.addf %259, %262 : vector<16x1xf32>
      %264 = math.rsqrt %263 : vector<16x1xf32>
      %265 = vector.broadcast %264 : vector<16x1xf32> to vector<16x32xf32>
      %266 = arith.mulf %261, %265 : vector<16x32xf32>
      %267 = vector.broadcast %35 : vector<1x32xf32> to vector<16x32xf32>
      %268 = arith.mulf %266, %267 : vector<16x32xf32>
      %269 = vector.broadcast %38 : vector<1x32xf32> to vector<16x32xf32>
      %270 = arith.addf %268, %269 : vector<16x32xf32>
      %c0_120 = arith.constant 0 : index
      %c0_121 = arith.constant 0 : index
      %271 = vector.load %arg8[%c0_120, %c0_121] : memref<16x32xf32, #tpu.memory_space<vmem>>, vector<16x32xf32>
      tpu.vector_store %arg8[%c0_120, %c0_121], %270 {strides = array<i32>} : memref<16x32xf32, #tpu.memory_space<vmem>>, vector<16x32xf32>,
    } else {
    }
    %c3_i32 = arith.constant 3 : i32
    %45 = arith.cmpi eq, %arg0, %c3_i32 : i32
    %46 = arith.extui %45 : i1 to i32
    %c0_i32_53 = arith.constant 0 : i32
    %47 = arith.cmpi ne, %46, %c0_i32_53 : i32
    scf.if %47 {
      %c0_54 = arith.constant 0 : index
      %c0_55 = arith.constant 0 : index
      %48 = vector.load %arg8[%c0_54, %c0_55] : memref<16x32xf32, #tpu.memory_space<vmem>>, vector<16x32xf32>
      %c0_56 = arith.constant 0 : index
      %c0_57 = arith.constant 0 : index
      %49 = vector.load %arg4[%c0_56, %c0_57] : memref<32x128xf32, #tpu.memory_space<vmem>>, vector<32x128xf32>
      %cst = arith.constant dense<0.000000e+00> : vector<16x128xf32>
      %50 = tpu.matmul %48, %49, %cst {dimension_numbers = #tpu.dot_dimension_numbers<[1], [0], [0], [1], [0, 0, 1, 1], [], []>} : vector<16x32xf32>, vector<32x128xf32>, vector<16x128xf32> -> vector<16x128xf32>
      %c0_58 = arith.constant 0 : index
      %c0_59 = arith.constant 0 : index
      %51 = vector.load %arg5[%c0_58, %c0_59] : memref<1x128xf32, #tpu.memory_space<vmem>>, vector<1x128xf32>
      %52 = vector.broadcast %51 : vector<1x128xf32> to vector<16x128xf32>
      %53 = arith.addf %50, %52 : vector<16x128xf32>
      %c0_60 = arith.constant 0 : index
      %c0_61 = arith.constant 0 : index
      %54 = vector.load %arg6[%c0_60, %c0_61] : memref<16x128xf32, #tpu.memory_space<vmem>>, vector<16x128xf32>
      tpu.vector_store %arg6[%c0_60, %c0_61], %53 {strides = array<i32>} : memref<16x128xf32, #tpu.memory_space<vmem>>, vector<16x128xf32>,
    } else {
    }
    return
  }
  func.func @transform_0(%arg0: i32) -> (i32, i32) {
    %c0_i32 = arith.constant 0 : i32
    %c0_i32_0 = arith.constant 0 : i32
    %c0_i32_1 = arith.constant 0 : i32
    return %c0_i32, %c0_i32_0 : i32, i32
  }
  func.func @transform_1(%arg0: i32) -> (i32, i32) {
    %c0_i32 = arith.constant 0 : i32
    %c0_i32_0 = arith.constant 0 : i32
    %c0_i32_1 = arith.constant 0 : i32
    return %c0_i32, %c0_i32_0 : i32, i32
  }
  func.func @transform_2(%arg0: i32) -> (i32, i32, i32) {
    %c0_i32 = arith.constant 0 : i32
    %c0_i32_0 = arith.constant 0 : i32
    %c0_i32_1 = arith.constant 0 : i32
    return %arg0, %c0_i32, %c0_i32_0 : i32, i32, i32
  }
  func.func @transform_3(%arg0: i32) -> (i32, i32) {
    %c0_i32 = arith.constant 0 : i32
    %c0_i32_0 = arith.constant 0 : i32
    %c0_i32_1 = arith.constant 0 : i32
    return %c0_i32, %c0_i32_0 : i32, i32
  }
  func.func @transform_4(%arg0: i32) -> (i32, i32) {
    %c0_i32 = arith.constant 0 : i32
    %c0_i32_0 = arith.constant 0 : i32
    %c0_i32_1 = arith.constant 0 : i32
    return %c0_i32, %c0_i32_0 : i32, i32
  }
  func.func @transform_5(%arg0: i32) -> (i32, i32) {
    %c0_i32 = arith.constant 0 : i32
    %c0_i32_0 = arith.constant 0 : i32
    %c0_i32_1 = arith.constant 0 : i32
    return %c0_i32, %c0_i32_0 : i32, i32
  }
}

</mosaic_0001>

<bundles_post_ra>
// kernel: transformer_forward.1
= control target key start
LH: loop header
LB: loop body
LE: loop exit
PB: predicated region body
PF: predicated region fallthrough
CT: control target
= control target key end

     0   :  { %10 = vsyncpa [#allocation5], 0  ;;  %s4028_s0 = inlined_call_operand.vmem [shape: f32[16,32], index: 0, kind: input, shape index: {}]   ;;  %s4029_s1 = inlined_call_operand.vmem [shape: f32[16,32], index: 1, kind: input, shape index: {}]   ;;  %s4030_s2 = inlined_call_operand.hbm [shape: f32[4,272,128], index: 2, kind: input, shape index: {}]   ;;  %s4031_s3 = inlined_call_operand.vmem [shape: f32[32,128], index: 3, kind: input, shape index: {}]   ;;  %s4032_s4 = inlined_call_operand.vmem [shape: f32[1,128], index: 4, kind: input, shape index: {}]   ;;  %s4033_s5 = inlined_call_operand.vmem [shape: f32[16,128], index: 5, kind: output, shape index: {}]  }
   0x1   :  { %12 = vsyncpa [#allocation5 + $0x1], 0  ;;  %s3338_s18 = smov 0   ;;  %s3340_s19 = smov 0  }
   0x2   :  { %s3342_s20 = smov 0   ;;  %s3344_s21 = smov 0  }
   0x3 LB: > { %s3357_s22 = sadd.s32 4294967295, %s3291_s21   ;;  %s3360_s23 = sadd.s32 1, %s3291_s21   ;;  %s3291_s21 = sphi %s3344_s21, %s4039_s21   ;;  %s3287_s20 = sphi %s3342_s20, %s4038_s20   ;;  %s3283_s19 = sphi %s3340_s19, %s4037_s19   ;;  %s3279_s18 = sphi %s3338_s18, %s4036_s18  }
   0x4   : > { %s64_s24 = ssub.s32 %s3291_s21, %s3360_s23  ;;  %s67_s25 = sadd.s32 1, %s3287_s20 }
   0x5   : > { %p65_p0 = scmp.eq.s32.totalorder %s64_s24, 0  ;;  %p74_p1 = scmp.ne.s32.totalorder %s3287_s20, %s3283_s19 }
   0x6   : > { %p75_p2 = scmp.eq.s32.totalorder %s3291_s21, 0  ;;  %p80_p3 = scmp.ne.s32.totalorder %s3283_s19, %s3279_s18 }
   0x7   : > { %s3370_s26 = scalar_select %p65_p0, %s3287_s20, %s67_s25  }
   0x8   : > { %p76_p4 = por %p75_p2, %p74_p1  ;;  %p81_p5 = scmp.eq.s32.totalorder %s3357_s22, 0 }
   0x9   : > { %p3008_p6 = scmp.lt.s32.totalorder %s3291_s21, 4  ;;  %s179_s28 = sand.u32 1, %s3287_s20  }
   0xa   : > { %p3374_p7 = por %p81_p5, %p80_p3  ;;  %s2999_s29 = smul.u32 272, %s179_s28 }
   0xb   : > { %s3000_s30 = smul.u32 272, %s3291_s21  ;;  %p3380_p8 = pnand %p3008_p6, %p76_p4 }
   0xc   : > { %s183_s10 = scalar_lea.vmem [#allocation4], %s2999_s29  ;;  %p2874_p9 = scmp.ge.s32.totalorder %s3291_s21, 1 }
   0xd   : > { %s188_s9 = scalar_lea.hbm %s4030_s2, %s3000_s30  ;;  %s191_s11 = sshll.u32 %s183_s10, 4  ;;  %s192_s11 = int_to_ptr.vmem [resolvable:$true] %s191_s11 }
   0xe   : > { %s189_s12 = sshll.u32 %s188_s9, 4  ;;  %s180_s13 = scalar_lea.sflag [#allocation5], %s179_s28  ;;  %s190_s12 = int_to_ptr.hbm [resolvable:$true] %s189_s12 }
   0xf   : > { %s3227_s14 = sshra.s32 %s190_s12, 4  ;;  %p3231_p11 = pneg %p3380_p8  ;;  %s3228_s14 = int_to_ptr.hbm [resolvable:$true] %s3227_s14 }
  0x10   : > { %s3229_s15 = scalar_lea.hbm %s3228_s14, 272  ;;  %s3234_s18 = scalar_lea.hbm %s4030_s2, 1088 }
  0x11   : > { %p3230_p10 = scmp.ne.s32.totalorder %s3228_s14, %s3229_s15  ;;  %p3235_p0 = scmp.lt.s32.totalorder %s3228_s14, %s4030_s2 }
  0x12   : > { %p3236_p1 = scmp.lt.s32.totalorder %s3234_s18, %s3229_s15 }
  0x13   : > { %p3232_p12 = pnand %p3231_p11, %p3230_p10 }
  0x14   : > { %p3237_p2 = por %p3236_p1, %p3235_p0 }
  0x15   : > { %p3233_p13 = pneg %p3232_p12 }
  0x17   : > { %p3238_p3 = pnand %p3237_p2, %p3233_p13 }
  0x19   : > { %3241 = shalt.err (!%p3238_p3)
}
  0x1a   : > { %s3293_s28 = smov 128   ;;  %s3294_s29 = smov 8  }
  0x1b   : > { %3007 = dma.hbm_to_vmem [thread:$0]  (!%p3380_p8), %s190_s12, 4352, %s192_s11, %s180_s13, %s3293_s28, %s3293_s28, %s3294_s29  }
  0x1c   : > { %p199_p4 = scmp.lt.s32.totalorder %s3291_s21, 5 }
  0x1e   : > { %p200_p5 = pnand %p2874_p9, %p199_p4 }
  0x1f   : > { %s205_s30 = sand.u32 (!%p200_p5), 1, %s3283_s19  }
  0x20   : > { %203 = sbr.rel (%p200_p5) target bundleno = 5170 (0x1432), region = 40  ;;  %s206_s8 = scalar_lea.sflag (!%p200_p5), [#allocation5], %s205_s30 }
  0x21   : > { %s3001_s7 = smul.u32 (!%p200_p5), 272, %s205_s30 }
  0x23   : > { %s3402_s9 = scalar_lea.vmem (!%p200_p5), [#allocation4], %s3001_s7 }
  0x25   : > { %3274 = dma.done.wait (%p3374_p7), %s206_s8, 4352  }
  0x26   : > { %3276 = vsyncadd (%p3374_p7), %s206_s8, 4294962944  ;;  %p2875_p6 = scmp.ne.s32.totalorder %s3357_s22, 0 }
  0x28   : > { %235 = sbr.rel (%p2875_p6) target bundleno = 52 (0x34), region = 48 }
  0x2d   : > { %v236_v0 = vld [vmem:[%s4028_s0] sm:$0xff]  ;;  %vm238_vm0 = vcmask 261120   ;;  %v237_v1 = vld [vmem:[%s4028_s0 + $0x8] sm:$0xff]  ;;  %v3295_v4 = vmov 0.0  }
  0x2e   : > { %v241_v2 = vld [vmem:[%s4029_s1] sm:$0xff]  ;;  %239 = vst.msk [vmem:[#allocation2] sm:$0xff] %vm238_vm0, %v236_v0  ;;  %v242_v3 = vld [vmem:[%s4029_s1 + $0x8] sm:$0xff] }
  0x2f   : > { %240 = vst.msk [vmem:[#allocation2 + $0x8] sm:$0xff] %vm238_vm0, %v237_v1 }
  0x30   : > { %243 = vst.msk [vmem:[#allocation3] sm:$0xff] %vm238_vm0, %v241_v2 }
  0x31   : > { %244 = vst.msk [vmem:[#allocation3 + $0x8] sm:$0xff] %vm238_vm0, %v242_v3 }
  0x32   : > { %245 = vst [vmem:[%s4033_s5] sm:$0xff] %v3295_v4 }
  0x33   : > { %246 = vst [vmem:[%s4033_s5 + $0x8] sm:$0xff] %v3295_v4 }
  0x34 PF: > { %v3428_v5 = vld [vmem:[%s3402_s9] sm:$0xff]  ;;  %v3431_v6 = vld [vmem:[%s3402_s9 + $0x8] sm:$0xff]  ;;  %v3434_v7 = vld [vmem:[%s3402_s9 + $0x10] sm:$0xff]  ;;  %p2876_p7 = scmp.ge.s32.totalorder %s3357_s22, 2 }
  0x35   : > { %v3437_v8 = vld [vmem:[%s3402_s9 + $0x18] sm:$0xff]  ;;  %v3440_v9 = vld [vmem:[%s3402_s9 + $0x100] sm:$0x1]  ;;  %v3446_v11 = vld [vmem:[%s3402_s9 + $0x28] sm:$0xff]  ;;  %s3296_s24 = smov (!%p2876_p7), 104   ;;  %s3297_s25 = smov (!%p2876_p7), 120  }
  0x36   : > { %v3443_v10 = vld [vmem:[%s3402_s9 + $0x20] sm:$0xff]  ;;  %v3449_v12 = vld [vmem:[%s3402_s9 + $0x30] sm:$0xff]  ;;  %v3452_v13 = vld [vmem:[%s3402_s9 + $0x38] sm:$0xff]  ;;  %s3298_s28 = smov (!%p2876_p7), 112   ;;  %s3299_s29 = smov (!%p2876_p7), 96  }
  0x37   : > { %v3455_v14 = vld [vmem:[%s3402_s9 + $0x101] sm:$0x1]  ;;  %v3458_v15 = vld [vmem:[%s3402_s9 + $0x102] sm:$0x1]  ;;  %v3461_v16 = vld [vmem:[%s3402_s9 + $0x103] sm:$0x1] }
  0x38   : > { %v3464_v17 = vld [vmem:[%s3402_s9 + $0x40] sm:$0xff]  ;;  %v3467_v18 = vld [vmem:[%s3402_s9 + $0x48] sm:$0xff]  ;;  %v3470_v19 = vld [vmem:[%s3402_s9 + $0x50] sm:$0xff]  ;;  %s3300_s30 = smov (!%p2876_p7), 64  }
  0x39   : > { %v3473_v20 = vld [vmem:[%s3402_s9 + $0x58] sm:$0xff]  ;;  %v3476_v21 = vld [vmem:[%s3402_s9 + $0x104] sm:$0x1]  ;;  %v3482_v23 = vld [vmem:[%s3402_s9 + $0x68] sm:$0xff]  ;;  %278 = sbr.rel (%p2876_p7) target bundleno = 1953 (0x7a1), region = 52 }
  0x3a   : > { %v3479_v22 = vld [vmem:[%s3402_s9 + $0x60] sm:$0xff]  ;;  %v3485_v24 = vld [vmem:[%s3402_s9 + $0x70] sm:$0xff]  ;;  %v3488_v25 = vld [vmem:[%s3402_s9 + $0x78] sm:$0xff] }
  0x3b   : > { %v3491_v26 = vld [vmem:[%s3402_s9 + $0x80] sm:$0xff]  ;;  %v3494_v27 = vld [vmem:[%s3402_s9 + $0x88] sm:$0xff]  ;;  %v3497_v28 = vld [vmem:[%s3402_s9 + $0x90] sm:$0xff] }
  0x3c   : > { %v3500_v29 = vld [vmem:[%s3402_s9 + $0x98] sm:$0xff]  ;;  %v3503_v30 = vld [vmem:[%s3402_s9 + $0x105] sm:$0x1]  ;;  %v3506_v31 = vld [vmem:[%s3402_s9 + $0x106] sm:$0x1] }
  0x3d   : > { %v3509_v32 = vld [vmem:[%s3402_s9 + $0x107] sm:$0x1] }
  0x3e   : > { %301 = vmatpush.msra.mxu0 %v3437_v8  ;;  %v3515_v33 = vld [vmem:[#allocation2] sm:$0xff]  ;;  %vm282_vm1 = vcmask 261120   ;;  %v3520_v34 = vld [vmem:[#allocation2 + $0x8] sm:$0xff]  ;;  %v281_v35 = vperm.slane %v3440_v9, 0  ;;  %vm328_vm2 = vcmask 64512   ;;  %vm1056_vm10 = vcmask 523264  }
  0x40   : > { %302 = vmatpush.msra.mxu0 %v3434_v7 }
  0x42   : > { %303 = vmatpush.msra.mxu0 %v3431_v6 }
  0x44   : > { %304 = vmatpush.msra.mxu0 %v3428_v5 }
  0x45   : > { %2877 = vmatmul.msk.f32.vlgmr.msra.gmra.mxu0 %vm282_vm1, %v3515_v33 }
  0x4d   : > { %2878 = vmatmul.msk.f32.gmra.mxu0 %vm282_vm1, %v3520_v34 }
  0xc2   : > { %v306_v36 = vpop.f32.mrf.mxu0 }
  0xc3   : > { %v307_v37 = vadd.f32 %v306_v36, %v281_v35 }
  0xc5   : > { %322 = vrot.lane.b32.xlu2 %v307_v37, %s3296_s24  ;;  %314 = vrot.lane.b32.xlu0 %v307_v37, %s3297_s25 }
  0xca   : > { %v309_v38 = vpop.f32.mrf.mxu0 }
  0xcb   : > { %v310_v39 = vadd.f32 %v309_v38, %v281_v35 }
  0xcd   : > { %316 = vrot.lane.b32.xlu1 %v310_v39, %s3297_s25  ;;  %320 = vrot.lane.b32.xlu2 %v310_v39, %s3298_s28  ;;  %v3056_v48 = vpack.i.bf16 %v307_v37, %v310_v39 }
  0xce   : > { %318 = vrot.lane.b32.xlu0 %v307_v37, %s3298_s28 }
  0xd5   : > { %324 = vrot.lane.b32.xlu1 %v310_v39, %s3296_s24 }
  0xd6   : > { %353 = vrot.lane.b32.xlu0 %v310_v39, %s3299_s29 }
  0xdd   : > { %326 = vrot.lane.b32.xlu1 %v307_v37, %s3299_s29 }
 0x11f   : > { %v3528_v41 = vpop.permute.xlu2 %322 }
 0x127   : > { %v3536_v44 = vpop.permute.xlu2 %320 }
 0x137   : > { %v3525_v40 = vpop.permute.xlu0 %314 }
 0x138   : > { %379 = vrot.lane.b32.xlu2 %v3525_v40, %s3299_s29 }
 0x13f   : > { %v3530_v42 = vpop.permute.xlu1 %316 }
 0x140   : > { %v3532_v43 = vpop.permute.xlu0 %318  ;;  %405 = vrot.lane.b32.xlu1 %v3530_v42, %s3299_s29 }
 0x141   : > { %431 = vrot.lane.b32.xlu0 %v3532_v43, %s3299_s29 }
 0x147   : > { %v3538_v45 = vpop.permute.xlu1 %324 }
 0x148   : > { %v354_v46 = vpop.permute.xlu0 %353  ;;  %457 = vrot.lane.b32.xlu1 %v3536_v44, %s3299_s29  ;;  %509 = vrot.lane.b32.xlu2 %v3538_v45, %s3299_s29 }
 0x149   : > { %483 = vrot.lane.b32.xlu0 %v3528_v41, %s3299_s29  ;;  %2881 = vmatpush.xpose.msk.msra.mxu2 %vm328_vm2, %v354_v46 }
 0x14c   : > { %2882 = vmatmul.msk.f32.vlgmr.msra.gmra.mxu2 %vm328_vm2, %v310_v39 }
 0x14f   : > { %v327_v47 = vpop.permute.xlu1 %326 }
 0x150   : > { %2879 = vmatpush.xpose.msk.msra.mxu1 %vm328_vm2, %v327_v47 }
 0x151   : > { %3057 = vrot.lane.b32.xlu0 %v3056_v48, %s3300_s30 }
 0x153   : > { %2880 = vmatmul.msk.f32.vlgmr.msra.gmra.mxu1 %vm328_vm2, %v307_v37 }
 0x192   : > { %v380_v49 = vpop.permute.xlu2 %379 }
 0x193   : > { %2883 = vmatpush.xpose.msk.msra.mxu3 %vm328_vm2, %v380_v49 }
 0x196   : > { %2884 = vmatmul.msk.f32.vlgmr.msra.gmra.mxu3 %vm328_vm2, %v3525_v40 }
 0x1a2   : > { %v510_v52 = vpop.permute.xlu2 %509 }
 0x1b2   : > { %v406_v50 = vpop.permute.xlu1 %405 }
 0x1b3   : > { %v432_v51 = vpop.permute.xlu0 %431  ;;  %2885 = vmatpush.xpose.msk.msrb.mxu1 %vm328_vm2, %v406_v50 }
 0x1b4   : > { %2887 = vmatpush.xpose.msk.msrb.mxu2 %vm328_vm2, %v432_v51 }
 0x1b6   : > { %2886 = vmatmul.msk.f32.vlgmr.msrb.gmra.mxu1 %vm328_vm2, %v3530_v42 }
 0x1b7   : > { %2888 = vmatmul.msk.f32.vlgmr.msrb.gmra.mxu2 %vm328_vm2, %v3532_v43 }
 0x1b8   : > { %2893 = vmatpush.xpose.msk.msra.mxu2 %vm328_vm2, %v510_v52 }
 0x1ba   : > { %v458_v53 = vpop.permute.xlu1 %457 }
 0x1bb   : > { %v484_v54 = vpop.permute.xlu0 %483  ;;  %2889 = vmatpush.xpose.msk.msrb.mxu3 %vm328_vm2, %v458_v53 }
 0x1bc   : > { %2891 = vmatpush.xpose.msk.msra.mxu1 %vm328_vm2, %v484_v54 }
 0x1be   : > { %2890 = vmatmul.msk.f32.vlgmr.msrb.gmra.mxu3 %vm328_vm2, %v3536_v44 }
 0x1bf   : > { %2892 = vmatmul.msk.f32.vlgmr.msra.gmra.mxu1 %vm328_vm2, %v3528_v41  ;;  %2894 = vmatmul.msk.f32.vlgmr.msra.gmra.mxu2 %vm328_vm2, %v3538_v45 }
 0x1c3   : > { %v3058_v55 = vpop.permute.xlu0 %3057 }
 0x1c4   : > { %v3060_v56 = vunpack.i.h.bf16 %v3058_v55  ;;  %v3059_v57 = vunpack.i.l.bf16 %v3058_v55 }
 0x1c6   : > { %652 = vmatpush.msra.mxu3 %v3060_v56  ;;  %678 = vmatpush.msrb.mxu1 %v3059_v57 }
 0x1cf   : > { %v376_v58 = vpop.f32.mrf.mxu2 }
 0x1d0   : > { %v536_v59 = vmul.f32 0.35355338, %v376_v58  ;;  %v350_v60 = vpop.f32.mrf.mxu1 }
 0x1d1   : > { %v535_v61 = vmul.f32 0.35355338, %v350_v60 }
 0x1d2   : > { %v546_v62 = vsel %vm328_vm2, %v536_v59, -inf }
 0x1d3   : > { %547 = vmax.xlane.f32.xlu2 %v546_v62  ;;  %v543_v63 = vsel %vm328_vm2, %v535_v61, -inf }
 0x1d4   : > { %544 = vmax.xlane.f32.xlu0 %v543_v63 }
 0x219   : > { %v402_v0 = vpop.f32.mrf.mxu3 }
 0x21a   : > { %v537_v1 = vmul.f32 0.35355338, %v402_v0  ;;  %v3061_v0 = vpack.i.bf16 %v3530_v42, %v3525_v40 }
 0x21c   : > { %v549_v2 = vsel %vm328_vm2, %v537_v1, -inf }
 0x21d   : > { %550 = vmax.xlane.f32.xlu1 %v549_v2  ;;  %v3066_v2 = vpack.i.bf16 %v3528_v41, %v3532_v43 }
 0x233   : > { %v428_v3 = vpop.f32.mrf.mxu1 }
 0x234   : > { %v538_v46 = vmul.f32 0.35355338, %v428_v3 }
 0x236   : > { %v552_v47 = vsel %vm328_vm2, %v538_v46, -inf }
 0x23a   : > { %v454_v4 = vpop.f32.mrf.mxu2 }
 0x23b   : > { %v539_v35 = vmul.f32 0.35355338, %v454_v4 }
 0x23c   : > { %v506_v36 = vpop.f32.mrf.mxu1 }
 0x23d   : > { %v3569_v37 = vmul.f32 0.35355338, %v506_v36  ;;  %v555_v38 = vsel %vm328_vm2, %v539_v35, -inf }
 0x23e   : > { %556 = vmax.xlane.f32.xlu2 %v555_v38 }
 0x23f   : > { %v561_v39 = vsel %vm328_vm2, %v3569_v37, -inf }
 0x240   : > { %562 = vmax.xlane.f32.xlu0 %v561_v39 }
 0x241   : > { %v480_v48 = vpop.f32.mrf.mxu3 }
 0x242   : > { %v540_v53 = vmul.f32 0.35355338, %v480_v48  ;;  %v532_v63 = vpop.f32.mrf.mxu2 }
 0x244   : > { %v558_v56 = vsel %vm328_vm2, %v540_v53, -inf }
 0x246   : > { %v548_v49 = vpop.xlane.xlu2 %547  ;;  %553 = vmax.xlane.f32.xlu2 %v552_v47 }
 0x247   : > { %v568_v50 = vsub.f32 %v536_v59, %v548_v49  ;;  %v545_v51 = vpop.xlane.xlu0 %544  ;;  %v542_v59 = vmul.f32 0.35355338, %v532_v63 }
 0x248   : > { %v567_v52 = vsub.f32 %v535_v61, %v545_v51 }
 0x249   : > { %v577_v54 = vmul.f32 1.442695, %v568_v50  ;;  %v564_v61 = vsel %vm328_vm2, %v542_v59, -inf }
 0x24a   : > { %v575_v55 = vmul.f32 1.442695, %v567_v52 }
 0x24b   : > { %3071 = vpow2.f32 %v577_v54 }
 0x24c   : > { %3073 = vpow2.f32 %v575_v55 }
 0x24e   : > { %559 = vmax.xlane.f32.xlu2 %v558_v56 }
 0x251   : > { %v3072_v57 = vpop.eup %3071 }
 0x252   : > { %v3074_v58 = vpop.eup %3073  ;;  %v594_v60 = vsel %vm328_vm2, %v3072_v57, 0.0 }
 0x253   : > { %595 = vadd.xlane.f32.xlu0 %v594_v60  ;;  %v591_v62 = vsel %vm328_vm2, %v3074_v58, 0.0 }
 0x254   : > { %592 = vadd.xlane.f32.xlu1 %v591_v62 }
 0x25c   : > { %565 = vmax.xlane.f32.xlu1 %v564_v61 }
 0x266   : > { %3062 = vrot.lane.b32.xlu2 %v3061_v0, %s3300_s30 }
 0x267   : > { %3067 = vrot.lane.b32.xlu0 %v3066_v2, %s3300_s30 }
 0x290   : > { %v551_v3 = vpop.xlane.xlu1 %550 }
 0x291   : > { %v569_v4 = vsub.f32 %v537_v1, %v551_v3 }
 0x293   : > { %v579_v36 = vmul.f32 1.442695, %v569_v4 }
 0x295   : > { %3075 = vpow2.f32 %v579_v36 }
 0x29b   : > { %v3585_v38 = vpop.eup %3075 }
 0x29c   : > { %v597_v39 = vsel %vm328_vm2, %v3585_v38, 0.0 }
 0x29d   : > { %598 = vadd.xlane.f32.xlu2 %v597_v39 }
 0x2b1   : > { %v557_v47 = vpop.xlane.xlu2 %556 }
 0x2b2   : > { %v571_v48 = vsub.f32 %v539_v35, %v557_v47 }
 0x2b3   : > { %v563_v51 = vpop.xlane.xlu0 %562 }
 0x2b4   : > { %v583_v40 = vmul.f32 1.442695, %v571_v48  ;;  %v573_v48 = vsub.f32 %v3569_v37, %v563_v51 }
 0x2b6   : > { %3077 = vpow2.f32 %v583_v40  ;;  %v587_v40 = vmul.f32 1.442695, %v573_v48 }
 0x2b9   : > { %v554_v42 = vpop.xlane.xlu2 %553 }
 0x2ba   : > { %v570_v41 = vsub.f32 %v538_v46, %v554_v42 }
 0x2bc   : > { %v3078_v43 = vpop.eup %3077  ;;  %v581_v49 = vmul.f32 1.442695, %v570_v41 }
 0x2bd   : > { %v603_v50 = vsel %vm328_vm2, %v3078_v43, 0.0 }
 0x2be   : > { %3079 = vpow2.f32 %v581_v49  ;;  %604 = vadd.xlane.f32.xlu2 %v603_v50 }
 0x2c1   : > { %v560_v1 = vpop.xlane.xlu2 %559 }
 0x2c2   : > { %v572_v52 = vsub.f32 %v540_v53, %v560_v1 }
 0x2c4   : > { %v3590_v54 = vpop.eup %3079  ;;  %v585_v55 = vmul.f32 1.442695, %v572_v52 }
 0x2c5   : > { %v600_v56 = vsel %vm328_vm2, %v3590_v54, 0.0 }
 0x2c6   : > { %3081 = vpow2.f32 %v585_v55  ;;  %601 = vadd.xlane.f32.xlu1 %v600_v56  ;;  %v596_v35 = vpop.xlane.xlu0 %595 }
 0x2c7   : > { %3083 = vrcp.f32 %v596_v35  ;;  %v593_v46 = vpop.xlane.xlu1 %592 }
 0x2c8   : > { %3085 = vrcp.f32 %v593_v46 }
 0x2c9   : > { %v3063_v60 = vpop.permute.xlu2 %3062 }
 0x2ca   : > { %v3065_v62 = vunpack.i.h.bf16 %v3063_v60  ;;  %v3064_v63 = vunpack.i.l.bf16 %v3063_v60 }
 0x2cc   : > { %v3082_v61 = vpop.eup %3081  ;;  %704 = vmatpush.msra.mxu1 %v3064_v63  ;;  %730 = vmatpush.msrb.mxu2 %v3065_v62 }
 0x2cd   : > { %v3084_v0 = vpop.eup %3083  ;;  %v606_v53 = vsel %vm328_vm2, %v3082_v61, 0.0 }
 0x2ce   : > { %v3086_v2 = vpop.eup %3085  ;;  %v624_v3 = vmul.f32 %v3084_v0, %v3072_v57  ;;  %607 = vadd.xlane.f32.xlu0 %v606_v53 }
 0x2cf   : > { %v623_v4 = vmul.f32 %v3086_v2, %v3074_v58  ;;  %v566_v36 = vpop.xlane.xlu1 %565 }
 0x2d0   : > { %v574_v39 = vsub.f32 %v542_v59, %v566_v36  ;;  %2896 = vmatmul.msk.f32.vlgmr.msrb.gmra.mxu1 %vm328_vm2, %v624_v3 }
 0x2d1   : > { %2895 = vmatmul.msk.f32.vlgmr.msra.gmra.mxu3 %vm328_vm2, %v623_v4 }
 0x2d2   : > { %v589_v47 = vmul.f32 1.442695, %v574_v39 }
 0x2d4   : > { %3087 = vpow2.f32 %v589_v47 }
 0x2d5   : > { %3089 = vpow2.f32 %v587_v40 }
 0x2d6   : > { %761 = vrot.lane.b32.xlu2 %v3536_v44, %s3300_s30 }
 0x2d9   : > { %v3068_v42 = vpop.permute.xlu0 %3067 }
 0x2da   : > { %v3088_v41 = vpop.eup %3087  ;;  %v3070_v49 = vunpack.i.h.bf16 %v3068_v42  ;;  %v3069_v57 = vunpack.i.l.bf16 %v3068_v42 }
 0x2db   : > { %v612_v58 = vsel %vm328_vm2, %v3088_v41, 0.0  ;;  %v3090_v59 = vpop.eup %3089 }
 0x2dc   : > { %756 = vmatpush.msrb.mxu3 %v3069_v57  ;;  %808 = vmatpush.msrb.mxu1 %v3070_v49  ;;  %v609_v37 = vsel %vm328_vm2, %v3090_v59, 0.0 }
 0x2dd   : > { %613 = vadd.xlane.f32.xlu1 %v612_v58 }
 0x2de   : > { %860 = vmatpush.msra.mxu3 %v3443_v10 }
 0x2e5   : > { %610 = vadd.xlane.f32.xlu1 %v609_v37 }
 0x2fe   : > { %813 = vrot.lane.b32.xlu1 %v3538_v45, %s3300_s30 }
 0x310   : > { %v599_v44 = vpop.xlane.xlu2 %598 }
 0x311   : > { %3091 = vrcp.f32 %v599_v44 }
 0x317   : > { %v3092_v50 = vpop.eup %3091 }
 0x318   : > { %v625_v51 = vmul.f32 %v3092_v50, %v3585_v38 }
 0x31a   : > { %2897 = vmatmul.msk.f32.vlgmr.msra.gmra.mxu1 %vm328_vm2, %v625_v51 }
 0x31b   : > { %923 = vmatpush.msra.mxu1 %v3449_v12 }
 0x331   : > { %v605_v1 = vpop.xlane.xlu2 %604 }
 0x332   : > { %3093 = vrcp.f32 %v605_v1 }
 0x338   : > { %v3094_v52 = vpop.eup %3093 }
 0x339   : > { %v627_v55 = vmul.f32 %v3094_v52, %v3078_v43  ;;  %v762_v56 = vpop.permute.xlu2 %761  ;;  %v602_v35 = vpop.xlane.xlu1 %601 }
 0x33a   : > { %3095 = vrcp.f32 %v602_v35  ;;  %782 = vmatpush.msrb.mxu0 %v762_v56 }
 0x33b   : > { %2899 = vmatmul.msk.f32.vlgmr.msrb.gmra.mxu3 %vm328_vm2, %v627_v55 }
 0x33c   : > { %892 = vmatpush.msra.mxu0 %v3446_v11  ;;  %1042 = vmatpush.msrb.mxu3 %v3473_v20 }
 0x33e   : > { %1043 = vmatpush.msrb.mxu3 %v3470_v19 }
 0x340   : > { %v3096_v45 = vpop.eup %3095  ;;  %1044 = vmatpush.msrb.mxu3 %v3467_v18 }
 0x341   : > { %v626_v38 = vmul.f32 %v3096_v45, %v3590_v54  ;;  %v608_v46 = vpop.xlane.xlu0 %607 }
 0x342   : > { %3097 = vrcp.f32 %v608_v46  ;;  %1045 = vmatpush.msrb.mxu3 %v3464_v17 }
 0x343   : > { %2898 = vmatmul.msk.f32.vlgmr.msrb.gmra.mxu2 %vm328_vm2, %v626_v38 }
 0x348   : > { %v3098_v43 = vpop.eup %3097 }
 0x349   : > { %v628_v60 = vmul.f32 %v3098_v43, %v3082_v61 }
 0x34b   : > { %2900 = vmatmul.msk.f32.vlgmr.msrb.gmra.mxu0 %vm328_vm2, %v628_v60 }
 0x34c   : > { %1071 = vmatpush.msrb.mxu0 %v3500_v29 }
 0x34d   : > { %v680_v61 = vpop.f32.mrf.mxu1 }
 0x34e   : > { %1072 = vmatpush.msrb.mxu0 %v3497_v28 }
 0x350   : > { %v614_v62 = vpop.xlane.xlu1 %613  ;;  %1073 = vmatpush.msrb.mxu0 %v3494_v27 }
 0x352   : > { %1074 = vmatpush.msrb.mxu0 %v3491_v26 }
 0x354   : > { %v654_v54 = vpop.f32.mrf.mxu3  ;;  %1075 = vmatpush.msrb.mxu0 %v3488_v25 }
 0x355   : > { %2903 = vmatmul.msk.f32.vlgmr.msra.gmra.mxu3 %vm328_vm2, %v654_v54 }
 0x356   : > { %1076 = vmatpush.msrb.mxu0 %v3485_v24 }
 0x358   : > { %v611_v63 = vpop.xlane.xlu1 %610  ;;  %1077 = vmatpush.msrb.mxu0 %v3482_v23 }
 0x359   : > { %3099 = vrcp.f32 %v611_v63  ;;  %v3301_v63 = vmov 32.0  }
 0x35a   : > { %1078 = vmatpush.msrb.mxu0 %v3479_v22  ;;  %3101 = vrcp.f32 %v614_v62 }
 0x35b   : > { %3103 = vrcp.f32 %v3301_v63 }
 0x35d   : > { %2904 = vmatmul.msk.f32.gmra.mxu3 %vm328_vm2, %v680_v61 }
 0x35f   : > { %v3100_v0 = vpop.eup %3099 }
 0x360   : > { %v629_v53 = vmul.f32 %v3100_v0, %v3090_v59  ;;  %v3102_v2 = vpop.eup %3101 }
 0x361   : > { %v630_v3 = vmul.f32 %v3102_v2, %v3088_v41  ;;  %v868_v41 = vperm.slane %v3455_v14, 0  ;;  %v3104_v61 = vpop.eup %3103 }
 0x362   : > { %2901 = vmatmul.msk.f32.vlgmr.msrb.gmra.mxu1 %vm328_vm2, %v629_v53  ;;  %vm977_vm3 = vweird.f32 %v3104_v61 }
 0x370   : > { %v814_v4 = vpop.permute.xlu1 %813 }
 0x371   : > { %834 = vmatpush.msra.mxu2 %v814_v4 }
 0x372   : > { %2902 = vmatmul.msk.f32.vlgmr.msra.gmra.mxu2 %vm328_vm2, %v630_v3 }
 0x373   : > { %954 = vmatpush.msrb.mxu2 %v3452_v13 }
 0x397   : > { %v706_v36 = vpop.f32.mrf.mxu1 }
 0x398   : > { %2905 = vmatmul.msk.f32.vlgmr.msra.gmra.mxu0 %vm328_vm2, %v706_v36 }
 0x3be   : > { %v758_v39 = vpop.f32.mrf.mxu3 }
 0x3bf   : > { %2907 = vmatmul.msk.f32.vlgmr.msra.gmra.mxu1 %vm328_vm2, %v758_v39 }
 0x3c6   : > { %v732_v47 = vpop.f32.mrf.mxu2 }
 0x3c7   : > { %2906 = vmatmul.msk.f32.gmra.mxu0 %vm328_vm2, %v732_v47 }
 0x3c8   : > { %v784_v48 = vpop.f32.mrf.mxu0 }
 0x3c9   : > { %2908 = vmatmul.msk.f32.gmra.mxu1 %vm328_vm2, %v784_v48 }
 0x3d8   : > { %v862_v49 = vpop.f32.mrf.mxu3 }
 0x3d9   : > { %v869_v58 = vadd.f32 %v868_v41, %v862_v49 }
 0x3df   : > { %v810_v40 = vpop.f32.mrf.mxu1 }
 0x3e0   : > { %2909 = vmatmul.msk.f32.vlgmr.msrb.gmra.mxu2 %vm328_vm2, %v810_v40  ;;  %v865_v55 = vpop.f32.mrf.mxu3 }
 0x3e1   : > { %v870_v35 = vadd.f32 %v868_v41, %v865_v55  ;;  %v1017_v55 = vperm.slane %v3458_v15, 0 }
 0x3f5   : > { %v836_v42 = vpop.f32.mrf.mxu2 }
 0x3f6   : > { %2910 = vmatmul.msk.f32.gmra.mxu2 %vm328_vm2, %v836_v42 }
 0x415   : > { %v894_v57 = vpop.f32.mrf.mxu0 }
 0x416   : > { %v900_v37 = vadd.f32 %v894_v57, %v869_v58 }
 0x43c   : > { %v925_v59 = vpop.f32.mrf.mxu1 }
 0x43d   : > { %v931_v44 = vadd.f32 %v925_v59, %v900_v37 }
 0x444   : > { %v897_v56 = vpop.f32.mrf.mxu0 }
 0x445   : > { %v901_v45 = vadd.f32 %v897_v56, %v870_v35 }
 0x446   : > { %v928_v38 = vpop.f32.mrf.mxu1 }
 0x447   : > { %v932_v46 = vadd.f32 %v928_v38, %v901_v45 }
 0x463   : > { %v956_v50 = vpop.f32.mrf.mxu2 }
 0x464   : > { %v962_v51 = vadd.f32 %v956_v50, %v931_v44 }
 0x466   : > { %v964_v1 = vadd.f32 %v962_v51, %v3515_v33  ;;  %v973_v33 = vmul.f32 32.0, %v3104_v61 }
 0x468   : > { %v966_v52 = vsel %vm282_vm1, %v964_v1, 0.0  ;;  %v974_v0 = vsub.f32 1.0, %v973_v33 }
 0x469   : > { %967 = vadd.xlane.f32.xlu2 %v966_v52 }
 0x46a   : > { %v975_v53 = vmul.f32 %v3104_v61, %v974_v0 }
 0x46c   : > { %v976_v2 = vadd.f32 %v3104_v61, %v975_v53 }
 0x46e   : > { %v3641_v3 = vsel %vm977_vm3, %v3104_v61, %v976_v2 }
 0x479   : > { %v959_v43 = vpop.f32.mrf.mxu2 }
 0x47a   : > { %v963_v60 = vadd.f32 %v959_v43, %v932_v46  ;;  %v1020_v46 = vperm.slane %v3461_v16, 0 }
 0x47c   : > { %v965_v62 = vadd.f32 %v963_v60, %v3520_v34 }
 0x47e   : > { %v969_v54 = vsel %vm282_vm1, %v965_v62, 0.0 }
 0x47f   : > { %970 = vadd.xlane.f32.xlu1 %v969_v54 }
 0x4dc   : > { %v968_v4 = vpop.xlane.xlu2 %967 }
 0x4dd   : > { %v979_v36 = vmul.f32 %v3641_v3, %v968_v4 }
 0x4df   : > { %v981_v39 = vsub.f32 %v964_v1, %v979_v36 }
 0x4e1   : > { %v983_v47 = vmul.f32 %v981_v39, %v981_v39 }
 0x4e3   : > { %v985_v34 = vsel %vm282_vm1, %v983_v47, 0.0  ;;  %v1023_v47 = vperm.slane %v3476_v21, 0 }
 0x4e4   : > { %986 = vadd.xlane.f32.xlu0 %v985_v34 }
 0x4f2   : > { %v971_v48 = vpop.xlane.xlu1 %970 }
 0x4f3   : > { %v980_v40 = vmul.f32 %v3641_v3, %v971_v48 }
 0x4f5   : > { %v982_v42 = vsub.f32 %v965_v62, %v980_v40 }
 0x4f7   : > { %v984_v41 = vmul.f32 %v982_v42, %v982_v42 }
 0x4f9   : > { %v988_v49 = vsel %vm282_vm1, %v984_v41, 0.0 }
 0x4fa   : > { %989 = vadd.xlane.f32.xlu0 %v988_v49 }
 0x557   : > { %v987_v57 = vpop.xlane.xlu0 %986 }
 0x558   : > { %v991_v58 = vmul.f32 %v987_v57, %v3641_v3 }
 0x55a   : > { %v993_v59 = vadd.f32 1e-05, %v991_v58  ;;  %v1055_v58 = vperm.slane %v3503_v30, 0 }
 0x55c   : > { %3105 = vrsqrt.f32 %v993_v59  ;;  %vm1001_vm5 = vweird.f32 %v993_v59 }
 0x562   : > { %v3106_v37 = vpop.eup %3105 }
 0x563   : > { %v996_v44 = vmul.f32 %v3106_v37, %v993_v59  ;;  %vm1002_vm4 = vweird.f32 %v3106_v37 }
 0x564   : > { %vm1003_vm6 = vmor %vm1001_vm5, %vm1002_vm4 }
 0x565   : > { %v997_v50 = vmul.f32 %v3106_v37, %v996_v44 }
 0x567   : > { %v998_v51 = vmul.f32 0.5, %v997_v50 }
 0x569   : > { %v999_v1 = vsub.f32 1.5, %v998_v51 }
 0x56b   : > { %v1000_v52 = vmul.f32 %v3106_v37, %v999_v1 }
 0x56d   : > { %v1004_v56 = vsel %vm1003_vm6, %v3106_v37, %v1000_v52  ;;  %v990_v35 = vpop.xlane.xlu0 %989 }
 0x56e   : > { %v1015_v45 = vmul.f32 %v1004_v56, %v981_v39  ;;  %v992_v38 = vmul.f32 %v990_v35, %v3641_v3 }
 0x570   : > { %v1018_v43 = vmul.f32 %v1017_v55, %v1015_v45  ;;  %v994_v60 = vadd.f32 1e-05, %v992_v38 }
 0x572   : > { %3107 = vrsqrt.f32 %v994_v60  ;;  %v1021_v62 = vadd.f32 %v1020_v46, %v1018_v43  ;;  %vm1011_vm8 = vweird.f32 %v994_v60 }
 0x574   : > { %2911 = vmatmul.msk.f32.vlgmr.msrb.gmra.mxu3 %vm282_vm1, %v1021_v62 }
 0x578   : > { %v3108_v54 = vpop.eup %3107 }
 0x579   : > { %v1006_v63 = vmul.f32 %v3108_v54, %v994_v60  ;;  %vm1012_vm7 = vweird.f32 %v3108_v54 }
 0x57a   : > { %vm1013_vm9 = vmor %vm1011_vm8, %vm1012_vm7 }
 0x57b   : > { %v1007_v61 = vmul.f32 %v3108_v54, %v1006_v63 }
 0x57d   : > { %v1008_v33 = vmul.f32 0.5, %v1007_v61 }
 0x57f   : > { %v1009_v0 = vsub.f32 1.5, %v1008_v33 }
 0x581   : > { %v1010_v53 = vmul.f32 %v3108_v54, %v1009_v0 }
 0x583   : > { %v1014_v2 = vsel %vm1013_vm9, %v3108_v54, %v1010_v53 }
 0x584   : > { %v1016_v4 = vmul.f32 %v1014_v2, %v982_v42 }
 0x586   : > { %v1019_v36 = vmul.f32 %v1017_v55, %v1016_v4 }
 0x588   : > { %v1022_v39 = vadd.f32 %v1020_v46, %v1019_v36 }
 0x58a   : > { %2912 = vmatmul.msk.f32.gmra.mxu3 %vm282_vm1, %v1022_v39 }
 0x5f7   : > { %v1047_v34 = vpop.f32.mrf.mxu3 }
 0x5f8   : > { %v1048_v48 = vadd.f32 %v1047_v34, %v1023_v47 }
 0x5fa   : > { %v1053_v40 = vmax.f32 %v1048_v48, 0.0 }
 0x5fc   : > { %2913 = vmatmul.msk.f32.vlgmr.msrb.gmra.mxu0 %vm1056_vm10, %v1053_v40  ;;  %v1135_v40 = vperm.slane %v3509_v32, 0 }
 0x60d   : > { %v1050_v41 = vpop.f32.mrf.mxu3 }
 0x60e   : > { %v1051_v49 = vadd.f32 %v1050_v41, %v1023_v47  ;;  %v1132_v47 = vperm.slane %v3506_v31, 0 }
 0x610   : > { %v1054_v57 = vmax.f32 %v1051_v49, 0.0 }
 0x612   : > { %2914 = vmatmul.msk.f32.gmra.mxu0 %vm1056_vm10, %v1054_v57 }
 0x679   : > { %v1080_v59 = vpop.f32.mrf.mxu0 }
 0x67a   : > { %v1081_v37 = vadd.f32 %v1080_v59, %v1055_v58 }
 0x67c   : > { %v1086_v42 = vadd.f32 %v1081_v37, %v1021_v62 }
 0x67e   : > { %v1088_v44 = vsel %vm282_vm1, %v1086_v42, 0.0 }
 0x67f   : > { %1089 = vadd.xlane.f32.xlu0 %v1088_v44 }
 0x68f   : > { %v1083_v50 = vpop.f32.mrf.mxu0 }
 0x690   : > { %v1084_v51 = vadd.f32 %v1083_v50, %v1055_v58 }
 0x692   : > { %v1087_v1 = vadd.f32 %v1084_v51, %v1022_v39 }
 0x694   : > { %v1091_v52 = vsel %vm282_vm1, %v1087_v1, 0.0 }
 0x695   : > { %1092 = vadd.xlane.f32.xlu2 %v1091_v52 }
 0x6f2   : > { %v1090_v55 = vpop.xlane.xlu0 %1089 }
 0x6f3   : > { %v1094_v56 = vmul.f32 %v1090_v55, %v3641_v3 }
 0x6f5   : > { %v1096_v35 = vsub.f32 %v1086_v42, %v1094_v56 }
 0x6f7   : > { %v1098_v45 = vmul.f32 %v1096_v35, %v1096_v35 }
 0x6f9   : > { %v1100_v38 = vsel %vm282_vm1, %v1098_v45, 0.0 }
 0x6fa   : > { %1101 = vadd.xlane.f32.xlu1 %v1100_v38 }
 0x708   : > { %v1093_v46 = vpop.xlane.xlu2 %1092 }
 0x709   : > { %v1095_v43 = vmul.f32 %v1093_v46, %v3641_v3 }
 0x70b   : > { %v1097_v60 = vsub.f32 %v1087_v1, %v1095_v43 }
 0x70d   : > { %v1099_v62 = vmul.f32 %v1097_v60, %v1097_v60 }
 0x70f   : > { %v1103_v54 = vsel %vm282_vm1, %v1099_v62, 0.0 }
 0x710   : > { %1104 = vadd.xlane.f32.xlu0 %v1103_v54 }
 0x76d   : > { %v1102_v63 = vpop.xlane.xlu1 %1101 }
 0x76e   : > { %v1106_v61 = vmul.f32 %v1102_v63, %v3641_v3 }
 0x770   : > { %v1108_v33 = vadd.f32 1e-05, %v1106_v61 }
 0x772   : > { %3109 = vrsqrt.f32 %v1108_v33  ;;  %vm1116_vm12 = vweird.f32 %v1108_v33 }
 0x778   : > { %v3110_v0 = vpop.eup %3109 }
 0x779   : > { %v1111_v53 = vmul.f32 %v3110_v0, %v1108_v33  ;;  %vm1117_vm11 = vweird.f32 %v3110_v0 }
 0x77a   : > { %vm1118_vm13 = vmor %vm1116_vm12, %vm1117_vm11 }
 0x77b   : > { %v1112_v2 = vmul.f32 %v3110_v0, %v1111_v53 }
 0x77d   : > { %v1113_v4 = vmul.f32 0.5, %v1112_v2 }
 0x77f   : > { %v1114_v36 = vsub.f32 1.5, %v1113_v4 }
 0x781   : > { %v1115_v39 = vmul.f32 %v3110_v0, %v1114_v36 }
 0x783   : > { %v1119_v34 = vsel %vm1118_vm13, %v3110_v0, %v1115_v39  ;;  %v1105_v48 = vpop.xlane.xlu0 %1104 }
 0x784   : > { %v1130_v41 = vmul.f32 %v1119_v34, %v1096_v35  ;;  %v1107_v49 = vmul.f32 %v1105_v48, %v3641_v3 }
 0x786   : > { %v1133_v57 = vmul.f32 %v1132_v47, %v1130_v41  ;;  %v1109_v58 = vadd.f32 1e-05, %v1107_v49 }
 0x788   : > { %v1136_v59 = vadd.f32 %v1135_v40, %v1133_v57  ;;  %3111 = vrsqrt.f32 %v1109_v58  ;;  %vm1126_vm15 = vweird.f32 %v1109_v58 }
 0x78a   : > { %1138 = vst.msk [vmem:[#allocation2] sm:$0xff] %vm282_vm1, %v1136_v59 }
 0x78e   : > { %v3112_v37 = vpop.eup %3111 }
 0x78f   : > { %v1121_v42 = vmul.f32 %v3112_v37, %v1109_v58  ;;  %vm1127_vm14 = vweird.f32 %v3112_v37 }
 0x790   : > { %vm1128_vm0 = vmor %vm1126_vm15, %vm1127_vm14 }
 0x791   : > { %v1122_v44 = vmul.f32 %v3112_v37, %v1121_v42 }
 0x793   : > { %v1123_v50 = vmul.f32 0.5, %v1122_v44 }
 0x795   : > { %v1124_v51 = vsub.f32 1.5, %v1123_v50 }
 0x797   : > { %v1125_v1 = vmul.f32 %v3112_v37, %v1124_v51 }
 0x799   : > { %v1129_v52 = vsel %vm1128_vm0, %v3112_v37, %v1125_v1 }
 0x79a   : > { %v1131_v55 = vmul.f32 %v1129_v52, %v1097_v60 }
 0x79c   : > { %v1134_v56 = vmul.f32 %v1132_v47, %v1131_v55 }
 0x79e   : > { %v1137_v35 = vadd.f32 %v1135_v40, %v1134_v56 }
 0x7a0   : > { %1139 = vst.msk [vmem:[#allocation2 + $0x8] sm:$0xff] %vm282_vm1, %v1137_v35 }
 0x7a1 PF: > { %p2915_p8 = scmp.lt.s32.totalorder %s3357_s22, 2 }
 0x7a2   : > { %s3302_s7 = smov (!%p2915_p8), 104   ;;  %s3303_s8 = smov (!%p2915_p8), 120  }
 0x7a3   : > { %1143 = sbr.rel (%p2915_p8) target bundleno = 5025 (0x13a1), region = 56  ;;  %s3304_s6 = smov (!%p2915_p8), 112  }
 0x7a4   : > { %s3305_s10 = smov (!%p2915_p8), 96   ;;  %s3306_s21 = smov (!%p2915_p8), 64  }
 0x7a8   : > { %1168 = vmatpush.msra.mxu0 %v3437_v8  ;;  %v3671_v3 = vld [vmem:[#allocation3] sm:$0xff]  ;;  %vm1149_vm2 = vcmask 261120   ;;  %v3676_v45 = vld [vmem:[#allocation3 + $0x8] sm:$0xff]  ;;  %v1148_v38 = vperm.slane %v3440_v9, 0  ;;  %vm1195_vm1 = vcmask 64512   ;;  %vm2701_vm0 = vcmask 523264  }
 0x7aa   : > { %1169 = vmatpush.msra.mxu0 %v3434_v7 }
 0x7ac   : > { %1170 = vmatpush.msra.mxu0 %v3431_v6 }
 0x7ae   : > { %1171 = vmatpush.msra.mxu0 %v3428_v5 }
 0x7af   : > { %2916 = vmatmul.msk.f32.vlgmr.msra.gmra.mxu0 %vm1149_vm2, %v3671_v3 }
 0x7b7   : > { %2917 = vmatmul.msk.f32.gmra.mxu0 %vm1149_vm2, %v3676_v45 }
 0x82c   : > { %v1173_v8 = vpop.f32.mrf.mxu0 }
 0x82d   : > { %v1174_v46 = vadd.f32 %v1173_v8, %v1148_v38 }
 0x82f   : > { %1189 = vrot.lane.b32.xlu2 %v1174_v46, %s3302_s7  ;;  %1181 = vrot.lane.b32.xlu0 %v1174_v46, %s3303_s8 }
 0x834   : > { %v1176_v6 = vpop.f32.mrf.mxu0 }
 0x835   : > { %v1177_v5 = vadd.f32 %v1176_v6, %v1148_v38 }
 0x837   : > { %1183 = vrot.lane.b32.xlu1 %v1177_v5, %s3303_s8  ;;  %1187 = vrot.lane.b32.xlu2 %v1177_v5, %s3304_s6  ;;  %v3113_v33 = vpack.i.bf16 %v1174_v46, %v1177_v5 }
 0x838   : > { %1185 = vrot.lane.b32.xlu0 %v1174_v46, %s3304_s6 }
 0x83f   : > { %1191 = vrot.lane.b32.xlu1 %v1177_v5, %s3302_s7 }
 0x840   : > { %1220 = vrot.lane.b32.xlu0 %v1177_v5, %s3305_s10 }
 0x847   : > { %1193 = vrot.lane.b32.xlu1 %v1174_v46, %s3305_s10 }
 0x889   : > { %v3693_v9 = vpop.permute.xlu2 %1189 }
 0x891   : > { %v3703_v62 = vpop.permute.xlu2 %1187 }
 0x8a1   : > { %v3689_v7 = vpop.permute.xlu0 %1181 }
 0x8a2   : > { %1246 = vrot.lane.b32.xlu2 %v3689_v7, %s3305_s10 }
 0x8a9   : > { %v3695_v43 = vpop.permute.xlu1 %1183 }
 0x8aa   : > { %v3697_v60 = vpop.permute.xlu0 %1185  ;;  %1272 = vrot.lane.b32.xlu1 %v3695_v43, %s3305_s10 }
 0x8ab   : > { %1298 = vrot.lane.b32.xlu0 %v3697_v60, %s3305_s10 }
 0x8b1   : > { %v3705_v54 = vpop.permute.xlu1 %1191 }
 0x8b2   : > { %v1221_v63 = vpop.permute.xlu0 %1220  ;;  %1324 = vrot.lane.b32.xlu1 %v3703_v62, %s3305_s10  ;;  %1376 = vrot.lane.b32.xlu2 %v3705_v54, %s3305_s10 }
 0x8b3   : > { %1350 = vrot.lane.b32.xlu0 %v3693_v9, %s3305_s10  ;;  %2920 = vmatpush.xpose.msk.msra.mxu2 %vm1195_vm1, %v1221_v63 }
 0x8b6   : > { %2921 = vmatmul.msk.f32.vlgmr.msra.gmra.mxu2 %vm1195_vm1, %v1177_v5 }
 0x8b9   : > { %v1194_v61 = vpop.permute.xlu1 %1193 }
 0x8ba   : > { %2918 = vmatpush.xpose.msk.msra.mxu1 %vm1195_vm1, %v1194_v61 }
 0x8bb   : > { %3114 = vrot.lane.b32.xlu0 %v3113_v33, %s3306_s21 }
 0x8bd   : > { %2919 = vmatmul.msk.f32.vlgmr.msra.gmra.mxu1 %vm1195_vm1, %v1174_v46 }
 0x8fc   : > { %v1247_v0 = vpop.permute.xlu2 %1246 }
 0x8fd   : > { %2922 = vmatpush.xpose.msk.msra.mxu3 %vm1195_vm1, %v1247_v0 }
 0x900   : > { %2923 = vmatmul.msk.f32.vlgmr.msra.gmra.mxu3 %vm1195_vm1, %v3689_v7 }
 0x90c   : > { %v1377_v4 = vpop.permute.xlu2 %1376 }
 0x91c   : > { %v1273_v53 = vpop.permute.xlu1 %1272 }
 0x91d   : > { %v1299_v2 = vpop.permute.xlu0 %1298  ;;  %2924 = vmatpush.xpose.msk.msrb.mxu1 %vm1195_vm1, %v1273_v53 }
 0x91e   : > { %2926 = vmatpush.xpose.msk.msrb.mxu2 %vm1195_vm1, %v1299_v2 }
 0x920   : > { %2925 = vmatmul.msk.f32.vlgmr.msrb.gmra.mxu1 %vm1195_vm1, %v3695_v43 }
 0x921   : > { %2927 = vmatmul.msk.f32.vlgmr.msrb.gmra.mxu2 %vm1195_vm1, %v3697_v60 }
 0x922   : > { %2932 = vmatpush.xpose.msk.msra.mxu2 %vm1195_vm1, %v1377_v4 }
 0x924   : > { %v1325_v36 = vpop.permute.xlu1 %1324 }
 0x925   : > { %v1351_v39 = vpop.permute.xlu0 %1350  ;;  %2928 = vmatpush.xpose.msk.msrb.mxu3 %vm1195_vm1, %v1325_v36 }
 0x926   : > { %2930 = vmatpush.xpose.msk.msra.mxu1 %vm1195_vm1, %v1351_v39 }
 0x928   : > { %2929 = vmatmul.msk.f32.vlgmr.msrb.gmra.mxu3 %vm1195_vm1, %v3703_v62 }
 0x929   : > { %2931 = vmatmul.msk.f32.vlgmr.msra.gmra.mxu1 %vm1195_vm1, %v3693_v9  ;;  %2933 = vmatmul.msk.f32.vlgmr.msra.gmra.mxu2 %vm1195_vm1, %v3705_v54 }
 0x92d   : > { %v3115_v47 = vpop.permute.xlu0 %3114 }
 0x92e   : > { %v3117_v34 = vunpack.i.h.bf16 %v3115_v47  ;;  %v3116_v48 = vunpack.i.l.bf16 %v3115_v47 }
 0x930   : > { %1519 = vmatpush.msra.mxu3 %v3117_v34  ;;  %1545 = vmatpush.msrb.mxu1 %v3116_v48 }
 0x939   : > { %v1243_v40 = vpop.f32.mrf.mxu2 }
 0x93a   : > { %v1403_v41 = vmul.f32 0.35355338, %v1243_v40  ;;  %v1217_v49 = vpop.f32.mrf.mxu1 }
 0x93b   : > { %v1402_v57 = vmul.f32 0.35355338, %v1217_v49  ;;  %v3123_v49 = vpack.i.bf16 %v3693_v9, %v3697_v60 }
 0x93c   : > { %v1413_v58 = vsel %vm1195_vm1, %v1403_v41, -inf }
 0x93d   : > { %1414 = vmax.xlane.f32.xlu2 %v1413_v58  ;;  %v1410_v59 = vsel %vm1195_vm1, %v1402_v57, -inf }
 0x93e   : > { %1411 = vmax.xlane.f32.xlu0 %v1410_v59 }
 0x983   : > { %v1269_v37 = vpop.f32.mrf.mxu3 }
 0x984   : > { %v1404_v42 = vmul.f32 0.35355338, %v1269_v37 }
 0x986   : > { %v1416_v44 = vsel %vm1195_vm1, %v1404_v42, -inf }
 0x987   : > { %1417 = vmax.xlane.f32.xlu1 %v1416_v44 }
 0x99d   : > { %v1295_v50 = vpop.f32.mrf.mxu1 }
 0x99e   : > { %v1405_v38 = vmul.f32 0.35355338, %v1295_v50 }
 0x9a0   : > { %v1419_v8 = vsel %vm1195_vm1, %v1405_v38, -inf }
 0x9a4   : > { %v1321_v51 = vpop.f32.mrf.mxu2 }
 0x9a5   : > { %v1406_v1 = vmul.f32 0.35355338, %v1321_v51 }
 0x9a6   : > { %v1373_v52 = vpop.f32.mrf.mxu1 }
 0x9a7   : > { %v3739_v55 = vmul.f32 0.35355338, %v1373_v52  ;;  %v1422_v56 = vsel %vm1195_vm1, %v1406_v1, -inf }
 0x9a8   : > { %1423 = vmax.xlane.f32.xlu2 %v1422_v56 }
 0x9a9   : > { %v1428_v35 = vsel %vm1195_vm1, %v3739_v55, -inf }
 0x9aa   : > { %1429 = vmax.xlane.f32.xlu0 %v1428_v35 }
 0x9ab   : > { %v1347_v46 = vpop.f32.mrf.mxu3 }
 0x9ac   : > { %v1407_v33 = vmul.f32 0.35355338, %v1347_v46  ;;  %v1399_v34 = vpop.f32.mrf.mxu2 }
 0x9ad   : > { %v1409_v48 = vmul.f32 0.35355338, %v1399_v34 }
 0x9ae   : > { %v1425_v2 = vsel %vm1195_vm1, %v1407_v33, -inf }
 0x9af   : > { %v1431_v40 = vsel %vm1195_vm1, %v1409_v48, -inf }
 0x9b0   : > { %v1415_v6 = vpop.xlane.xlu2 %1414  ;;  %1420 = vmax.xlane.f32.xlu2 %v1419_v8 }
 0x9b1   : > { %v1435_v5 = vsub.f32 %v1403_v41, %v1415_v6  ;;  %v1412_v63 = vpop.xlane.xlu0 %1411  ;;  %v3118_v41 = vpack.i.bf16 %v3695_v43, %v3689_v7 }
 0x9b2   : > { %v1434_v61 = vsub.f32 %v1402_v57, %v1412_v63 }
 0x9b3   : > { %v1444_v0 = vmul.f32 1.442695, %v1435_v5 }
 0x9b4   : > { %v1442_v53 = vmul.f32 1.442695, %v1434_v61 }
 0x9b5   : > { %3148 = vpow2.f32 %v1444_v0 }
 0x9b6   : > { %3150 = vpow2.f32 %v1442_v53 }
 0x9b8   : > { %1426 = vmax.xlane.f32.xlu2 %v1425_v2 }
 0x9bb   : > { %v3149_v4 = vpop.eup %3148 }
 0x9bc   : > { %v3151_v36 = vpop.eup %3150  ;;  %v1461_v39 = vsel %vm1195_vm1, %v3149_v4, 0.0 }
 0x9bd   : > { %1462 = vadd.xlane.f32.xlu0 %v1461_v39  ;;  %v1458_v47 = vsel %vm1195_vm1, %v3151_v36, 0.0 }
 0x9be   : > { %1459 = vadd.xlane.f32.xlu1 %v1458_v47 }
 0x9c6   : > { %1432 = vmax.xlane.f32.xlu1 %v1431_v40 }
 0x9d0   : > { %3119 = vrot.lane.b32.xlu2 %v3118_v41, %s3306_s21 }
 0x9d1   : > { %3124 = vrot.lane.b32.xlu0 %v3123_v49, %s3306_s21 }
 0x9fa   : > { %v1418_v57 = vpop.xlane.xlu1 %1417 }
 0x9fb   : > { %v1436_v58 = vsub.f32 %v1404_v42, %v1418_v57 }
 0x9fd   : > { %v1446_v59 = vmul.f32 1.442695, %v1436_v58 }
 0x9ff   : > { %3152 = vpow2.f32 %v1446_v59 }
 0xa05   : > { %v3755_v37 = vpop.eup %3152 }
 0xa06   : > { %v1464_v44 = vsel %vm1195_vm1, %v3755_v37, 0.0 }
 0xa07   : > { %1465 = vadd.xlane.f32.xlu2 %v1464_v44 }
 0xa1b   : > { %v1424_v50 = vpop.xlane.xlu2 %1423 }
 0xa1c   : > { %v1438_v51 = vsub.f32 %v1406_v1, %v1424_v50 }
 0xa1d   : > { %v1430_v35 = vpop.xlane.xlu0 %1429 }
 0xa1e   : > { %v1450_v7 = vmul.f32 1.442695, %v1438_v51  ;;  %v1440_v57 = vsub.f32 %v3739_v55, %v1430_v35 }
 0xa20   : > { %3154 = vpow2.f32 %v1450_v7  ;;  %v1454_v58 = vmul.f32 1.442695, %v1440_v57 }
 0xa23   : > { %v1421_v43 = vpop.xlane.xlu2 %1420 }
 0xa24   : > { %v1437_v9 = vsub.f32 %v1405_v38, %v1421_v43 }
 0xa26   : > { %v3155_v60 = vpop.eup %3154  ;;  %v1448_v52 = vmul.f32 1.442695, %v1437_v9 }
 0xa27   : > { %v1470_v56 = vsel %vm1195_vm1, %v3155_v60, 0.0 }
 0xa28   : > { %3156 = vpow2.f32 %v1448_v52  ;;  %1471 = vadd.xlane.f32.xlu2 %v1470_v56 }
 0xa2b   : > { %v1427_v42 = vpop.xlane.xlu2 %1426 }
 0xa2c   : > { %v1439_v8 = vsub.f32 %v1407_v33, %v1427_v42 }
 0xa2e   : > { %v3157_v46 = vpop.eup %3156  ;;  %v1452_v6 = vmul.f32 1.442695, %v1439_v8 }
 0xa2f   : > { %v1467_v5 = vsel %vm1195_vm1, %v3157_v46, 0.0 }
 0xa30   : > { %3158 = vpow2.f32 %v1452_v6  ;;  %1468 = vadd.xlane.f32.xlu1 %v1467_v5  ;;  %v1463_v1 = vpop.xlane.xlu0 %1462 }
 0xa31   : > { %3160 = vrcp.f32 %v1463_v1  ;;  %v1460_v63 = vpop.xlane.xlu1 %1459 }
 0xa32   : > { %3162 = vrcp.f32 %v1460_v63 }
 0xa33   : > { %v3120_v38 = vpop.permute.xlu2 %3119 }
 0xa34   : > { %v3122_v61 = vunpack.i.h.bf16 %v3120_v38  ;;  %v3121_v0 = vunpack.i.l.bf16 %v3120_v38 }
 0xa36   : > { %v3159_v53 = vpop.eup %3158  ;;  %1571 = vmatpush.msra.mxu1 %v3121_v0  ;;  %1597 = vmatpush.msrb.mxu2 %v3122_v61 }
 0xa37   : > { %v3161_v2 = vpop.eup %3160  ;;  %v1473_v39 = vsel %vm1195_vm1, %v3159_v53, 0.0 }
 0xa38   : > { %v3163_v33 = vpop.eup %3162  ;;  %v1491_v47 = vmul.f32 %v3161_v2, %v3149_v4  ;;  %1474 = vadd.xlane.f32.xlu0 %v1473_v39 }
 0xa39   : > { %v1490_v34 = vmul.f32 %v3163_v33, %v3151_v36  ;;  %v1433_v40 = vpop.xlane.xlu1 %1432 }
 0xa3a   : > { %v1441_v41 = vsub.f32 %v1409_v48, %v1433_v40  ;;  %2935 = vmatmul.msk.f32.vlgmr.msrb.gmra.mxu1 %vm1195_vm1, %v1491_v47 }
 0xa3b   : > { %2934 = vmatmul.msk.f32.vlgmr.msra.gmra.mxu3 %vm1195_vm1, %v1490_v34 }
 0xa3c   : > { %v1456_v49 = vmul.f32 1.442695, %v1441_v41 }
 0xa3e   : > { %3164 = vpow2.f32 %v1456_v49 }
 0xa3f   : > { %3166 = vpow2.f32 %v1454_v58 }
 0xa40   : > { %1628 = vrot.lane.b32.xlu2 %v3703_v62, %s3306_s21 }
 0xa43   : > { %v3125_v59 = vpop.permute.xlu0 %3124 }
 0xa44   : > { %v3165_v44 = vpop.eup %3164  ;;  %v3127_v50 = vunpack.i.h.bf16 %v3125_v59  ;;  %v3126_v4 = vunpack.i.l.bf16 %v3125_v59 }
 0xa45   : > { %v1479_v36 = vsel %vm1195_vm1, %v3165_v44, 0.0  ;;  %v3167_v48 = vpop.eup %3166 }
 0xa46   : > { %1623 = vmatpush.msrb.mxu3 %v3126_v4  ;;  %1675 = vmatpush.msrb.mxu1 %v3127_v50  ;;  %v1476_v55 = vsel %vm1195_vm1, %v3167_v48, 0.0 }
 0xa47   : > { %1480 = vadd.xlane.f32.xlu1 %v1479_v36 }
 0xa48   : > { %1727 = vmatpush.msra.mxu3 %v3443_v10 }
 0xa4f   : > { %1477 = vadd.xlane.f32.xlu1 %v1476_v55 }
 0xa68   : > { %1680 = vrot.lane.b32.xlu1 %v3705_v54, %s3306_s21 }
 0xa7a   : > { %v1466_v62 = vpop.xlane.xlu2 %1465 }
 0xa7b   : > { %3168 = vrcp.f32 %v1466_v62 }
 0xa81   : > { %v3169_v51 = vpop.eup %3168 }
 0xa82   : > { %v1492_v7 = vmul.f32 %v3169_v51, %v3755_v37 }
 0xa84   : > { %2936 = vmatmul.msk.f32.vlgmr.msra.gmra.mxu1 %vm1195_vm1, %v1492_v7 }
 0xa85   : > { %1790 = vmatpush.msra.mxu1 %v3449_v12 }
 0xa9b   : > { %v1472_v43 = vpop.xlane.xlu2 %1471 }
 0xa9c   : > { %3170 = vrcp.f32 %v1472_v43 }
 0xaa2   : > { %v3171_v9 = vpop.eup %3170 }
 0xaa3   : > { %v1494_v10 = vmul.f32 %v3171_v9, %v3155_v60  ;;  %v1629_v52 = vpop.permute.xlu2 %1628  ;;  %v1469_v56 = vpop.xlane.xlu1 %1468 }
 0xaa4   : > { %3172 = vrcp.f32 %v1469_v56  ;;  %1649 = vmatpush.msrb.mxu0 %v1629_v52  ;;  %v1897_v52 = vld [vmem:[%s3402_s9 + $0xd0] sm:$0xff]  ;;  %v1896_v56 = vld [vmem:[%s3402_s9 + $0xc8] sm:$0xff] }
 0xaa5   : > { %2938 = vmatmul.msk.f32.vlgmr.msrb.gmra.mxu3 %vm1195_vm1, %v1494_v10  ;;  %v1898_v10 = vld [vmem:[%s3402_s9 + $0xd8] sm:$0xff] }
 0xaa6   : > { %1759 = vmatpush.msra.mxu0 %v3446_v11 }
 0xaaa   : > { %v3173_v54 = vpop.eup %3172 }
 0xaab   : > { %v1493_v35 = vmul.f32 %v3173_v54, %v3157_v46  ;;  %v1475_v42 = vpop.xlane.xlu0 %1474 }
 0xaac   : > { %3174 = vrcp.f32 %v1475_v42  ;;  %v1146_v42 = vld [vmem:[#allocation2] sm:$0xff] }
 0xaad   : > { %2937 = vmatmul.msk.f32.vlgmr.msrb.gmra.mxu2 %vm1195_vm1, %v1493_v35  ;;  %v1895_v35 = vld [vmem:[%s3402_s9 + $0xc0] sm:$0xff] }
 0xab2   : > { %v3175_v37 = vpop.eup %3174 }
 0xab3   : > { %v1495_v12 = vmul.f32 %v3175_v37, %v3159_v53 }
 0xab5   : > { %2939 = vmatmul.msk.f32.vlgmr.msrb.gmra.mxu0 %vm1195_vm1, %v1495_v12 }
 0xab6   : > { %1954 = vmatpush.msrb.mxu0 %v1898_v10 }
 0xab7   : > { %v1547_v5 = vpop.f32.mrf.mxu1 }
 0xab8   : > { %1955 = vmatpush.msrb.mxu0 %v1897_v52 }
 0xaba   : > { %v1481_v8 = vpop.xlane.xlu1 %1480  ;;  %1956 = vmatpush.msrb.mxu0 %v1896_v56 }
 0xabc   : > { %1957 = vmatpush.msrb.mxu0 %v1895_v35 }
 0xabe   : > { %v1521_v60 = vpop.f32.mrf.mxu3 }
 0xabf   : > { %2942 = vmatmul.msk.f32.vlgmr.msra.gmra.mxu3 %vm1195_vm1, %v1521_v60 }
 0xac2   : > { %v1478_v6 = vpop.xlane.xlu1 %1477 }
 0xac3   : > { %3176 = vrcp.f32 %v1478_v6 }
 0xac4   : > { %3178 = vrcp.f32 %v1481_v8 }
 0xac7   : > { %2943 = vmatmul.msk.f32.gmra.mxu3 %vm1195_vm1, %v1547_v5 }
 0xac9   : > { %v3177_v11 = vpop.eup %3176 }
 0xaca   : > { %v1496_v1 = vmul.f32 %v3177_v11, %v3167_v48  ;;  %v3179_v46 = vpop.eup %3178 }
 0xacb   : > { %v1497_v63 = vmul.f32 %v3179_v46, %v3165_v44 }
 0xacc   : > { %2940 = vmatmul.msk.f32.vlgmr.msrb.gmra.mxu1 %vm1195_vm1, %v1496_v1 }
 0xada   : > { %v1681_v38 = vpop.permute.xlu1 %1680 }
 0xadb   : > { %1701 = vmatpush.msra.mxu2 %v1681_v38 }
 0xadc   : > { %2941 = vmatmul.msk.f32.vlgmr.msra.gmra.mxu2 %vm1195_vm1, %v1497_v63 }
 0xadd   : > { %1821 = vmatpush.msrb.mxu2 %v3452_v13  ;;  %v1735_v13 = vperm.slane %v3455_v14, 0 }
 0xb01   : > { %v1573_v61 = vpop.f32.mrf.mxu1 }
 0xb02   : > { %2944 = vmatmul.msk.f32.vlgmr.msra.gmra.mxu0 %vm1195_vm1, %v1573_v61 }
 0xb28   : > { %v1625_v0 = vpop.f32.mrf.mxu3 }
 0xb29   : > { %2946 = vmatmul.msk.f32.vlgmr.msra.gmra.mxu1 %vm1195_vm1, %v1625_v0 }
 0xb30   : > { %v1599_v53 = vpop.f32.mrf.mxu2 }
 0xb31   : > { %2945 = vmatmul.msk.f32.gmra.mxu0 %vm1195_vm1, %v1599_v53 }
 0xb32   : > { %v1651_v2 = vpop.f32.mrf.mxu0 }
 0xb33   : > { %2947 = vmatmul.msk.f32.gmra.mxu1 %vm1195_vm1, %v1651_v2  ;;  %v1147_v2 = vld [vmem:[#allocation2 + $0x8] sm:$0xff] }
 0xb39   : > { %2952 = vmatmul.msk.f32.vlgmr.msrb.gmra.mxu0 %vm1149_vm2, %v1146_v42 }
 0xb41   : > { %2953 = vmatmul.msk.f32.gmra.mxu0 %vm1149_vm2, %v1147_v2 }
 0xb42   : > { %v1729_v47 = vpop.f32.mrf.mxu3 }
 0xb43   : > { %v1736_v40 = vadd.f32 %v1735_v13, %v1729_v47  ;;  %v1892_v47 = vld [vmem:[%s3402_s9 + $0xb0] sm:$0xff] }
 0xb49   : > { %v1677_v39 = vpop.f32.mrf.mxu1 }
 0xb4a   : > { %2948 = vmatmul.msk.f32.vlgmr.msrb.gmra.mxu2 %vm1195_vm1, %v1677_v39  ;;  %v1732_v4 = vpop.f32.mrf.mxu3  ;;  %v1893_v39 = vld [vmem:[%s3402_s9 + $0xb8] sm:$0xff] }
 0xb4b   : > { %v1737_v48 = vadd.f32 %v1735_v13, %v1732_v4  ;;  %1924 = vmatpush.msrb.mxu3 %v1893_v39 }
 0xb4d   : > { %1925 = vmatpush.msrb.mxu3 %v1892_v47 }
 0xb5f   : > { %v1703_v33 = vpop.f32.mrf.mxu2 }
 0xb60   : > { %2949 = vmatmul.msk.f32.gmra.mxu2 %vm1195_vm1, %v1703_v33  ;;  %v3143_v33 = vld [vmem:[%s3402_s9 + $0x109] ss:$0 sm:$0xff] }
 0xb7f   : > { %v1761_v34 = vpop.f32.mrf.mxu0 }
 0xb80   : > { %v1767_v49 = vadd.f32 %v1761_v34, %v1736_v40  ;;  %v1891_v40 = vld [vmem:[%s3402_s9 + $0xa8] sm:$0xff] }
 0xb81   : > { %1926 = vmatpush.msrb.mxu3 %v1891_v40 }
 0xba6   : > { %v1792_v41 = vpop.f32.mrf.mxu1 }
 0xba7   : > { %v1798_v57 = vadd.f32 %v1792_v41, %v1767_v49  ;;  %v1890_v41 = vld [vmem:[%s3402_s9 + $0xa0] sm:$0xff] }
 0xba8   : > { %1927 = vmatpush.msrb.mxu3 %v1890_v41 }
 0xbae   : > { %v1764_v36 = vpop.f32.mrf.mxu0 }
 0xbaf   : > { %v1768_v14 = vadd.f32 %v1764_v36, %v1737_v48 }
 0xbb0   : > { %v1795_v55 = vpop.f32.mrf.mxu1 }
 0xbb1   : > { %v1799_v62 = vadd.f32 %v1795_v55, %v1768_v14  ;;  %v1884_v14 = vperm.slane %v3458_v15, 0 }
 0xbb6   : > { %v1959_v13 = vpop.f32.mrf.mxu0 }
 0xbb7   : > { %v3810_v34 = vadd.f32 %v3143_v33, %v1959_v13 }
 0xbb9   : > { %2954 = vmatpush.xpose.msk.msrb.mxu1 %vm1195_vm1, %v3810_v34 }
 0xbcd   : > { %v1823_v58 = vpop.f32.mrf.mxu2 }
 0xbce   : > { %v1829_v59 = vadd.f32 %v1823_v58, %v1798_v57 }
 0xbd0   : > { %v1831_v44 = vadd.f32 %v1829_v59, %v3671_v3  ;;  %v3307_v3 = vmov 32.0  }
 0xbd1   : > { %3180 = vrcp.f32 %v3307_v3 }
 0xbd2   : > { %v1833_v50 = vsel %vm1149_vm2, %v1831_v44, 0.0 }
 0xbd3   : > { %1834 = vadd.xlane.f32.xlu2 %v1833_v50 }
 0xbd7   : > { %v3181_v54 = vpop.eup %3180 }
 0xbd8   : > { %v1840_v37 = vmul.f32 32.0, %v3181_v54  ;;  %vm1844_vm3 = vweird.f32 %v3181_v54 }
 0xbda   : > { %v1841_v12 = vsub.f32 1.0, %v1840_v37 }
 0xbe3   : > { %v1826_v51 = vpop.f32.mrf.mxu2 }
 0xbe4   : > { %v1830_v7 = vadd.f32 %v1826_v51, %v1799_v62 }
 0xbe6   : > { %v1832_v43 = vadd.f32 %v1830_v7, %v3676_v45  ;;  %v1842_v45 = vmul.f32 %v3181_v54, %v1841_v12 }
 0xbe8   : > { %v1836_v9 = vsel %vm1149_vm2, %v1832_v43, 0.0  ;;  %v1843_v8 = vadd.f32 %v3181_v54, %v1842_v45 }
 0xbe9   : > { %1837 = vadd.xlane.f32.xlu1 %v1836_v9 }
 0xbea   : > { %v3800_v60 = vsel %vm1844_vm3, %v3181_v54, %v1843_v8  ;;  %v1962_v8 = vpop.f32.mrf.mxu0 }
 0xc02   : > { %1981 = vrot.lane.b32.xlu1 %v3810_v34, %s3303_s8 }
 0xc46   : > { %v1835_v6 = vpop.xlane.xlu2 %1834 }
 0xc47   : > { %v1846_v5 = vmul.f32 %v3800_v60, %v1835_v6  ;;  %v3830_v6 = vadd.f32 %v3143_v33, %v1962_v8 }
 0xc49   : > { %v1848_v11 = vsub.f32 %v1831_v44, %v1846_v5  ;;  %2956 = vmatpush.xpose.msk.msra.mxu2 %vm1195_vm1, %v3830_v6  ;;  %1991 = vrot.lane.b32.xlu1 %v3830_v6, %s3302_s7 }
 0xc4b   : > { %v1850_v1 = vmul.f32 %v1848_v11, %v1848_v11 }
 0xc4d   : > { %v1852_v46 = vsel %vm1149_vm2, %v1850_v1, 0.0 }
 0xc4e   : > { %1853 = vadd.xlane.f32.xlu0 %v1852_v46 }
 0xc5c   : > { %v1838_v63 = vpop.xlane.xlu1 %1837 }
 0xc5d   : > { %v1847_v38 = vmul.f32 %v3800_v60, %v1838_v63 }
 0xc5f   : > { %v1849_v61 = vsub.f32 %v1832_v43, %v1847_v38  ;;  %v1887_v43 = vperm.slane %v3461_v16, 0 }
 0xc61   : > { %v1851_v0 = vmul.f32 %v1849_v61, %v1849_v61 }
 0xc63   : > { %v1855_v53 = vsel %vm1149_vm2, %v1851_v0, 0.0 }
 0xc64   : > { %1856 = vadd.xlane.f32.xlu0 %v1855_v53 }
 0xc74   : > { %v3838_v5 = vpop.permute.xlu1 %1981 }
 0xc75   : > { %2958 = vmatpush.xpose.msk.msra.mxu1 %vm1195_vm1, %v3838_v5 }
 0xc78   : > { %1983 = vrot.lane.b32.xlu0 %v3830_v6, %s3303_s8 }
 0xc80   : > { %1985 = vrot.lane.b32.xlu0 %v3810_v34, %s3304_s6 }
 0xcbb   : > { %v3861_v0 = vpop.permute.xlu1 %1991 }
 0xcc1   : > { %v1854_v49 = vpop.xlane.xlu0 %1853 }
 0xcc2   : > { %v1858_v57 = vmul.f32 %v1854_v49, %v3800_v60 }
 0xcc4   : > { %v1860_v58 = vadd.f32 1e-05, %v1858_v57 }
 0xcc6   : > { %3182 = vrsqrt.f32 %v1860_v58  ;;  %vm1868_vm5 = vweird.f32 %v1860_v58 }
 0xccc   : > { %v3183_v59 = vpop.eup %3182 }
 0xccd   : > { %v1863_v44 = vmul.f32 %v3183_v59, %v1860_v58  ;;  %vm1869_vm4 = vweird.f32 %v3183_v59 }
 0xcce   : > { %vm1870_vm6 = vmor %vm1868_vm5, %vm1869_vm4 }
 0xccf   : > { %v1864_v50 = vmul.f32 %v3183_v59, %v1863_v44 }
 0xcd1   : > { %v1865_v4 = vmul.f32 0.5, %v1864_v50 }
 0xcd3   : > { %v1866_v36 = vsub.f32 1.5, %v1865_v4 }
 0xcd5   : > { %v1867_v48 = vmul.f32 %v3183_v59, %v1866_v36 }
 0xcd7   : > { %v1871_v55 = vsel %vm1870_vm6, %v3183_v59, %v1867_v48  ;;  %v1857_v62 = vpop.xlane.xlu0 %1856 }
 0xcd8   : > { %v1882_v51 = vmul.f32 %v1871_v55, %v1848_v11  ;;  %v1859_v7 = vmul.f32 %v1857_v62, %v3800_v60  ;;  %v3144_v11 = vld [vmem:[%s3402_s9 + $0x108] ss:$0 sm:$0xff] }
 0xcda   : > { %v1885_v9 = vmul.f32 %v1884_v14, %v1882_v51  ;;  %v1861_v3 = vadd.f32 1e-05, %v1859_v7 }
 0xcdc   : > { %3184 = vrsqrt.f32 %v1861_v3  ;;  %v3822_v10 = vadd.f32 %v1887_v43, %v1885_v9  ;;  %vm1878_vm8 = vweird.f32 %v1861_v3 }
 0xcde   : > { %2950 = vmatmul.msk.f32.vlgmr.msrb.gmra.mxu3 %vm1149_vm2, %v3822_v10 }
 0xce2   : > { %v3185_v52 = vpop.eup %3184 }
 0xce3   : > { %v1873_v56 = vmul.f32 %v3185_v52, %v1861_v3  ;;  %vm1879_vm7 = vweird.f32 %v3185_v52 }
 0xce4   : > { %vm1880_vm9 = vmor %vm1878_vm8, %vm1879_vm7 }
 0xce5   : > { %v1874_v54 = vmul.f32 %v3185_v52, %v1873_v56 }
 0xce7   : > { %v1875_v15 = vmul.f32 0.5, %v1874_v54 }
 0xce9   : > { %v1876_v35 = vsub.f32 1.5, %v1875_v15 }
 0xceb   : > { %v1877_v42 = vmul.f32 %v3185_v52, %v1876_v35 }
 0xced   : > { %v1881_v37 = vsel %vm1880_vm9, %v3185_v52, %v1877_v42 }
 0xcee   : > { %v1883_v16 = vmul.f32 %v1881_v37, %v1849_v61  ;;  %v3857_v61 = vpop.permute.xlu0 %1983 }
 0xcef   : > { %2960 = vmatpush.xpose.msk.msrb.mxu2 %vm1195_vm1, %v3857_v61 }
 0xcf0   : > { %v1886_v12 = vmul.f32 %v1884_v14, %v1883_v16 }
 0xcf2   : > { %v3826_v45 = vadd.f32 %v1887_v43, %v1886_v12 }
 0xcf4   : > { %2951 = vmatmul.msk.f32.gmra.mxu3 %vm1149_vm2, %v3826_v45 }
 0xcf6   : > { %v1986_v53 = vpop.permute.xlu0 %1985 }
 0xcf7   : > { %v3133_v2 = vpack.i.bf16 %v1986_v53, %v3857_v61  ;;  %2962 = vmatpush.xpose.msk.msra.mxu3 %vm1195_vm1, %v1986_v53 }
 0xd61   : > { %v1929_v1 = vpop.f32.mrf.mxu3 }
 0xd62   : > { %v1930_v46 = vadd.f32 %v3144_v11, %v1929_v1 }
 0xd64   : > { %1967 = vrot.lane.b32.xlu2 %v1930_v46, %s3303_s8  ;;  %2955 = vmatmul.msk.f32.vlgmr.msrb.gmra.mxu1 %vm1195_vm1, %v1930_v46 }
 0xd65   : > { %1975 = vrot.lane.b32.xlu1 %v1930_v46, %s3302_s7  ;;  %1971 = vrot.lane.b32.xlu0 %v1930_v46, %s3304_s6 }
 0xd6d   : > { %1989 = vrot.lane.b32.xlu0 %v3810_v34, %s3302_s7 }
 0xd77   : > { %v1932_v63 = vpop.f32.mrf.mxu3 }
 0xd78   : > { %v1933_v38 = vadd.f32 %v3144_v11, %v1932_v63 }
 0xd7a   : > { %1973 = vrot.lane.b32.xlu0 %v1933_v38, %s3304_s6  ;;  %1969 = vrot.lane.b32.xlu2 %v1933_v38, %s3303_s8 }
 0xd7b   : > { %2957 = vmatmul.msk.f32.vlgmr.msra.gmra.mxu2 %vm1195_vm1, %v1933_v38 }
 0xd7c   : > { %2968 = vmatpush.xpose.msk.msra.mxu2 %vm1195_vm1, %v3861_v0 }
 0xd82   : > { %1977 = vrot.lane.b32.xlu2 %v1933_v38, %s3302_s7  ;;  %v3128_v38 = vpack.i.bf16 %v3838_v5, %v3810_v34 }
 0xd8a   : > { %1987 = vrot.lane.b32.xlu2 %v3830_v6, %s3304_s6 }
 0xdbe   : > { %v1968_v39 = vpop.permute.xlu2 %1967 }
 0xdbf   : > { %2959 = vmatmul.msk.f32.vlgmr.msra.gmra.mxu1 %vm1195_vm1, %v1968_v39 }
 0xdd4   : > { %v1970_v33 = vpop.permute.xlu2 %1969 }
 0xdd5   : > { %2961 = vmatmul.msk.f32.vlgmr.msrb.gmra.mxu2 %vm1195_vm1, %v1970_v33 }
 0xdd7   : > { %v1972_v13 = vpop.permute.xlu0 %1971  ;;  %v1976_v49 = vpop.permute.xlu1 %1975 }
 0xdd8   : > { %2963 = vmatmul.msk.f32.vlgmr.msra.gmra.mxu3 %vm1195_vm1, %v1972_v13 }
 0xddc   : > { %v1978_v47 = vpop.permute.xlu2 %1977 }
 0xddd   : > { %2969 = vmatmul.msk.f32.vlgmr.msra.gmra.mxu2 %vm1195_vm1, %v1978_v47 }
 0xddf   : > { %v1990_v40 = vpop.permute.xlu0 %1989 }
 0xde0   : > { %2966 = vmatpush.xpose.msk.msrb.mxu1 %vm1195_vm1, %v1990_v40  ;;  %v3138_v61 = vpack.i.bf16 %v3830_v6, %v1990_v40 }
 0xde1   : > { %v2014_v41 = vpop.f32.mrf.mxu1 }
 0xde2   : > { %v2185_v57 = vmul.f32 0.35355338, %v2014_v41 }
 0xde3   : > { %2967 = vmatmul.msk.f32.vlgmr.msrb.gmra.mxu1 %vm1195_vm1, %v1976_v49 }
 0xde4   : > { %v3873_v58 = vpop.permute.xlu2 %1987  ;;  %v2193_v59 = vsel %vm1195_vm1, %v2185_v57, -inf }
 0xde5   : > { %2194 = vmax.xlane.f32.xlu1 %v2193_v59  ;;  %2964 = vmatpush.xpose.msk.msra.mxu0 %vm1195_vm1, %v3873_v58 }
 0xdec   : > { %v1974_v44 = vpop.permute.xlu0 %1973 }
 0xded   : > { %2965 = vmatmul.msk.f32.vlgmr.msra.gmra.mxu0 %vm1195_vm1, %v1974_v44 }
 0xdfe   : > { %v2038_v50 = vpop.f32.mrf.mxu2 }
 0xdff   : > { %v2186_v4 = vmul.f32 0.35355338, %v2038_v50 }
 0xe01   : > { %v2196_v36 = vsel %vm1195_vm1, %v2186_v4, -inf }
 0xe02   : > { %2197 = vmax.xlane.f32.xlu0 %v2196_v36 }
 0xe3c   : > { %v2062_v48 = vpop.f32.mrf.mxu1 }
 0xe3d   : > { %v2187_v14 = vmul.f32 0.35355338, %v2062_v48 }
 0xe3f   : > { %v2199_v55 = vsel %vm1195_vm1, %v2187_v14, -inf }
 0xe40   : > { %2200 = vmax.xlane.f32.xlu2 %v2199_v55 }
 0xe58   : > { %v2086_v62 = vpop.f32.mrf.mxu2  ;;  %v2195_v51 = vpop.xlane.xlu1 %2194 }
 0xe59   : > { %v2217_v7 = vsub.f32 %v2185_v57, %v2195_v51  ;;  %v2188_v8 = vmul.f32 0.35355338, %v2086_v62 }
 0xe5b   : > { %v2225_v43 = vmul.f32 1.442695, %v2217_v7  ;;  %v2110_v9 = vpop.f32.mrf.mxu3  ;;  %v2202_v46 = vsel %vm1195_vm1, %v2188_v8, -inf }
 0xe5c   : > { %v2189_v3 = vmul.f32 0.35355338, %v2110_v9 }
 0xe5d   : > { %3186 = vpow2.f32 %v2225_v43 }
 0xe5e   : > { %v2205_v52 = vsel %vm1195_vm1, %v2189_v3, -inf }
 0xe5f   : > { %2206 = vmax.xlane.f32.xlu1 %v2205_v52 }
 0xe60   : > { %v2158_v56 = vpop.f32.mrf.mxu1  ;;  %v2182_v54 = vpop.f32.mrf.mxu2 }
 0xe61   : > { %v2191_v15 = vmul.f32 0.35355338, %v2158_v56  ;;  %v2192_v35 = vmul.f32 0.35355338, %v2182_v54 }
 0xe63   : > { %v3882_v42 = vpop.eup %3186  ;;  %v2211_v37 = vsel %vm1195_vm1, %v2191_v15, -inf  ;;  %v2214_v12 = vsel %vm1195_vm1, %v2192_v35, -inf }
 0xe64   : > { %2212 = vmax.xlane.f32.xlu2 %v2211_v37  ;;  %v2241_v16 = vsel %vm1195_vm1, %v3882_v42, 0.0 }
 0xe65   : > { %2242 = vadd.xlane.f32.xlu0 %v2241_v16 }
 0xe67   : > { %2215 = vmax.xlane.f32.xlu1 %v2214_v12 }
 0xe6a   : > { %v2134_v11 = vpop.f32.mrf.mxu0 }
 0xe6b   : > { %v2190_v1 = vmul.f32 0.35355338, %v2134_v11 }
 0xe6d   : > { %2203 = vmax.xlane.f32.xlu0 %v2202_v46  ;;  %v2208_v63 = vsel %vm1195_vm1, %v2190_v1, -inf }
 0xe6e   : > { %2209 = vmax.xlane.f32.xlu2 %v2208_v63 }
 0xe75   : > { %v2198_v53 = vpop.xlane.xlu0 %2197 }
 0xe76   : > { %v2218_v39 = vsub.f32 %v2186_v4, %v2198_v53 }
 0xe78   : > { %v2227_v33 = vmul.f32 1.442695, %v2218_v39 }
 0xe7a   : > { %3188 = vpow2.f32 %v2227_v33 }
 0xe80   : > { %3134 = vrot.lane.b32.xlu1 %v3133_v2, %s3305_s10  ;;  %v3896_v13 = vpop.eup %3188 }
 0xe81   : > { %3129 = vrot.lane.b32.xlu0 %v3128_v38, %s3305_s10  ;;  %v2244_v47 = vsel %vm1195_vm1, %v3896_v13, 0.0 }
 0xe89   : > { %3139 = vrot.lane.b32.xlu0 %v3138_v61, %s3305_s10 }
 0xeaa   : > { %2245 = vadd.xlane.f32.xlu1 %v2244_v47 }
 0xeb3   : > { %v2201_v41 = vpop.xlane.xlu2 %2200 }
 0xeb4   : > { %v2219_v34 = vsub.f32 %v2187_v14, %v2201_v41 }
 0xeb6   : > { %v2229_v5 = vmul.f32 1.442695, %v2219_v34 }
 0xeb8   : > { %3190 = vpow2.f32 %v2229_v5 }
 0xebe   : > { %v3900_v2 = vpop.eup %3190 }
 0xebf   : > { %v2247_v6 = vsel %vm1195_vm1, %v3900_v2, 0.0 }
 0xec0   : > { %2248 = vadd.xlane.f32.xlu1 %v2247_v6 }
 0xed2   : > { %v2207_v40 = vpop.xlane.xlu1 %2206 }
 0xed3   : > { %v2221_v49 = vsub.f32 %v2189_v3, %v2207_v40 }
 0xed5   : > { %v2233_v57 = vmul.f32 1.442695, %v2221_v49 }
 0xed7   : > { %3192 = vpow2.f32 %v2233_v57  ;;  %v2213_v59 = vpop.xlane.xlu2 %2212 }
 0xed8   : > { %v2223_v44 = vsub.f32 %v2191_v15, %v2213_v59  ;;  %v2243_v50 = vpop.xlane.xlu0 %2242 }
 0xeda   : > { %v2237_v4 = vmul.f32 1.442695, %v2223_v44  ;;  %v2216_v14 = vpop.xlane.xlu1 %2215  ;;  %v1900_v44 = vld [vmem:[%s3402_s9 + $0xe0] sm:$0xff] }
 0xedb   : > { %v2224_v9 = vsub.f32 %v2192_v35, %v2216_v14 }
 0xedc   : > { %3194 = vpow2.f32 %v2237_v4 }
 0xedd   : > { %v3904_v36 = vpop.eup %3192  ;;  %v2239_v54 = vmul.f32 1.442695, %v2224_v9 }
 0xede   : > { %v2253_v48 = vsel %vm1195_vm1, %v3904_v36, 0.0 }
 0xedf   : > { %2254 = vadd.xlane.f32.xlu1 %v2253_v48 }
 0xee0   : > { %v2204_v55 = vpop.xlane.xlu0 %2203 }
 0xee1   : > { %v2220_v62 = vsub.f32 %v2188_v8, %v2204_v55  ;;  %v2210_v51 = vpop.xlane.xlu2 %2209 }
 0xee2   : > { %v3195_v7 = vpop.eup %3194  ;;  %v2222_v43 = vsub.f32 %v2190_v1, %v2210_v51 }
 0xee3   : > { %v2231_v3 = vmul.f32 1.442695, %v2220_v62  ;;  %v2259_v52 = vsel %vm1195_vm1, %v3195_v7, 0.0 }
 0xee4   : > { %v2235_v56 = vmul.f32 1.442695, %v2222_v43  ;;  %2260 = vadd.xlane.f32.xlu2 %v2259_v52 }
 0xee5   : > { %3196 = vpow2.f32 %v2231_v3 }
 0xee6   : > { %3198 = vpow2.f32 %v2235_v56 }
 0xee7   : > { %3200 = vpow2.f32 %v2239_v54 }
 0xee8   : > { %3202 = vrcp.f32 %v2243_v50 }
 0xeeb   : > { %v3909_v15 = vpop.eup %3196 }
 0xeec   : > { %v3911_v37 = vpop.eup %3198  ;;  %v2250_v16 = vsel %vm1195_vm1, %v3909_v15, 0.0 }
 0xeed   : > { %2251 = vadd.xlane.f32.xlu2 %v2250_v16  ;;  %v2256_v35 = vsel %vm1195_vm1, %v3911_v37, 0.0  ;;  %v3917_v12 = vpop.eup %3200 }
 0xeee   : > { %2257 = vadd.xlane.f32.xlu0 %v2256_v35  ;;  %v3203_v8 = vpop.eup %3202  ;;  %v2262_v61 = vsel %vm1195_vm1, %v3917_v12, 0.0 }
 0xeef   : > { %v2273_v53 = vmul.f32 %v3203_v8, %v3882_v42 }
 0xef2   : > { %v3135_v11 = vpop.permute.xlu1 %3134 }
 0xef3   : > { %v3136_v1 = vunpack.i.l.bf16 %v3135_v11  ;;  %v3130_v46 = vpop.permute.xlu0 %3129  ;;  %v3137_v39 = vunpack.i.h.bf16 %v3135_v11 }
 0xef4   : > { %v3132_v63 = vunpack.i.h.bf16 %v3130_v46  ;;  %v3131_v38 = vunpack.i.l.bf16 %v3130_v46 }
 0xef5   : > { %2380 = vmatpush.msrb.mxu2 %v3136_v1  ;;  %2263 = vadd.xlane.f32.xlu2 %v2262_v61 }
 0xef6   : > { %2302 = vmatpush.msrb.mxu3 %v3131_v38  ;;  %2354 = vmatpush.msra.mxu1 %v3132_v63 }
 0xef7   : > { %2970 = vmatmul.msk.f32.vlgmr.msrb.gmra.mxu3 %vm1195_vm1, %v2273_v53 }
 0xef8   : > { %2411 = vrot.lane.b32.xlu1 %v3873_v58, %s3305_s10  ;;  %2406 = vmatpush.msra.mxu3 %v3137_v39 }
 0xefa   : > { %2510 = vmatpush.msrb.mxu3 %v1900_v44 }
 0xefb   : > { %v3140_v33 = vpop.permute.xlu0 %3139 }
 0xefc   : > { %v3142_v47 = vunpack.i.h.bf16 %v3140_v33  ;;  %v3141_v41 = vunpack.i.l.bf16 %v3140_v33 }
 0xefe   : > { %2328 = vmatpush.msrb.mxu0 %v3142_v47  ;;  %2458 = vmatpush.msrb.mxu1 %v3141_v41 }
 0xf0d   : > { %2463 = vrot.lane.b32.xlu2 %v3861_v0, %s3305_s10 }
 0xf1d   : > { %v2246_v42 = vpop.xlane.xlu1 %2245 }
 0xf1e   : > { %3204 = vrcp.f32 %v2246_v42 }
 0xf24   : > { %v3205_v34 = vpop.eup %3204 }
 0xf25   : > { %v2274_v5 = vmul.f32 %v3205_v34, %v3896_v13 }
 0xf27   : > { %2971 = vmatmul.msk.f32.vlgmr.msrb.gmra.mxu0 %vm1195_vm1, %v2274_v5 }
 0xf33   : > { %v2249_v6 = vpop.xlane.xlu1 %2248 }
 0xf34   : > { %3206 = vrcp.f32 %v2249_v6 }
 0xf3a   : > { %v3207_v58 = vpop.eup %3206 }
 0xf3b   : > { %v2275_v40 = vmul.f32 %v3207_v58, %v3900_v2 }
 0xf3d   : > { %2972 = vmatmul.msk.f32.vlgmr.msra.gmra.mxu1 %vm1195_vm1, %v2275_v40 }
 0xf52   : > { %v2255_v49 = vpop.xlane.xlu1 %2254 }
 0xf53   : > { %3208 = vrcp.f32 %v2255_v49 }
 0xf57   : > { %v2261_v57 = vpop.xlane.xlu2 %2260 }
 0xf58   : > { %3210 = vrcp.f32 %v2261_v57 }
 0xf59   : > { %v3209_v0 = vpop.eup %3208 }
 0xf5a   : > { %v2277_v59 = vmul.f32 %v3209_v0, %v3904_v36 }
 0xf5c   : > { %2974 = vmatmul.msk.f32.vlgmr.msra.gmra.mxu3 %vm1195_vm1, %v2277_v59 }
 0xf5d   : > { %2687 = vmatpush.msra.mxu3 %v3473_v20 }
 0xf5e   : > { %v3211_v13 = vpop.eup %3210 }
 0xf5f   : > { %v2279_v50 = vmul.f32 %v3211_v13, %v3195_v7  ;;  %2688 = vmatpush.msra.mxu3 %v3470_v19  ;;  %v1901_v7 = vld [vmem:[%s3402_s9 + $0xe8] sm:$0xff] }
 0xf60   : > { %v2252_v2 = vpop.xlane.xlu2 %2251 }
 0xf61   : > { %3212 = vrcp.f32 %v2252_v2  ;;  %2976 = vmatmul.msk.f32.vlgmr.msrb.gmra.mxu1 %vm1195_vm1, %v2279_v50  ;;  %v2258_v4 = vpop.xlane.xlu0 %2257  ;;  %2689 = vmatpush.msra.mxu3 %v3467_v18 }
 0xf62   : > { %3214 = vrcp.f32 %v2258_v4 }
 0xf63   : > { %2690 = vmatpush.msra.mxu3 %v3464_v17 }
 0xf67   : > { %v3213_v36 = vpop.eup %3212 }
 0xf68   : > { %v3215_v48 = vpop.eup %3214  ;;  %v2276_v14 = vmul.f32 %v3213_v36, %v3909_v15  ;;  %v2264_v20 = vpop.xlane.xlu2 %2263 }
 0xf69   : > { %v2278_v55 = vmul.f32 %v3215_v48, %v3911_v37  ;;  %3216 = vrcp.f32 %v2264_v20  ;;  %v3146_v48 = vld [vmem:[%s3402_s9 + $0x10b] ss:$0 sm:$0xff] }
 0xf6a   : > { %v2412_v19 = vpop.permute.xlu1 %2411  ;;  %2973 = vmatmul.msk.f32.vlgmr.msrb.gmra.mxu2 %vm1195_vm1, %v2276_v14 }
 0xf6b   : > { %2432 = vmatpush.msra.mxu0 %v2412_v19  ;;  %v3147_v19 = vld [vmem:[%s3402_s9 + $0x10c] ss:$0 sm:$0xff] }
 0xf6c   : > { %2975 = vmatmul.msk.f32.vlgmr.msra.gmra.mxu0 %vm1195_vm1, %v2278_v55 }
 0xf6d   : > { %2542 = vmatpush.msrb.mxu0 %v1901_v7 }
 0xf6f   : > { %v3217_v62 = vpop.eup %3216  ;;  %2716 = vmatpush.msra.mxu0 %v3500_v29 }
 0xf70   : > { %v2280_v18 = vmul.f32 %v3217_v62, %v3917_v12  ;;  %v2464_v51 = vpop.permute.xlu2 %2463 }
 0xf71   : > { %2484 = vmatpush.msra.mxu2 %v2464_v51  ;;  %2717 = vmatpush.msra.mxu0 %v3497_v28  ;;  %v1903_v28 = vld [vmem:[%s3402_s9 + $0xf8] sm:$0xff] }
 0xf72   : > { %2977 = vmatmul.msk.f32.vlgmr.msra.gmra.mxu2 %vm1195_vm1, %v2280_v18 }
 0xf73   : > { %2718 = vmatpush.msra.mxu0 %v3494_v27  ;;  %2604 = vmatpush.msrb.mxu2 %v1903_v28  ;;  %v1902_v27 = vld [vmem:[%s3402_s9 + $0xf0] sm:$0xff] }
 0xf74   : > { %2573 = vmatpush.msra.mxu1 %v1902_v27 }
 0xf75   : > { %2719 = vmatpush.msra.mxu0 %v3491_v26 }
 0xf77   : > { %2720 = vmatpush.msra.mxu0 %v3488_v25 }
 0xf79   : > { %2721 = vmatpush.msra.mxu0 %v3485_v24  ;;  %v3145_v24 = vld [vmem:[%s3402_s9 + $0x10a] ss:$0 sm:$0xff] }
 0xf7a   : > { %v2304_v17 = vpop.f32.mrf.mxu3 }
 0xf7b   : > { %2978 = vmatmul.msk.f32.vlgmr.msrb.gmra.mxu3 %vm1195_vm1, %v2304_v17  ;;  %2722 = vmatpush.msra.mxu0 %v3482_v23 }
 0xf7d   : > { %2723 = vmatpush.msra.mxu0 %v3479_v22 }
 0xfa4   : > { %v2330_v43 = vpop.f32.mrf.mxu0 }
 0xfa5   : > { %2979 = vmatmul.msk.f32.gmra.mxu3 %vm1195_vm1, %v2330_v43 }
 0xfba   : > { %v2356_v9 = vpop.f32.mrf.mxu1 }
 0xfbb   : > { %2980 = vmatmul.msk.f32.vlgmr.msrb.gmra.mxu0 %vm1195_vm1, %v2356_v9 }
 0xfde   : > { %v2460_v26 = vpop.f32.mrf.mxu1 }
 0xfdf   : > { %v2408_v29 = vpop.f32.mrf.mxu3  ;;  %2984 = vmatmul.msk.f32.vlgmr.msrb.gmra.mxu2 %vm1195_vm1, %v2460_v26 }
 0xfe0   : > { %2982 = vmatmul.msk.f32.vlgmr.msra.gmra.mxu1 %vm1195_vm1, %v2408_v29 }
 0xfe9   : > { %v2434_v25 = vpop.f32.mrf.mxu0 }
 0xfea   : > { %2983 = vmatmul.msk.f32.gmra.mxu1 %vm1195_vm1, %v2434_v25 }
 0xfed   : > { %v2382_v23 = vpop.f32.mrf.mxu2 }
 0xfee   : > { %2981 = vmatmul.msk.f32.gmra.mxu0 %vm1195_vm1, %v2382_v23 }
 0xff5   : > { %v2486_v22 = vpop.f32.mrf.mxu2 }
 0xff6   : > { %2985 = vmatmul.msk.f32.gmra.mxu2 %vm1195_vm1, %v2486_v22 }
 0xffe   : > { %v2512_v3 = vpop.f32.mrf.mxu3 }
 0xfff   : > { %v2519_v56 = vadd.f32 %v3145_v24, %v2512_v3 }
0x1028   : > { %v2515_v11 = vpop.f32.mrf.mxu3 }
0x1029   : > { %v2520_v46 = vadd.f32 %v3145_v24, %v2515_v11  ;;  %v2668_v24 = vperm.slane %v3476_v21, 0 }
0x1038   : > { %v2544_v52 = vpop.f32.mrf.mxu0 }
0x1039   : > { %v2550_v15 = vadd.f32 %v2544_v52, %v2519_v56 }
0x105d   : > { %v2575_v54 = vpop.f32.mrf.mxu1 }
0x105e   : > { %v2581_v37 = vadd.f32 %v2575_v54, %v2550_v15 }
0x1062   : > { %v2606_v16 = vpop.f32.mrf.mxu2 }
0x1063   : > { %v2612_v35 = vadd.f32 %v2606_v16, %v2581_v37  ;;  %v2700_v16 = vperm.slane %v3503_v30, 0 }
0x1065   : > { %v2616_v12 = vadd.f32 %v2612_v35, %v3822_v10 }
0x1067   : > { %v2618_v8 = vsel %vm1149_vm2, %v2616_v12, 0.0  ;;  %v2578_v38 = vpop.f32.mrf.mxu1 }
0x1068   : > { %2619 = vadd.xlane.f32.xlu2 %v2618_v8 }
0x106b   : > { %v2547_v1 = vpop.f32.mrf.mxu0 }
0x106c   : > { %v2551_v63 = vadd.f32 %v2547_v1, %v2520_v46 }
0x106e   : > { %v2582_v61 = vadd.f32 %v2578_v38, %v2551_v63 }
0x1079   : > { %v2609_v53 = vpop.f32.mrf.mxu2 }
0x107a   : > { %v2613_v39 = vadd.f32 %v2609_v53, %v2582_v61 }
0x107c   : > { %v2617_v33 = vadd.f32 %v2613_v39, %v3826_v45 }
0x107e   : > { %v2621_v47 = vsel %vm1149_vm2, %v2617_v33, 0.0 }
0x107f   : > { %2622 = vadd.xlane.f32.xlu1 %v2621_v47 }
0x10db   : > { %v2620_v41 = vpop.xlane.xlu2 %2619 }
0x10dc   : > { %v2624_v42 = vmul.f32 %v2620_v41, %v3800_v60 }
0x10de   : > { %v2626_v10 = vsub.f32 %v2616_v12, %v2624_v42 }
0x10e0   : > { %v2628_v34 = vmul.f32 %v2626_v10, %v2626_v10 }
0x10e2   : > { %v2630_v5 = vsel %vm1149_vm2, %v2628_v34, 0.0 }
0x10e3   : > { %2631 = vadd.xlane.f32.xlu0 %v2630_v5 }
0x10f2   : > { %v2623_v6 = vpop.xlane.xlu1 %2622 }
0x10f3   : > { %v2625_v58 = vmul.f32 %v2623_v6, %v3800_v60 }
0x10f5   : > { %v2627_v40 = vsub.f32 %v2617_v33, %v2625_v58 }
0x10f7   : > { %v2629_v49 = vmul.f32 %v2627_v40, %v2627_v40 }
0x10f9   : > { %v2633_v57 = vsel %vm1149_vm2, %v2629_v49, 0.0 }
0x10fa   : > { %2634 = vadd.xlane.f32.xlu0 %v2633_v57 }
0x1156   : > { %v2632_v45 = vpop.xlane.xlu0 %2631 }
0x1157   : > { %v2636_v0 = vmul.f32 %v2632_v45, %v3800_v60 }
0x1159   : > { %v2638_v59 = vadd.f32 1e-05, %v2636_v0 }
0x115b   : > { %3218 = vrsqrt.f32 %v2638_v59  ;;  %vm2646_vm11 = vweird.f32 %v2638_v59 }
0x1161   : > { %v3219_v44 = vpop.eup %3218 }
0x1162   : > { %v2641_v13 = vmul.f32 %v3219_v44, %v2638_v59  ;;  %vm2647_vm10 = vweird.f32 %v3219_v44  ;;  %v2777_v59 = vperm.slane %v3506_v31, 0 }
0x1163   : > { %vm2648_vm12 = vmor %vm2646_vm11, %vm2647_vm10 }
0x1164   : > { %v2642_v50 = vmul.f32 %v3219_v44, %v2641_v13  ;;  %v2780_v13 = vperm.slane %v3509_v32, 0 }
0x1166   : > { %v2643_v2 = vmul.f32 0.5, %v2642_v50 }
0x1168   : > { %v2644_v4 = vsub.f32 1.5, %v2643_v2 }
0x116a   : > { %v2645_v36 = vmul.f32 %v3219_v44, %v2644_v4 }
0x116c   : > { %v2649_v14 = vsel %vm2648_vm12, %v3219_v44, %v2645_v36 }
0x116d   : > { %v2660_v20 = vmul.f32 %v2649_v14, %v2626_v10  ;;  %v2635_v55 = vpop.xlane.xlu0 %2634 }
0x116e   : > { %v2637_v62 = vmul.f32 %v2635_v55, %v3800_v60 }
0x116f   : > { %v2663_v18 = vmul.f32 %v3146_v48, %v2660_v20 }
0x1170   : > { %v2639_v51 = vadd.f32 1e-05, %v2637_v62 }
0x1171   : > { %v2666_v17 = vadd.f32 %v3147_v19, %v2663_v18 }
0x1172   : > { %3220 = vrsqrt.f32 %v2639_v51  ;;  %vm2656_vm14 = vweird.f32 %v2639_v51 }
0x1173   : > { %2986 = vmatmul.msk.f32.vlgmr.msra.gmra.mxu3 %vm1149_vm2, %v2666_v17 }
0x1178   : > { %v3221_v7 = vpop.eup %3220 }
0x1179   : > { %v2651_v43 = vmul.f32 %v3221_v7, %v2639_v51  ;;  %vm2657_vm13 = vweird.f32 %v3221_v7 }
0x117a   : > { %vm2658_vm15 = vmor %vm2656_vm14, %vm2657_vm13 }
0x117b   : > { %v2652_v9 = vmul.f32 %v3221_v7, %v2651_v43 }
0x117d   : > { %v2653_v28 = vmul.f32 0.5, %v2652_v9 }
0x117f   : > { %v2654_v27 = vsub.f32 1.5, %v2653_v28 }
0x1181   : > { %v2655_v26 = vmul.f32 %v3221_v7, %v2654_v27 }
0x1183   : > { %v2659_v29 = vsel %vm2658_vm15, %v3221_v7, %v2655_v26 }
0x1184   : > { %v2661_v25 = vmul.f32 %v2659_v29, %v2627_v40 }
0x1186   : > { %v2664_v23 = vmul.f32 %v3146_v48, %v2661_v25 }
0x1188   : > { %v2667_v22 = vadd.f32 %v3147_v19, %v2664_v23 }
0x118a   : > { %2987 = vmatmul.msk.f32.gmra.mxu3 %vm1149_vm2, %v2667_v22 }
0x11f6   : > { %v2692_v3 = vpop.f32.mrf.mxu3 }
0x11f7   : > { %v2693_v52 = vadd.f32 %v2692_v3, %v2668_v24 }
0x11f9   : > { %v2698_v56 = vmax.f32 %v2693_v52, 0.0 }
0x11fb   : > { %2988 = vmatmul.msk.f32.vlgmr.msra.gmra.mxu0 %vm2701_vm0, %v2698_v56 }
0x120d   : > { %v2695_v54 = vpop.f32.mrf.mxu3 }
0x120e   : > { %v2696_v15 = vadd.f32 %v2695_v54, %v2668_v24 }
0x1210   : > { %v2699_v37 = vmax.f32 %v2696_v15, 0.0 }
0x1212   : > { %2989 = vmatmul.msk.f32.gmra.mxu0 %vm2701_vm0, %v2699_v37 }
0x1278   : > { %v2725_v35 = vpop.f32.mrf.mxu0 }
0x1279   : > { %v2726_v12 = vadd.f32 %v2725_v35, %v2700_v16 }
0x127b   : > { %v2731_v8 = vadd.f32 %v2726_v12, %v2666_v17 }
0x127d   : > { %v2733_v11 = vsel %vm1149_vm2, %v2731_v8, 0.0 }
0x127e   : > { %2734 = vadd.xlane.f32.xlu0 %v2733_v11 }
0x128f   : > { %v2728_v1 = vpop.f32.mrf.mxu0 }
0x1290   : > { %v2729_v46 = vadd.f32 %v2728_v1, %v2700_v16 }
0x1292   : > { %v2732_v21 = vadd.f32 %v2729_v46, %v2667_v22 }
0x1294   : > { %v2736_v63 = vsel %vm1149_vm2, %v2732_v21, 0.0 }
0x1295   : > { %2737 = vadd.xlane.f32.xlu2 %v2736_v63 }
0x12f1   : > { %v2735_v38 = vpop.xlane.xlu0 %2734 }
0x12f2   : > { %v2739_v61 = vmul.f32 %v2735_v38, %v3800_v60 }
0x12f4   : > { %v2741_v53 = vsub.f32 %v2731_v8, %v2739_v61 }
0x12f6   : > { %v2743_v39 = vmul.f32 %v2741_v53, %v2741_v53 }
0x12f8   : > { %v2745_v33 = vsel %vm1149_vm2, %v2743_v39, 0.0 }
0x12f9   : > { %2746 = vadd.xlane.f32.xlu1 %v2745_v33 }
0x1308   : > { %v2738_v30 = vpop.xlane.xlu2 %2737 }
0x1309   : > { %v2740_v47 = vmul.f32 %v2738_v30, %v3800_v60 }
0x130b   : > { %v2742_v41 = vsub.f32 %v2732_v21, %v2740_v47 }
0x130d   : > { %v2744_v42 = vmul.f32 %v2742_v41, %v2742_v41 }
0x130f   : > { %v2748_v10 = vsel %vm1149_vm2, %v2744_v42, 0.0 }
0x1310   : > { %2749 = vadd.xlane.f32.xlu0 %v2748_v10 }
0x136c   : > { %v2747_v34 = vpop.xlane.xlu1 %2746 }
0x136d   : > { %v2751_v5 = vmul.f32 %v2747_v34, %v3800_v60 }
0x136f   : > { %v2753_v6 = vadd.f32 1e-05, %v2751_v5 }
0x1371   : > { %3222 = vrsqrt.f32 %v2753_v6  ;;  %vm2761_vm3 = vweird.f32 %v2753_v6 }
0x1377   : > { %v3223_v58 = vpop.eup %3222 }
0x1378   : > { %v2756_v40 = vmul.f32 %v3223_v58, %v2753_v6  ;;  %vm2762_vm1 = vweird.f32 %v3223_v58 }
0x1379   : > { %vm2763_vm4 = vmor %vm2761_vm3, %vm2762_vm1 }
0x137a   : > { %v2757_v49 = vmul.f32 %v3223_v58, %v2756_v40 }
0x137c   : > { %v2758_v57 = vmul.f32 0.5, %v2757_v49 }
0x137e   : > { %v2759_v45 = vsub.f32 1.5, %v2758_v57 }
0x1380   : > { %v2760_v0 = vmul.f32 %v3223_v58, %v2759_v45 }
0x1382   : > { %v2764_v44 = vsel %vm2763_vm4, %v3223_v58, %v2760_v0 }
0x1383   : > { %v2775_v50 = vmul.f32 %v2764_v44, %v2741_v53  ;;  %v2750_v2 = vpop.xlane.xlu0 %2749 }
0x1384   : > { %v2752_v4 = vmul.f32 %v2750_v2, %v3800_v60 }
0x1385   : > { %v2778_v36 = vmul.f32 %v2777_v59, %v2775_v50 }
0x1386   : > { %v2754_v48 = vadd.f32 1e-05, %v2752_v4 }
0x1387   : > { %v2781_v14 = vadd.f32 %v2780_v13, %v2778_v36 }
0x1388   : > { %3224 = vrsqrt.f32 %v2754_v48  ;;  %vm2771_vm6 = vweird.f32 %v2754_v48 }
0x1389   : > { %2783 = vst.msk [vmem:[#allocation3] sm:$0xff] %vm1149_vm2, %v2781_v14 }
0x138e   : > { %v3225_v20 = vpop.eup %3224 }
0x138f   : > { %v2766_v55 = vmul.f32 %v3225_v20, %v2754_v48  ;;  %vm2772_vm5 = vweird.f32 %v3225_v20 }
0x1390   : > { %vm2773_vm7 = vmor %vm2771_vm6, %vm2772_vm5 }
0x1391   : > { %v2767_v19 = vmul.f32 %v3225_v20, %v2766_v55 }
0x1393   : > { %v2768_v62 = vmul.f32 0.5, %v2767_v19 }
0x1395   : > { %v2769_v18 = vsub.f32 1.5, %v2768_v62 }
0x1397   : > { %v2770_v31 = vmul.f32 %v3225_v20, %v2769_v18 }
0x1399   : > { %v2774_v32 = vsel %vm2773_vm7, %v3225_v20, %v2770_v31 }
0x139a   : > { %v2776_v51 = vmul.f32 %v2774_v32, %v2742_v41 }
0x139c   : > { %v2779_v17 = vmul.f32 %v2777_v59, %v2776_v51 }
0x139e   : > { %v2782_v7 = vadd.f32 %v2780_v13, %v2779_v17 }
0x13a0   : > { %2784 = vst.msk [vmem:[#allocation3 + $0x8] sm:$0xff] %vm1149_vm2, %v2782_v7 }
0x13a1 PF: > { %p2990_p9 = scmp.ne.s32.totalorder %s3357_s22, 3 }
0x13a3   : > { %2788 = sbr.rel (%p2990_p9) target bundleno = 5170 (0x1432), region = 60 }
0x13a8   : > { %v2794_v60 = vld [vmem:[%s4031_s3 + $0x18] sm:$0xff]  ;;  %v2793_v43 = vld [vmem:[%s4031_s3 + $0x10] sm:$0xff]  ;;  %v2792_v9 = vld [vmem:[%s4031_s3 + $0x8] sm:$0xff]  ;;  %vm2799_vm2 = vcmask 261120  }
0x13a9   : > { %2818 = vmatpush.msra.mxu0 %v2794_v60  ;;  %2995 = vmatpush.msra.mxu1 %v2794_v60  ;;  %v2791_v28 = vld [vmem:[%s4031_s3] sm:$0xff]  ;;  %v2789_v27 = vld [vmem:[#allocation3] sm:$0xff]  ;;  %v2790_v26 = vld [vmem:[#allocation3 + $0x8] sm:$0xff] }
0x13aa   : > { %v3226_v29 = vld [vmem:[%s4032_s4] ss:$0 sm:$0xff] }
0x13ab   : > { %2819 = vmatpush.msra.mxu0 %v2793_v43  ;;  %2996 = vmatpush.msra.mxu1 %v2793_v43 }
0x13ad   : > { %2820 = vmatpush.msra.mxu0 %v2792_v9  ;;  %2997 = vmatpush.msra.mxu1 %v2792_v9 }
0x13af   : > { %2821 = vmatpush.msra.mxu0 %v2791_v28  ;;  %2998 = vmatpush.msra.mxu1 %v2791_v28 }
0x13b0   : > { %2991 = vmatmul.msk.f32.vlgmr.msra.gmra.mxu0 %vm2799_vm2, %v2789_v27  ;;  %2992 = vmatmul.msk.f32.vlgmr.msra.gmra.mxu1 %vm2799_vm2, %v2790_v26 }
0x142d   : > { %v2823_v25 = vpop.f32.mrf.mxu0  ;;  %v2826_v23 = vpop.f32.mrf.mxu1 }
0x142e   : > { %v2824_v22 = vadd.f32 %v3226_v29, %v2823_v25  ;;  %v2827_v24 = vadd.f32 %v3226_v29, %v2826_v23 }
0x1430   : > { %2829 = vst [vmem:[%s4033_s5] sm:$0xff] %v2824_v22 }
0x1431   : > { %2830 = vst [vmem:[%s4033_s5 + $0x8] sm:$0xff] %v2827_v24 }
0x1432 PF: > { %p15_p10 = scmp.ge.s32.totalorder %s3360_s23, 6   ;;  %s4036_s18 = smov %s3283_s19 }
0x1433   : > { %s4037_s19 = smov %s3287_s20  ;;  %s4038_s20 = smov %s3370_s26 }
0x1434   : > { %s4039_s21 = smov %s3360_s23  ;;  %17 = sbr.rel (!%p15_p10) target bundleno = 3 (0x3), region = 92 }
0x1439   :  { %2842 = vsyncpa [#allocation5], 1 }
0x143a   :  { %2844 = vsyncpa [#allocation5 + $0x1], 1 }

</bundles_post_ra>
